<compile_context>
chip_gen: v5e
topology: v5e:2x2
jax: 0.10.0
libtpu: 0.0.40
codegen_flags: <defaults>
</compile_context>

<pallas_src>
import functools

import numpy as np
import jax
import jax.numpy as jnp
from jax import lax
from jax.experimental import pallas as pl
from jax.experimental.pallas import tpu as pltpu

KERNEL_WIDTHS = tuple(range(1, 8))  # emit_dims empty -> Conv1d widths 1..7, all -> hidden_dim


def _rup(a, m):
    return ((a + m - 1) // m) * m


# ---------------------------------------------------------------------------
# Fused kernel: (Toeplitz conv + word proj) -> masked time-max -> tanh -> MLP -> scores
# ---------------------------------------------------------------------------
def wordchar_fused_kernel(slab_ref, wcombo_ref, mask_ref, wa_ref, b_ref, x_ref, out_ref,
                          *, L, nkh_pad, h_pad):
    # ONE MXU push: all conv widths x all valid time positions + the wemb @ Wb projection.
    big = jnp.dot(slab_ref[...], wcombo_ref[...],
                  preferred_element_type=jnp.float32)           # [Vb, L*nkh_pad + h_pad] f32

    mask = mask_ref[...]                                        # [L, nkh_pad] additive (0 / -1e30)

    # Masked max over the L time positions: lane-aligned static slices, pure VPU work.
    pooled = big[:, 0:nkh_pad] + mask[0:1, :]
    for t in range(1, L):
        pooled = jnp.maximum(pooled,
                             big[:, t * nkh_pad:(t + 1) * nkh_pad] + mask[t:t + 1, :])

    feat = jnp.tanh(pooled).astype(jnp.bfloat16)                # [Vb, nkh_pad], one EUP pass
    wproj = big[:, L * nkh_pad:L * nkh_pad + h_pad]             # wemb @ Wb, from the same matmul

    # y = tanh(sum_k feat_k @ Wa + wemb @ Wb + b); sum over widths folded into wa (tiled NK x).
    y = jnp.tanh(jnp.dot(feat, wa_ref[...], preferred_element_type=jnp.float32)
                 + wproj + b_ref[...])                          # [Vb, h_pad] f32

    # out[b, v] = sum_h x[b, h] * y[v, h]  (tiny M=Bpad matmul; kept f32 for output precision)
    out_ref[...] = lax.dot_general(x_ref[...], y, (((1,), (1,)), ((), ())),
                                   preferred_element_type=jnp.float32)


# ---------------------------------------------------------------------------
# One-time host-side parameter packing (call once per vocab / parameter set)
# ---------------------------------------------------------------------------
def pack_wordchar_params(char_embs, conv_ws_pt, wmlp, bmlp, wemb, *, v_blk=1024):
    V, L, C = char_embs.shape
    H = conv_ws_pt[0].shape[0]
    Dw = wemb.shape[1]
    NK = len(conv_ws_pt)
    assert L >= NK, f"char buffer length {L} must be >= widest conv kernel {NK}"

    nkh = NK * H
    nkh_pad = _rup(nkh, 128)
    h_pad = _rup(H, 128)
    S = _rup(L * C + Dw, 128)
    ncol = L * nkh_pad + h_pad

    # Vocab block: lane-dense (multiple of 128), no bigger than needed, even block count
    # so both v7x TensorCores get equal work.
    v_blk = max(128, _rup(min(v_blk, _rup(V, 128)), 128))
    n_blk = -(-V // v_blk)
    n_blk += n_blk % 2
    Vp = n_blk * v_blk

    # Per-vocab streaming slab: [chars flattened | word emb | zero pad], bf16, lane-dense.
    slab = jnp.zeros((Vp, S), jnp.bfloat16)
    slab = slab.at[:V, :L * C].set(char_embs.reshape(V, L * C).astype(jnp.bfloat16))
    slab = slab.at[:V, L * C:L * C + Dw].set(wemb.astype(jnp.bfloat16))

    # Block-Toeplitz conv weights + word projection packed into one [S, ncol] matrix.
    #   wcombo[(t+dk)*C + c, t*nkh_pad + (k-1)*H + h] = W_k[h, c, dk]   (valid t only)
    #   wcombo[L*C + d,      L*nkh_pad + h]           = wmlp[h, H + d]
    wcombo = np.zeros((S, ncol), np.float32)
    for ki, Wk in enumerate(conv_ws_pt):                 # Wk: [H, C, k]  (PyTorch Conv1d layout)
        k = ki + 1
        Wk_np = np.asarray(Wk)
        for t in range(L - k + 1):
            col0 = t * nkh_pad + ki * H
            for dk in range(k):
                wcombo[(t + dk) * C:(t + dk + 1) * C, col0:col0 + H] = Wk_np[:, :, dk].T
    wcombo[L * C:L * C + Dw, L * nkh_pad:L * nkh_pad + H] = np.asarray(wmlp[:, H:]).T
    wcombo = jnp.asarray(wcombo, jnp.bfloat16)

    # Additive time mask: -1e30 where conv position t is invalid for width k, 0 elsewhere.
    mask = np.zeros((L, nkh_pad), np.float32)
    for ki in range(NK):
        k = ki + 1
        for t in range(L):
            if t + k > L:
                mask[t, ki * H:(ki + 1) * H] = -1e30
    mask = jnp.asarray(mask)

    # MLP weight on features, tiled NK times (folds the sum over widths into the matmul).
    wa = np.zeros((nkh_pad, h_pad), np.float32)
    wa[:nkh, :H] = np.tile(np.asarray(wmlp[:, :H]).T, (NK, 1))
    wa = jnp.asarray(wa, jnp.bfloat16)

    bias = jnp.zeros((1, h_pad), jnp.float32).at[0, :H].set(bmlp.astype(jnp.float32))

    packed = dict(slab=slab, wcombo=wcombo, mask=mask, wa=wa, bias=bias)
    meta = dict(V=V, L=L, H=H, S=S, ncol=ncol, nkh_pad=nkh_pad, h_pad=h_pad,
                v_blk=v_blk, Vp=Vp)
    return packed, meta


# ---------------------------------------------------------------------------
# Forward: one gridded pallas_call over vocab blocks
# ---------------------------------------------------------------------------
def wordchar_scores(x, packed, meta):
    B, H = x.shape
    assert H == meta["H"]
    L, S, ncol = meta["L"], meta["S"], meta["ncol"]
    nkh_pad, h_pad = meta["nkh_pad"], meta["h_pad"]
    v_blk, Vp = meta["v_blk"], meta["Vp"]

    Bp = max(8, _rup(B, 8))                               # unmasked sublane stores on the output
    x_pad = jnp.zeros((Bp, h_pad), jnp.float32).at[:B, :H].set(x.astype(jnp.float32))

    kernel = functools.partial(wordchar_fused_kernel, L=L, nkh_pad=nkh_pad, h_pad=h_pad)

    # VMEM budget from the actual block sizes (double-buffered I/O + f32 intermediates),
    # capped at 48 MiB so the kernel stays safe on v7x's 64 MiB physical VMEM.
    vmem_est = (2 * (v_blk * S * 2)            # streaming slab (bf16, double-buffered)
                + 2 * (S * ncol * 2)           # packed combo weight (bf16)
                + 2 * (Bp * v_blk * 4)         # output block
                + 3 * (v_blk * ncol * 4)       # big matmul result + temporaries headroom
                + (1 << 22))                   # small residents + slack
    vmem_limit = int(min(max(vmem_est, 32 * 1024 * 1024), 48 * 1024 * 1024))

    out = pl.pallas_call(
        kernel,
        out_shape=jax.ShapeDtypeStruct((Bp, Vp), jnp.float32),
        grid=(Vp // v_blk,),
        in_specs=[
            pl.BlockSpec((v_blk, S), lambda j: (j, 0)),        # per-vocab slab (streamed over V)
            pl.BlockSpec((S, ncol), lambda j: (0, 0)),         # block-Toeplitz + wb (resident)
            pl.BlockSpec((L, nkh_pad), lambda j: (0, 0)),      # additive time mask (resident)
            pl.BlockSpec((nkh_pad, h_pad), lambda j: (0, 0)),  # wa tiled NK times (resident)
            pl.BlockSpec((1, h_pad), lambda j: (0, 0)),        # bias (resident)
            pl.BlockSpec((Bp, h_pad), lambda j: (0, 0)),       # queries x (resident)
        ],
        out_specs=pl.BlockSpec((Bp, v_blk), lambda j: (0, j)),  # lane-dense [Bpad, V_BLK] store
        compiler_params=pltpu.CompilerParams(
            dimension_semantics=("parallel",),                  # shard V blocks across TCs (v7x)
            vmem_limit_bytes=vmem_limit),
    )(packed["slab"], packed["wcombo"], packed["mask"], packed["wa"], packed["bias"], x_pad)
    return out[:B, :meta["V"]]


# ---------------------------------------------------------------------------
# Pure-JAX reference (mirrors the PyTorch forward exactly)
# ---------------------------------------------------------------------------
def reference_forward(x, char_embs, conv_ws_pt, wmlp, bmlp, wemb):
    conv_input = jnp.transpose(char_embs, (0, 2, 1))            # NCW: [V, C, L]
    outs = []
    for W in conv_ws_pt:                                        # W: [H, C, k]
        o = lax.conv_general_dilated(conv_input, W, (1,), 'VALID',
                                     dimension_numbers=('NCH', 'OIH', 'NCH'),
                                     precision=lax.Precision.HIGHEST)
        outs.append(jnp.tanh(jnp.max(o, axis=-1)))              # [V, H]
    feat = jnp.sum(jnp.stack(outs, -1), -1)                     # [V, H]
    y = jnp.tanh(jnp.dot(jnp.concatenate([feat, wemb], -1), wmlp.T,
                         precision=lax.Precision.HIGHEST) + bmlp)
    return jnp.dot(x, y.T, precision=lax.Precision.HIGHEST)


if __name__ == "__main__":
    # ---- synthetic vocabulary (replicates process_vocab host-side) ----
    words = ["the", "cat", "sat", "on", "a", "mat", "python", "kernel",
             "tensor", "pallas", "tpu", "core", "vmem", "dot", "max", "tanh"]
    V = len(words)
    max_len = max(len(w) for w in words) + 2                    # <bow> + chars + <eow>
    i2c = ['<cpad>', '<bow>', '<eow>'] + sorted({c for w in words for c in w})
    c2i = {c: i for i, c in enumerate(i2c)}
    n_chars = len(i2c)

    char_buffer = np.zeros((V, max_len), dtype=np.int32)        # pad_idx = 0
    for i, w in enumerate(words):
        toks = ['<bow>'] + list(w) + ['<eow>']
        for t, ch in enumerate(toks):
            char_buffer[i, t] = c2i[ch]
    char_buffer = jnp.asarray(char_buffer)

    # ---- shapes ----
    emb_dim, hidden_dim, word_dim, batch = 8, 32, 16, 4

    # ---- deterministic parameters ----
    keys = jax.random.split(jax.random.PRNGKey(0), 12)
    char_emb_table = 0.1 * jax.random.normal(keys[0], (n_chars, emb_dim), jnp.float32)
    char_emb_table = char_emb_table.at[0].set(0.0)              # padding_idx row = 0
    word_vectors = jax.random.normal(keys[1], (V, word_dim), jnp.float32)

    conv_ws_pt = []
    for ki, k in enumerate(KERNEL_WIDTHS):                      # PyTorch layout [H, C, k]
        scale = 1.0 / np.sqrt(emb_dim * k)
        conv_ws_pt.append(scale * jax.random.normal(keys[2 + ki],
                                                    (hidden_dim, emb_dim, k), jnp.float32))

    wmlp = (1.0 / np.sqrt(hidden_dim + word_dim)) * jax.random.normal(
        keys[9], (hidden_dim, hidden_dim + word_dim), jnp.float32)
    bmlp = 0.1 * jax.random.normal(keys[10], (hidden_dim,), jnp.float32)

    x = jax.random.normal(keys[11], (batch, hidden_dim), jnp.float32)

    # ---- embedding lookup (glue, plain JAX gather; vocab-static) ----
    char_embs = jnp.take(char_emb_table, char_buffer, axis=0)   # [V, max_len, emb_dim]

    # ---- one-time host-side packing, then the fused Pallas forward ----
    packed, meta = pack_wordchar_params(char_embs, conv_ws_pt, wmlp, bmlp, word_vectors)
    out = wordchar_scores(x, packed, meta)
    out = jax.block_until_ready(out)

    # ---- verify against pure-JAX reference on the bf16-rounded operands the kernel uses ----
    rnd = lambda a: a.astype(jnp.bfloat16).astype(jnp.float32)
    ref = reference_forward(x, rnd(char_embs), [rnd(w) for w in conv_ws_pt],
                            rnd(wmlp), bmlp, rnd(word_vectors))
    np.testing.assert_allclose(np.asarray(out), np.asarray(ref), rtol=2e-2, atol=3e-2)

    print("KERNEL_OK")
</pallas_src>

<mosaic_0001>
module attributes {stable_mosaic.version = 11 : i64} {
  func.func @wordchar_fused_kernel(%arg0: i32, %arg1: memref<128x128xbf16, #tpu.memory_space<vmem>>, %arg2: memref<128x2176xbf16, #tpu.memory_space<vmem>>, %arg3: memref<8x256xf32, #tpu.memory_space<vmem>>, %arg4: memref<256x128xbf16, #tpu.memory_space<vmem>>, %arg5: memref<1x128xf32, #tpu.memory_space<vmem>>, %arg6: memref<8x128xf32, #tpu.memory_space<vmem>>, %arg7: memref<8x128xf32, #tpu.memory_space<vmem>>) attributes {dimension_semantics = [#tpu.dimension_semantics<parallel>], iteration_bounds = array<i64: 2>, scalar_prefetch = 0 : i64, scratch_operands = 0 : i64, tpu.core_type = #tpu.core_type<tc>, window_params = [{transform_indices = @transform_0, window_bounds = array<i64: 128, 128>}, {pipeline_mode = #tpu.pipeline_mode<synchronous>, transform_indices = @transform_1, window_bounds = array<i64: 128, 2176>}, {pipeline_mode = #tpu.pipeline_mode<synchronous>, transform_indices = @transform_2, window_bounds = array<i64: 8, 256>}, {pipeline_mode = #tpu.pipeline_mode<synchronous>, transform_indices = @transform_3, window_bounds = array<i64: 256, 128>}, {pipeline_mode = #tpu.pipeline_mode<synchronous>, transform_indices = @transform_4, window_bounds = array<i64: 1, 128>}, {pipeline_mode = #tpu.pipeline_mode<synchronous>, transform_indices = @transform_5, window_bounds = array<i64: 8, 128>}, {transform_indices = @transform_6, window_bounds = array<i64: 8, 128>}]} {
    %c0 = arith.constant 0 : index
    %c0_0 = arith.constant 0 : index
    %0 = vector.load %arg1[%c0, %c0_0] : memref<128x128xbf16, #tpu.memory_space<vmem>>, vector<128x128xbf16>
    %c0_1 = arith.constant 0 : index
    %c0_2 = arith.constant 0 : index
    %1 = vector.load %arg2[%c0_1, %c0_2] : memref<128x2176xbf16, #tpu.memory_space<vmem>>, vector<128x2176xbf16>
    %cst = arith.constant dense<0.000000e+00> : vector<128x2176xf32>
    %2 = tpu.matmul %0, %1, %cst {dimension_numbers = #tpu.dot_dimension_numbers<[1], [0], [0], [1], [0, 0, 1, 1], [], []>} : vector<128x128xbf16>, vector<128x2176xbf16>, vector<128x2176xf32> -> vector<128x2176xf32>
    %c0_3 = arith.constant 0 : index
    %c0_4 = arith.constant 0 : index
    %3 = vector.load %arg3[%c0_3, %c0_4] : memref<8x256xf32, #tpu.memory_space<vmem>>, vector<8x256xf32>
    %4 = vector.extract_strided_slice %2 {offsets = [0, 0], sizes = [128, 256], strides = [1, 1]} : vector<128x2176xf32> to vector<128x256xf32>
    %5 = vector.extract_strided_slice %3 {offsets = [0, 0], sizes = [1, 256], strides = [1, 1]} : vector<8x256xf32> to vector<1x256xf32>
    %6 = vector.broadcast %5 : vector<1x256xf32> to vector<128x256xf32>
    %7 = arith.addf %4, %6 : vector<128x256xf32>
    %8 = vector.extract_strided_slice %2 {offsets = [0, 256], sizes = [128, 256], strides = [1, 1]} : vector<128x2176xf32> to vector<128x256xf32>
    %9 = vector.extract_strided_slice %3 {offsets = [1, 0], sizes = [1, 256], strides = [1, 1]} : vector<8x256xf32> to vector<1x256xf32>
    %10 = vector.broadcast %9 : vector<1x256xf32> to vector<128x256xf32>
    %11 = arith.addf %8, %10 : vector<128x256xf32>
    %12 = arith.maximumf %7, %11 : vector<128x256xf32>
    %13 = vector.extract_strided_slice %2 {offsets = [0, 512], sizes = [128, 256], strides = [1, 1]} : vector<128x2176xf32> to vector<128x256xf32>
    %14 = vector.extract_strided_slice %3 {offsets = [2, 0], sizes = [1, 256], strides = [1, 1]} : vector<8x256xf32> to vector<1x256xf32>
    %15 = vector.broadcast %14 : vector<1x256xf32> to vector<128x256xf32>
    %16 = arith.addf %13, %15 : vector<128x256xf32>
    %17 = arith.maximumf %12, %16 : vector<128x256xf32>
    %18 = vector.extract_strided_slice %2 {offsets = [0, 768], sizes = [128, 256], strides = [1, 1]} : vector<128x2176xf32> to vector<128x256xf32>
    %19 = vector.extract_strided_slice %3 {offsets = [3, 0], sizes = [1, 256], strides = [1, 1]} : vector<8x256xf32> to vector<1x256xf32>
    %20 = vector.broadcast %19 : vector<1x256xf32> to vector<128x256xf32>
    %21 = arith.addf %18, %20 : vector<128x256xf32>
    %22 = arith.maximumf %17, %21 : vector<128x256xf32>
    %23 = vector.extract_strided_slice %2 {offsets = [0, 1024], sizes = [128, 256], strides = [1, 1]} : vector<128x2176xf32> to vector<128x256xf32>
    %24 = vector.extract_strided_slice %3 {offsets = [4, 0], sizes = [1, 256], strides = [1, 1]} : vector<8x256xf32> to vector<1x256xf32>
    %25 = vector.broadcast %24 : vector<1x256xf32> to vector<128x256xf32>
    %26 = arith.addf %23, %25 : vector<128x256xf32>
    %27 = arith.maximumf %22, %26 : vector<128x256xf32>
    %28 = vector.extract_strided_slice %2 {offsets = [0, 1280], sizes = [128, 256], strides = [1, 1]} : vector<128x2176xf32> to vector<128x256xf32>
    %29 = vector.extract_strided_slice %3 {offsets = [5, 0], sizes = [1, 256], strides = [1, 1]} : vector<8x256xf32> to vector<1x256xf32>
    %30 = vector.broadcast %29 : vector<1x256xf32> to vector<128x256xf32>
    %31 = arith.addf %28, %30 : vector<128x256xf32>
    %32 = arith.maximumf %27, %31 : vector<128x256xf32>
    %33 = vector.extract_strided_slice %2 {offsets = [0, 1536], sizes = [128, 256], strides = [1, 1]} : vector<128x2176xf32> to vector<128x256xf32>
    %34 = vector.extract_strided_slice %3 {offsets = [6, 0], sizes = [1, 256], strides = [1, 1]} : vector<8x256xf32> to vector<1x256xf32>
    %35 = vector.broadcast %34 : vector<1x256xf32> to vector<128x256xf32>
    %36 = arith.addf %33, %35 : vector<128x256xf32>
    %37 = arith.maximumf %32, %36 : vector<128x256xf32>
    %38 = vector.extract_strided_slice %2 {offsets = [0, 1792], sizes = [128, 256], strides = [1, 1]} : vector<128x2176xf32> to vector<128x256xf32>
    %39 = vector.extract_strided_slice %3 {offsets = [7, 0], sizes = [1, 256], strides = [1, 1]} : vector<8x256xf32> to vector<1x256xf32>
    %40 = vector.broadcast %39 : vector<1x256xf32> to vector<128x256xf32>
    %41 = arith.addf %38, %40 : vector<128x256xf32>
    %42 = arith.maximumf %37, %41 : vector<128x256xf32>
    %43 = math.tanh %42 : vector<128x256xf32>
    %44 = arith.truncf %43 : vector<128x256xf32> to vector<128x256xbf16>
    %45 = vector.extract_strided_slice %2 {offsets = [0, 2048], sizes = [128, 128], strides = [1, 1]} : vector<128x2176xf32> to vector<128x128xf32>
    %c0_5 = arith.constant 0 : index
    %c0_6 = arith.constant 0 : index
    %46 = vector.load %arg4[%c0_5, %c0_6] : memref<256x128xbf16, #tpu.memory_space<vmem>>, vector<256x128xbf16>
    %cst_7 = arith.constant dense<0.000000e+00> : vector<128x128xf32>
    %47 = tpu.matmul %44, %46, %cst_7 {dimension_numbers = #tpu.dot_dimension_numbers<[1], [0], [0], [1], [0, 0, 1, 1], [], []>} : vector<128x256xbf16>, vector<256x128xbf16>, vector<128x128xf32> -> vector<128x128xf32>
    %48 = arith.addf %47, %45 : vector<128x128xf32>
    %c0_8 = arith.constant 0 : index
    %c0_9 = arith.constant 0 : index
    %49 = vector.load %arg5[%c0_8, %c0_9] : memref<1x128xf32, #tpu.memory_space<vmem>>, vector<1x128xf32>
    %50 = vector.broadcast %49 : vector<1x128xf32> to vector<128x128xf32>
    %51 = arith.addf %48, %50 : vector<128x128xf32>
    %52 = math.tanh %51 : vector<128x128xf32>
    %c0_10 = arith.constant 0 : index
    %c0_11 = arith.constant 0 : index
    %53 = vector.load %arg6[%c0_10, %c0_11] : memref<8x128xf32, #tpu.memory_space<vmem>>, vector<8x128xf32>
    %cst_12 = arith.constant dense<0.000000e+00> : vector<8x128xf32>
    %54 = tpu.matmul %53, %52, %cst_12 {dimension_numbers = #tpu.dot_dimension_numbers<[1], [1], [0], [0], [0, 0, 1, 0], [], []>} : vector<8x128xf32>, vector<128x128xf32>, vector<8x128xf32> -> vector<8x128xf32>
    %c0_13 = arith.constant 0 : index
    %c0_14 = arith.constant 0 : index
    %55 = vector.load %arg7[%c0_13, %c0_14] : memref<8x128xf32, #tpu.memory_space<vmem>>, vector<8x128xf32>
    tpu.vector_store %arg7[%c0_13, %c0_14], %54 {strides = array<i32>} : memref<8x128xf32, #tpu.memory_space<vmem>>, vector<8x128xf32>,
    return
  }
  func.func @transform_0(%arg0: i32) -> (i32, i32) {
    %c0_i32 = arith.constant 0 : i32
    %c0_i32_0 = arith.constant 0 : i32
    return %arg0, %c0_i32 : i32, i32
  }
  func.func @transform_1(%arg0: i32) -> (i32, i32) {
    %c0_i32 = arith.constant 0 : i32
    %c0_i32_0 = arith.constant 0 : i32
    %c0_i32_1 = arith.constant 0 : i32
    return %c0_i32, %c0_i32_0 : i32, i32
  }
  func.func @transform_2(%arg0: i32) -> (i32, i32) {
    %c0_i32 = arith.constant 0 : i32
    %c0_i32_0 = arith.constant 0 : i32
    %c0_i32_1 = arith.constant 0 : i32
    return %c0_i32, %c0_i32_0 : i32, i32
  }
  func.func @transform_3(%arg0: i32) -> (i32, i32) {
    %c0_i32 = arith.constant 0 : i32
    %c0_i32_0 = arith.constant 0 : i32
    %c0_i32_1 = arith.constant 0 : i32
    return %c0_i32, %c0_i32_0 : i32, i32
  }
  func.func @transform_4(%arg0: i32) -> (i32, i32) {
    %c0_i32 = arith.constant 0 : i32
    %c0_i32_0 = arith.constant 0 : i32
    %c0_i32_1 = arith.constant 0 : i32
    return %c0_i32, %c0_i32_0 : i32, i32
  }
  func.func @transform_5(%arg0: i32) -> (i32, i32) {
    %c0_i32 = arith.constant 0 : i32
    %c0_i32_0 = arith.constant 0 : i32
    %c0_i32_1 = arith.constant 0 : i32
    return %c0_i32, %c0_i32_0 : i32, i32
  }
  func.func @transform_6(%arg0: i32) -> (i32, i32) {
    %c0_i32 = arith.constant 0 : i32
    %c0_i32_0 = arith.constant 0 : i32
    return %c0_i32, %arg0 : i32, i32
  }
}

</mosaic_0001>

<bundles_post_ra>
// kernel: tpu_custom_call.1
= control target key start
LH: loop header
LB: loop body
LE: loop exit
PB: predicated region body
PF: predicated region fallthrough
CT: control target
= control target key end

     0   :  { %11 = vsyncpa [#allocation3], 0  ;;  %s5910_s0 = inlined_call_operand.hbm [shape: bf16[256,128], index: 0, kind: input, shape index: {}]   ;;  %s5911_s1 = inlined_call_operand.hbm [shape: bf16[128,2176], index: 1, kind: input, shape index: {}]   ;;  %s5912_s2 = inlined_call_operand.hbm [shape: f32[8,256], index: 2, kind: input, shape index: {}]   ;;  %s5913_s3 = inlined_call_operand.hbm [shape: bf16[256,128], index: 3, kind: input, shape index: {}]   ;;  %s5914_s4 = inlined_call_operand.vmem [shape: f32[1,128], index: 4, kind: input, shape index: {}]   ;;  %s5915_s5 = inlined_call_operand.hbm [shape: f32[8,128], index: 5, kind: input, shape index: {}]   ;;  %s5916_s6 = inlined_call_operand.hbm [shape: f32[8,256], index: 6, kind: output, shape index: {}]  }
   0x1   :  { %13 = vsyncpa [#allocation3 + $0x1], 0 }
   0x2   :  { %14 = vsyncpa [#allocation6], 0 }
   0x3   :  { %15 = vsyncpa [#allocation9], 0 }
   0x4   :  { %16 = vsyncpa [#allocation4], 0 }
   0x5   :  { %18 = vsyncpa [#allocation4 + $0x1], 0  ;;  %s4339_s21 = smov 0   ;;  %s4341_s22 = smov 0  }
   0x6   :  { %s4343_s23 = smov 0   ;;  %s4345_s24 = smov 0  }
   0x7 LB: > { %s4360_s25 = sadd.s32 4294967295, %s4294_s24   ;;  %s3018_s26 = sadd.s32 4294967294, %s4294_s24   ;;  %s4294_s24 = sphi %s4345_s24, %s6056_s24   ;;  %s4290_s23 = sphi %s4343_s23, %s6055_s23   ;;  %s4286_s22 = sphi %s4341_s22, %s6054_s22   ;;  %s4282_s21 = sphi %s4339_s21, %s6053_s21  }
   0x8   : > { %p44_p0 = scmp.ne.s32.totalorder %s4286_s22, %s4282_s21  ;;  %p45_p1 = scmp.eq.s32.totalorder %s4360_s25, 0 }
   0x9   : > { %p173_p2 = scmp.eq.s32.totalorder %s4360_s25, 1  ;;  %p179_p3 = scmp.eq.s32.totalorder %s3018_s26, 1 }
   0xa   : > { %p4369_p4 = por %p45_p1, %p44_p0  ;;  %p3019_p5 = scmp.ge.s32.totalorder %s4294_s24, 1 }
   0xb   : > { %p4374_p6 = por %p179_p3, %p44_p0  ;;  %p186_p7 = scmp.lt.s32.totalorder %s4294_s24, 3 }
   0xc   : > { %s197_s7 = sshll.u32 %s5911_s1, 4  ;;  %s4296_s9 = smov [#allocation5]   ;;  %s198_s7 = int_to_ptr.hbm [resolvable:$true] %s197_s7 }
   0xd   : > { %p4382_p8 = pnand %p3019_p5, %p186_p7  ;;  %s199_s10 = sshll.u32 %s4296_s9, 4  ;;  %s200_s10 = int_to_ptr.vmem [resolvable:$true] %s199_s10 }
   0xe   : > { %s223_s14 = sshll.u32 %s5913_s3, 4  ;;  %s4297_s15 = smov 1088   ;;  %s224_s14 = int_to_ptr.hbm [resolvable:$true] %s223_s14 }
   0xf   : > { %p3884_p9 = pneg %p4382_p8  ;;  %s4298_s16 = smov 68  }
  0x10   : > { %s4299_s17 = smov [#allocation8]   ;;  %s5917_s19 = smov 64  }
  0x11   : > { %p4390_p10 = pnand %p3884_p9, %p45_p1  ;;  %s225_s18 = sshll.u32 %s4299_s17, 4  ;;  %s226_s18 = int_to_ptr.vmem [resolvable:$true] %s225_s18 }
  0x12   : > { %s5918_s20 = smov 4   ;;  %s212_s30 = sshll.u32 %s5912_s2, 4  ;;  %s213_s30 = int_to_ptr.hbm [resolvable:$true] %s212_s30 }
  0x13   : > { %3887 = dma.hbm_to_vmem [thread:$0]  (!%p4390_p10), %s198_s7, 17408, %s200_s10, [#allocation6], %s4297_s15, %s4297_s15, %s4298_s16  }
  0x14   : > { %3893 = dma.hbm_to_vmem [thread:$0]  (!%p4390_p10), %s224_s14, 2048, %s226_s18, [#allocation9], %s5917_s19, %s5917_s19, %s5918_s20  }
  0x15   : > { %s4302_s7 = smov [#allocation7]   ;;  %s241_s13 = sshll.u32 %s5915_s5, 4  ;;  %s242_s13 = int_to_ptr.hbm [resolvable:$true] %s241_s13 }
  0x16   : > { %s214_s9 = sshll.u32 %s4302_s7, 4  ;;  %s4303_s14 = smov [#allocation10]   ;;  %s215_s9 = int_to_ptr.vmem [resolvable:$true] %s214_s9 }
  0x17   : > { %3890 = dma.hbm_to_vmem [thread:$0]  (!%p4390_p10), %s213_s30, 256, %s215_s9, [#allocation6]  }
  0x18   : > { %s243_s15 = sshll.u32 %s4303_s14, 4  ;;  %s4416_s16 = sadd.s32 1, %s4294_s24   ;;  %s244_s15 = int_to_ptr.vmem [resolvable:$true] %s243_s15 }
  0x19   : > { %3896 = dma.hbm_to_vmem [thread:$0]  (!%p4390_p10), %s242_s13, 128, %s244_s15, [#allocation9]  }
  0x1a   : > { %s31_s17 = sadd.s32 1, %s4290_s23  ;;  %s28_s18 = ssub.s32 %s4294_s24, %s4416_s16 }
  0x1b   : > { %p38_p12 = scmp.ne.s32.totalorder %s4290_s23, %s4286_s22  ;;  %p29_p13 = scmp.eq.s32.totalorder %s28_s18, 0 }
  0x1c   : > { %p39_p0 = scmp.eq.s32.totalorder %s4294_s24, 0  ;;  %p3909_p5 = scmp.lt.s32.totalorder %s4294_s24, 2 }
  0x1d   : > { %p4426_p3 = por %p173_p2, %p38_p12  ;;  %s254_s30 = sand.u32 1, %s4290_s23  }
  0x1e   : > { %s4432_s29 = scalar_select %p29_p13, %s4290_s23, %s31_s17  }
  0x1f   : > { %p40_p7 = por %p39_p0, %p38_p12  ;;  %s3025_s11 = sshll.u32 %s254_s30, 6 }
  0x20   : > { %s3679_s7 = sshll.u32 %s4294_s24, 6  ;;  %s258_s13 = scalar_lea.vmem [#allocation2], %s3025_s11 }
  0x21   : > { %s263_s12 = scalar_lea.hbm %s5910_s0, %s3679_s7  ;;  %s266_s14 = sshll.u32 %s258_s13, 4  ;;  %s267_s14 = int_to_ptr.vmem [resolvable:$true] %s266_s14 }
  0x22   : > { %s264_s15 = sshll.u32 %s263_s12, 4  ;;  %p4439_p2 = pnand %p3909_p5, %p40_p7  ;;  %s265_s15 = int_to_ptr.hbm [resolvable:$true] %s264_s15 }
  0x23   : > { %s255_s17 = scalar_lea.sflag [#allocation3], %s254_s30  ;;  %s4190_s19 = sshra.s32 %s265_s15, 4  ;;  %s4191_s19 = int_to_ptr.hbm [resolvable:$true] %s4190_s19 }
  0x24   : > { %s4192_s20 = scalar_lea.hbm %s4191_s19, 64  ;;  %p4194_p10 = pneg %p4439_p2 }
  0x25   : > { %p4193_p9 = scmp.ne.s32.totalorder %s4191_s19, %s4192_s20  ;;  %s4197_s9 = scalar_lea.hbm %s5910_s0, 128 }
  0x26   : > { %p4198_p0 = scmp.lt.s32.totalorder %s4191_s19, %s5910_s0  ;;  %p4199_p5 = scmp.lt.s32.totalorder %s4197_s9, %s4192_s20 }
  0x27   : > { %p4195_p12 = pnand %p4194_p10, %p4193_p9 }
  0x28   : > { %p4200_p7 = por %p4199_p5, %p4198_p0 }
  0x29   : > { %p4196_p13 = pneg %p4195_p12 }
  0x2b   : > { %p4201_p11 = pnand %p4200_p7, %p4196_p13 }
  0x2d   : > { %4204 = shalt.err (!%p4201_p11)
}
  0x2e   : > { %s5947_s30 = smov 4   ;;  %s5948_s13 = smov 64  }
  0x2f   : > { %3900 = dma.hbm_to_vmem [thread:$0]  (!%p4439_p2), %s265_s15, 1024, %s267_s14, %s255_s17, %s5948_s13, %s5948_s13, %s5947_s30  }
  0x30   : > { %278 = sbr.rel (%p4382_p8) target bundleno = 1189 (0x4a5), region = 44 }
  0x35   : > { %s4459_s7 = sand.u32 1, %s4286_s22  }
  0x36   : > { %s3029_s19 = sshll.u32 %s4459_s7, 6  ;;  %s281_s20 = scalar_lea.sflag [#allocation3], %s4459_s7 }
  0x37   : > { %s4463_s11 = scalar_lea.vmem [#allocation2], %s3029_s19 }
  0x38   : > { %4265 = dma.done.wait (%p4369_p4), %s281_s20, 1024  }
  0x39   : > { %4267 = vsyncadd (%p4369_p4), %s281_s20, 4294966272 }
  0x3a   : > { %4269 = dma.done.wait (%p45_p1), [#allocation6], 17664  }
  0x3b   : > { %4271 = vsyncadd (%p45_p1), [#allocation6], 4294949632 }
  0x3c   : > { %4273 = dma.done.wait (%p45_p1), [#allocation9], 2176  }
  0x3d   : > { %4275 = vsyncadd (%p45_p1), [#allocation9], 4294965120  ;;  %v3545_v0 = vld [vmem:[#allocation5 + $0x3b8] sm:$0xf]  ;;  %v3815_v1 = vld [vmem:[#allocation5 + $0x3f8] sm:$0xf0] }
  0x3e   : > { %v3807_v2 = vld [vmem:[#allocation5 + $0x3bc] sm:$0xf]  ;;  %v3546_v3 = vor.u32 %v3815_v1, %v3545_v0  ;;  %v3547_v4 = vld [vmem:[#allocation5 + $0x3fc] sm:$0xf0]  ;;  %v3816_v6 = vld [vmem:[#allocation5 + $0x400] sm:$0xf0] }
  0x3f   : > { %v3553_v5 = vld [vmem:[#allocation5 + $0x3c0] sm:$0xf]  ;;  %v3550_v7 = vor.u32 %v3807_v2, %v3547_v4  ;;  %v3477_v9 = vld [vmem:[#allocation5 + $0x330] sm:$0xf]  ;;  %v3798_v10 = vld [vmem:[#allocation5 + $0x370] sm:$0xf0] }
  0x40   : > { %v3554_v8 = vor.u32 %v3816_v6, %v3553_v5  ;;  %v3790_v11 = vld [vmem:[#allocation5 + $0x334] sm:$0xf]  ;;  %1231 = vmatpush.bf16.msra.mxu0 %v3546_v3  ;;  %3840 = vmatpush.bf16.msra.mxu3 %v3546_v3  ;;  %v3478_v12 = vor.u32 %v3798_v10, %v3477_v9  ;;  %v3479_v13 = vld [vmem:[#allocation5 + $0x374] sm:$0xf0]  ;;  %v3799_v15 = vld [vmem:[#allocation5 + $0x378] sm:$0xf0] }
  0x41   : > { %v3485_v14 = vld [vmem:[#allocation5 + $0x338] sm:$0xf]  ;;  %1280 = vmatpush.bf16.msra.mxu1 %v3550_v7  ;;  %v3482_v16 = vor.u32 %v3790_v11, %v3479_v13  ;;  %v3409_v18 = vld [vmem:[#allocation5 + $0x2a8] sm:$0xf]  ;;  %v3781_v19 = vld [vmem:[#allocation5 + $0x2e8] sm:$0xf0] }
  0x42   : > { %1329 = vmatpush.bf16.msra.mxu2 %v3554_v8  ;;  %v3486_v17 = vor.u32 %v3799_v15, %v3485_v14  ;;  %v3773_v20 = vld [vmem:[#allocation5 + $0x2ac] sm:$0xf]  ;;  %v3411_v21 = vld [vmem:[#allocation5 + $0x2ec] sm:$0xf0]  ;;  %v3782_v23 = vld [vmem:[#allocation5 + $0x2f0] sm:$0xf0]  ;;  %v3410_v24 = vor.u32 %v3781_v19, %v3409_v18 }
  0x43   : > { %v3417_v22 = vld [vmem:[#allocation5 + $0x2b0] sm:$0xf]  ;;  %v3414_v25 = vor.u32 %v3773_v20, %v3411_v21  ;;  %v3341_v27 = vld [vmem:[#allocation5 + $0x220] sm:$0xf]  ;;  %v3764_v28 = vld [vmem:[#allocation5 + $0x260] sm:$0xf0] }
  0x44   : > { %1232 = vmatpush.bf16.msra.mxu0 %v3478_v12  ;;  %3841 = vmatpush.bf16.msra.mxu3 %v3478_v12  ;;  %v3418_v26 = vor.u32 %v3782_v23, %v3417_v22  ;;  %v3756_v29 = vld [vmem:[#allocation5 + $0x224] sm:$0xf]  ;;  %v3343_v30 = vld [vmem:[#allocation5 + $0x264] sm:$0xf0]  ;;  %v3765_v32 = vld [vmem:[#allocation5 + $0x268] sm:$0xf0]  ;;  %v3342_v33 = vor.u32 %v3764_v28, %v3341_v27 }
  0x45   : > { %1281 = vmatpush.bf16.msra.mxu1 %v3482_v16  ;;  %v3349_v31 = vld [vmem:[#allocation5 + $0x228] sm:$0xf]  ;;  %v3346_v34 = vor.u32 %v3756_v29, %v3343_v30  ;;  %v3273_v36 = vld [vmem:[#allocation5 + $0x198] sm:$0xf]  ;;  %v3747_v37 = vld [vmem:[#allocation5 + $0x1d8] sm:$0xf0] }
  0x46   : > { %1330 = vmatpush.bf16.msra.mxu2 %v3486_v17  ;;  %v3350_v35 = vor.u32 %v3765_v32, %v3349_v31  ;;  %v3739_v38 = vld [vmem:[#allocation5 + $0x19c] sm:$0xf]  ;;  %v3275_v39 = vld [vmem:[#allocation5 + $0x1dc] sm:$0xf0]  ;;  %v3748_v41 = vld [vmem:[#allocation5 + $0x1e0] sm:$0xf0]  ;;  %v3274_v42 = vor.u32 %v3747_v37, %v3273_v36 }
  0x47   : > { %v3281_v40 = vld [vmem:[#allocation5 + $0x1a0] sm:$0xf]  ;;  %v3278_v43 = vor.u32 %v3739_v38, %v3275_v39  ;;  %v3205_v45 = vld [vmem:[#allocation5 + $0x110] sm:$0xf]  ;;  %v3730_v46 = vld [vmem:[#allocation5 + $0x150] sm:$0xf0] }
  0x48   : > { %1233 = vmatpush.bf16.msra.mxu0 %v3410_v24  ;;  %3842 = vmatpush.bf16.msra.mxu3 %v3410_v24  ;;  %v3282_v44 = vor.u32 %v3748_v41, %v3281_v40  ;;  %v3722_v47 = vld [vmem:[#allocation5 + $0x114] sm:$0xf]  ;;  %v3207_v48 = vld [vmem:[#allocation5 + $0x154] sm:$0xf0]  ;;  %v3731_v50 = vld [vmem:[#allocation5 + $0x158] sm:$0xf0]  ;;  %v3206_v51 = vor.u32 %v3730_v46, %v3205_v45 }
  0x49   : > { %1282 = vmatpush.bf16.msra.mxu1 %v3414_v25  ;;  %v3213_v49 = vld [vmem:[#allocation5 + $0x118] sm:$0xf]  ;;  %v3210_v52 = vor.u32 %v3722_v47, %v3207_v48  ;;  %v3137_v54 = vld [vmem:[#allocation5 + $0x88] sm:$0xf]  ;;  %v3713_v55 = vld [vmem:[#allocation5 + $0xc8] sm:$0xf0] }
  0x4a   : > { %1331 = vmatpush.bf16.msra.mxu2 %v3418_v26  ;;  %v3214_v53 = vor.u32 %v3731_v50, %v3213_v49  ;;  %v3705_v56 = vld [vmem:[#allocation5 + $0x8c] sm:$0xf]  ;;  %v3139_v57 = vld [vmem:[#allocation5 + $0xcc] sm:$0xf0]  ;;  %v3714_v59 = vld [vmem:[#allocation5 + $0xd0] sm:$0xf0]  ;;  %v3138_v60 = vor.u32 %v3713_v55, %v3137_v54 }
  0x4b   : > { %v3145_v58 = vld [vmem:[#allocation5 + $0x90] sm:$0xf]  ;;  %v3142_v61 = vor.u32 %v3705_v56, %v3139_v57  ;;  %v3069_v63 = vld [vmem:[#allocation5] sm:$0xf]  ;;  %v3696_v0 = vld [vmem:[#allocation5 + $0x40] sm:$0xf0] }
  0x4c   : > { %1234 = vmatpush.bf16.msra.mxu0 %v3342_v33  ;;  %3843 = vmatpush.bf16.msra.mxu3 %v3342_v33  ;;  %v3146_v62 = vor.u32 %v3714_v59, %v3145_v58  ;;  %v3688_v1 = vld [vmem:[#allocation5 + $0x4] sm:$0xf]  ;;  %v3071_v2 = vld [vmem:[#allocation5 + $0x44] sm:$0xf0]  ;;  %v3697_v4 = vld [vmem:[#allocation5 + $0x48] sm:$0xf0]  ;;  %v3070_v7 = vor.u32 %v3696_v0, %v3069_v63 }
  0x4d   : > { %1283 = vmatpush.bf16.msra.mxu1 %v3346_v34  ;;  %v3077_v3 = vld [vmem:[#allocation5 + $0x8] sm:$0xf]  ;;  %v3817_v6 = vld [vmem:[#allocation5 + $0x408] sm:$0xf0]  ;;  %v3074_v8 = vor.u32 %v3688_v1, %v3071_v2  ;;  %v4478_v10 = vld [vmem:[%s4463_s11] sm:$0xff]  ;;  %s3034_s14 = sshll.u32 %s4459_s7, 3 }
  0x4e   : > { %1332 = vmatpush.bf16.msra.mxu2 %v3350_v35  ;;  %v3561_v5 = vld [vmem:[#allocation5 + $0x3c8] sm:$0xf]  ;;  %v3078_v9 = vor.u32 %v3697_v4, %v3077_v3  ;;  %v4481_v12 = vld [vmem:[%s4463_s11 + $0x10] sm:$0xff]  ;;  %v3493_v13 = vld [vmem:[#allocation5 + $0x340] sm:$0xf]  ;;  %s3676_s15 = sshll.u32 %s4360_s25, 3 }
  0x4f   : > { %v3562_v11 = vor.u32 %v3817_v6, %v3561_v5  ;;  %v3800_v14 = vld [vmem:[#allocation5 + $0x380] sm:$0xf0]  ;;  %v3425_v16 = vld [vmem:[#allocation5 + $0x2b8] sm:$0xf]  ;;  %v3783_v17 = vld [vmem:[#allocation5 + $0x2f8] sm:$0xf0]  ;;  %s2905_s9 = scalar_lea.hbm %s5916_s6, %s3676_s15 }
  0x50   : > { %1235 = vmatpush.bf16.msra.mxu0 %v3274_v42  ;;  %3844 = vmatpush.bf16.msra.mxu3 %v3274_v42  ;;  %v3494_v15 = vor.u32 %v3800_v14, %v3493_v13  ;;  %v3426_v18 = vor.u32 %v3783_v17, %v3425_v16  ;;  %v3357_v19 = vld [vmem:[#allocation5 + $0x230] sm:$0xf]  ;;  %v3766_v20 = vld [vmem:[#allocation5 + $0x270] sm:$0xf0]  ;;  %v3289_v22 = vld [vmem:[#allocation5 + $0x1a8] sm:$0xf] }
  0x51   : > { %1284 = vmatpush.bf16.msra.mxu1 %v3278_v43  ;;  %v3358_v21 = vor.u32 %v3766_v20, %v3357_v19  ;;  %v3749_v23 = vld [vmem:[#allocation5 + $0x1e8] sm:$0xf0]  ;;  %v4491_v26 = vld [vmem:[%s4463_s11 + $0x18] sm:$0xff]  ;;  %v3221_v27 = vld [vmem:[#allocation5 + $0x120] sm:$0xf]  ;;  %s333_s10 = scalar_lea.vmem [#allocation11], %s3034_s14 }
  0x52   : > { %1333 = vmatpush.bf16.msra.mxu2 %v3282_v44  ;;  %v4488_v24 = vld [vmem:[%s4463_s11 + $0x8] sm:$0xff]  ;;  %v3290_v25 = vor.u32 %v3749_v23, %v3289_v22  ;;  %v3732_v28 = vld [vmem:[#allocation5 + $0x160] sm:$0xf0]  ;;  %v3153_v30 = vld [vmem:[#allocation5 + $0x98] sm:$0xf]  ;;  %s2907_s12 = sshll.u32 %s333_s10, 4  ;;  %s2908_s12 = int_to_ptr.vmem [resolvable:$true] %s2907_s12 }
  0x53   : > { %v3222_v29 = vor.u32 %v3732_v28, %v3221_v27  ;;  %v3715_v31 = vld [vmem:[#allocation5 + $0xd8] sm:$0xf0]  ;;  %v3085_v33 = vld [vmem:[#allocation5 + $0x10] sm:$0xf]  ;;  %v3698_v34 = vld [vmem:[#allocation5 + $0x50] sm:$0xf0] }
  0x54   : > { %1236 = vmatpush.bf16.msra.mxu0 %v3206_v51  ;;  %3845 = vmatpush.bf16.msra.mxu3 %v3206_v51  ;;  %v3154_v32 = vor.u32 %v3715_v31, %v3153_v30  ;;  %v3086_v35 = vor.u32 %v3698_v34, %v3085_v33  ;;  %v4498_v36 = vld [vmem:[%s4463_s11 + $0x20] sm:$0xff]  ;;  %v3555_v38 = vld [vmem:[#allocation5 + $0x404] sm:$0xf0]  ;;  %v3791_v40 = vld [vmem:[#allocation5 + $0x33c] sm:$0xf]  ;;  %s2909_s30 = sshll.u32 %s2905_s9, 4  ;;  %s2910_s30 = int_to_ptr.hbm [resolvable:$true] %s2909_s30 }
  0x55   : > { %1285 = vmatpush.bf16.msra.mxu1 %v3210_v52  ;;  %v3808_v37 = vld [vmem:[#allocation5 + $0x3c4] sm:$0xf]  ;;  %v3487_v41 = vld [vmem:[#allocation5 + $0x37c] sm:$0xf0]  ;;  %v3774_v43 = vld [vmem:[#allocation5 + $0x2b4] sm:$0xf] }
  0x56   : > { %1334 = vmatpush.bf16.msra.mxu2 %v3214_v53  ;;  %v3558_v39 = vor.u32 %v3808_v37, %v3555_v38  ;;  %v3490_v42 = vor.u32 %v3791_v40, %v3487_v41  ;;  %v3419_v44 = vld [vmem:[#allocation5 + $0x2f4] sm:$0xf0]  ;;  %v3757_v46 = vld [vmem:[#allocation5 + $0x22c] sm:$0xf]  ;;  %v3351_v47 = vld [vmem:[#allocation5 + $0x26c] sm:$0xf0] }
  0x57   : > { %v3422_v45 = vor.u32 %v3774_v43, %v3419_v44  ;;  %v3354_v48 = vor.u32 %v3757_v46, %v3351_v47  ;;  %v4505_v49 = vld [vmem:[%s4463_s11 + $0x28] sm:$0xff]  ;;  %v3740_v50 = vld [vmem:[#allocation5 + $0x1a4] sm:$0xf]  ;;  %v3723_v53 = vld [vmem:[#allocation5 + $0x11c] sm:$0xf]  ;;  %s2895_s13 = scalar_lea.sflag [#allocation4], %s4459_s7 }
  0x58   : > { %1237 = vmatpush.bf16.msra.mxu0 %v3138_v60  ;;  %3846 = vmatpush.bf16.msra.mxu3 %v3138_v60  ;;  %v3283_v51 = vld [vmem:[#allocation5 + $0x1e4] sm:$0xf0]  ;;  %v3215_v54 = vld [vmem:[#allocation5 + $0x15c] sm:$0xf0]  ;;  %v3706_v56 = vld [vmem:[#allocation5 + $0x94] sm:$0xf] }
  0x59   : > { %1286 = vmatpush.bf16.msra.mxu1 %v3142_v61  ;;  %v3286_v52 = vor.u32 %v3740_v50, %v3283_v51  ;;  %v3218_v55 = vor.u32 %v3723_v53, %v3215_v54  ;;  %v3147_v57 = vld [vmem:[#allocation5 + $0xd4] sm:$0xf0]  ;;  %v3689_v59 = vld [vmem:[#allocation5 + $0xc] sm:$0xf]  ;;  %v3079_v60 = vld [vmem:[#allocation5 + $0x4c] sm:$0xf0] }
  0x5a   : > { %1335 = vmatpush.bf16.msra.mxu2 %v3146_v62  ;;  %v3150_v58 = vor.u32 %v3706_v56, %v3147_v57  ;;  %v3082_v61 = vor.u32 %v3689_v59, %v3079_v60  ;;  %v4512_v62 = vld [vmem:[%s4463_s11 + $0x30] sm:$0xff]  ;;  %v3809_v63 = vld [vmem:[#allocation5 + $0x3cc] sm:$0xf]  ;;  %v3792_v5 = vld [vmem:[#allocation5 + $0x344] sm:$0xf]  ;;  %s4234_s19 = sshra.s32 %s2910_s30, 4  ;;  %s4235_s19 = int_to_ptr.hbm [resolvable:$true] %s4234_s19 }
  0x5b   : > { %v3563_v0 = vld [vmem:[#allocation5 + $0x40c] sm:$0xf0]  ;;  %v3818_v3 = vld [vmem:[#allocation5 + $0x410] sm:$0xf0]  ;;  %v3495_v6 = vld [vmem:[#allocation5 + $0x384] sm:$0xf0]  ;;  %p4241_p11 = scmp.lt.s32.totalorder %s4235_s19, %s5916_s6 }
  0x5c   : > { %1238 = vmatpush.bf16.msra.mxu0 %v3070_v7  ;;  %3847 = vmatpush.bf16.msra.mxu3 %v3070_v7  ;;  %v3569_v1 = vld [vmem:[#allocation5 + $0x3d0] sm:$0xf]  ;;  %v3566_v2 = vor.u32 %v3809_v63, %v3563_v0  ;;  %v3501_v7 = vld [vmem:[#allocation5 + $0x348] sm:$0xf]  ;;  %v3775_v13 = vld [vmem:[#allocation5 + $0x2bc] sm:$0xf] }
  0x5d   : > { %1287 = vmatpush.bf16.msra.mxu1 %v3074_v8  ;;  %v3570_v4 = vor.u32 %v3818_v3, %v3569_v1  ;;  %v3498_v8 = vor.u32 %v3792_v5, %v3495_v6  ;;  %v3427_v14 = vld [vmem:[#allocation5 + $0x2fc] sm:$0xf0]  ;;  %v3784_v16 = vld [vmem:[#allocation5 + $0x300] sm:$0xf0]  ;;  %v3758_v19 = vld [vmem:[#allocation5 + $0x234] sm:$0xf] }
  0x5e   : > { %1336 = vmatpush.bf16.msra.mxu2 %v3078_v9  ;;  %v3801_v9 = vld [vmem:[#allocation5 + $0x388] sm:$0xf0]  ;;  %v3430_v17 = vor.u32 %v3775_v13, %v3427_v14  ;;  %v3359_v20 = vld [vmem:[#allocation5 + $0x274] sm:$0xf0]  ;;  %v3767_v22 = vld [vmem:[#allocation5 + $0x278] sm:$0xf0] }
  0x5f   : > { %1239 = vmatmul.bf16.vlgmr.msra.gmra.mxu0 %v4478_v10  ;;  %1249 = vmatmul.bf16.vlgmr.msra.gmra.mxu3 %v4481_v12  ;;  %v3362_v23 = vor.u32 %v3758_v19, %v3359_v20  ;;  %v4519_v27 = vld [vmem:[%s4463_s11 + $0x38] sm:$0xff]  ;;  %v3741_v28 = vld [vmem:[#allocation5 + $0x1ac] sm:$0xf]  ;;  %v3297_v30 = vld [vmem:[#allocation5 + $0x1b0] sm:$0xf]  ;;  %s4236_s20 = scalar_lea.hbm %s4235_s19, 8 }
  0x60   : > { %1427 = vmatpush.bf16.msrb.mxu0 %v3562_v11  ;;  %1288 = vmatmul.bf16.vlgmr.msra.gmra.mxu1 %v4478_v10  ;;  %v3502_v11 = vor.u32 %v3801_v9, %v3501_v7  ;;  %v3724_v34 = vld [vmem:[#allocation5 + $0x124] sm:$0xf]  ;;  %v3229_v37 = vld [vmem:[#allocation5 + $0x128] sm:$0xf]  ;;  %v3707_v41 = vld [vmem:[#allocation5 + $0x9c] sm:$0xf]  ;;  %p4237_p1 = scmp.ne.s32.totalorder %s4235_s19, %s4236_s20 }
  0x61   : > { %1337 = vmatmul.bf16.vlgmr.msra.gmra.mxu2 %v4478_v10  ;;  %1378 = vmatpush.bf16.msrb.mxu3 %v3558_v39  ;;  %v3733_v39 = vld [vmem:[#allocation5 + $0x168] sm:$0xf0]  ;;  %v3161_v43 = vld [vmem:[#allocation5 + $0xa0] sm:$0xf]  ;;  %v3716_v44 = vld [vmem:[#allocation5 + $0xe0] sm:$0xf0] }
  0x62   : > { %1476 = vmatpush.bf16.msrb.mxu1 %v3566_v2  ;;  %1525 = vmatpush.bf16.msrb.mxu2 %v3570_v4  ;;  %v3230_v40 = vor.u32 %v3733_v39, %v3229_v37  ;;  %v3162_v46 = vor.u32 %v3716_v44, %v3161_v43  ;;  %v3690_v47 = vld [vmem:[#allocation5 + $0x14] sm:$0xf]  ;;  %v3093_v50 = vld [vmem:[#allocation5 + $0x18] sm:$0xf]  ;;  %v3509_v57 = vld [vmem:[#allocation5 + $0x350] sm:$0xf]  ;;  %p4238_p4 = pnand %p4237_p1, %p4426_p3 }
  0x63   : > { %v3577_v54 = vld [vmem:[#allocation5 + $0x3d8] sm:$0xf]  ;;  %v3441_v60 = vld [vmem:[#allocation5 + $0x2c8] sm:$0xf]  ;;  %v3373_v0 = vld [vmem:[#allocation5 + $0x240] sm:$0xf] }
  0x64   : > { %1428 = vmatpush.bf16.msrb.mxu0 %v3494_v15  ;;  %v3433_v15 = vld [vmem:[#allocation5 + $0x2c0] sm:$0xf]  ;;  %v3768_v1 = vld [vmem:[#allocation5 + $0x280] sm:$0xf0]  ;;  %v3305_v3 = vld [vmem:[#allocation5 + $0x1b8] sm:$0xf]  ;;  %p4239_p8 = pneg %p4238_p4 }
  0x65   : > { %1379 = vmatpush.bf16.msrb.mxu3 %v3490_v42  ;;  %v3155_v42 = vld [vmem:[#allocation5 + $0xdc] sm:$0xf0]  ;;  %v3374_v2 = vor.u32 %v3768_v1, %v3373_v0  ;;  %v3751_v4 = vld [vmem:[#allocation5 + $0x1f8] sm:$0xf0]  ;;  %v3237_v6 = vld [vmem:[#allocation5 + $0x130] sm:$0xf] }
  0x66   : > { %1477 = vmatpush.bf16.msrb.mxu1 %v3498_v8  ;;  %1526 = vmatpush.bf16.msrb.mxu2 %v3502_v11  ;;  %v3306_v5 = vor.u32 %v3751_v4, %v3305_v3  ;;  %v3734_v7 = vld [vmem:[#allocation5 + $0x170] sm:$0xf0]  ;;  %v3169_v9 = vld [vmem:[#allocation5 + $0xa8] sm:$0xf]  ;;  %v3717_v11 = vld [vmem:[#allocation5 + $0xe8] sm:$0xf0] }
  0x67   : > { %v3238_v8 = vor.u32 %v3734_v7, %v3237_v6  ;;  %v3170_v13 = vor.u32 %v3717_v11, %v3169_v9  ;;  %v3101_v14 = vld [vmem:[#allocation5 + $0x20] sm:$0xf]  ;;  %v3793_v43 = vld [vmem:[#allocation5 + $0x34c] sm:$0xf]  ;;  %v3503_v44 = vld [vmem:[#allocation5 + $0x38c] sm:$0xf0] }
  0x68   : > { %1429 = vmatpush.bf16.msrb.mxu0 %v3426_v18  ;;  %v3434_v18 = vor.u32 %v3784_v16, %v3433_v15  ;;  %v3700_v15 = vld [vmem:[#allocation5 + $0x60] sm:$0xf0]  ;;  %s4240_s27 = scalar_lea.hbm %s5916_s6, 16 }
  0x69   : > { %1380 = vmatpush.bf16.msrb.mxu3 %v3422_v45  ;;  %v3158_v45 = vor.u32 %v3707_v41, %v3155_v42  ;;  %v3102_v16 = vor.u32 %v3700_v15, %v3101_v14  ;;  %v3776_v1 = vld [vmem:[#allocation5 + $0x2c4] sm:$0xf]  ;;  %p4242_p2 = scmp.lt.s32.totalorder %s4240_s27, %s4236_s20 }
  0x6a   : > { %1478 = vmatpush.bf16.msrb.mxu1 %v3430_v17  ;;  %1527 = vmatpush.bf16.msrb.mxu2 %v3434_v18  ;;  %v4533_v18 = vld [vmem:[#allocation7] sm:$0xff] }
  0x6b   : > { %v4540_v20 = vperm.slane %v4533_v18, 0  ;;  %p4243_p9 = por %p4242_p2, %p4241_p11 }
  0x6c   : > { %1430 = vmatpush.bf16.msrb.mxu0 %v3358_v21  ;;  %v3365_v21 = vld [vmem:[#allocation5 + $0x238] sm:$0xf] }
  0x6d   : > { %1381 = vmatpush.bf16.msrb.mxu3 %v3354_v48  ;;  %v3087_v48 = vld [vmem:[#allocation5 + $0x54] sm:$0xf0]  ;;  %p4244_p10 = pnand %p4243_p9, %p4239_p8 }
  0x6e   : > { %1479 = vmatpush.bf16.msrb.mxu1 %v3362_v23  ;;  %v3090_v51 = vor.u32 %v3690_v47, %v3087_v48 }
  0x6f   : > { %1244 = vmatmul.bf16.gmra.mxu0 %v4488_v24  ;;  %1254 = vmatmul.bf16.gmra.mxu3 %v4491_v26 }
  0x70   : > { %1431 = vmatpush.bf16.msrb.mxu0 %v3290_v25  ;;  %1293 = vmatmul.bf16.gmra.mxu1 %v4488_v24  ;;  %v3366_v25 = vor.u32 %v3767_v22, %v3365_v21  ;;  %v3810_v21 = vld [vmem:[#allocation5 + $0x3d4] sm:$0xf]  ;;  %v3571_v22 = vld [vmem:[#allocation5 + $0x414] sm:$0xf0] }
  0x71   : > { %1342 = vmatmul.bf16.gmra.mxu2 %v4488_v24  ;;  %1382 = vmatpush.bf16.msrb.mxu3 %v3286_v52  ;;  %v3699_v52 = vld [vmem:[#allocation5 + $0x58] sm:$0xf0]  ;;  %v3574_v23 = vor.u32 %v3810_v21, %v3571_v22 }
  0x72   : > { %1528 = vmatpush.bf16.msrb.mxu2 %v3366_v25  ;;  %v3094_v53 = vor.u32 %v3699_v52, %v3093_v50 }
  0x74   : > { %1432 = vmatpush.bf16.msrb.mxu0 %v3222_v29  ;;  %v3291_v29 = vld [vmem:[#allocation5 + $0x1ec] sm:$0xf0] }
  0x75   : > { %1383 = vmatpush.bf16.msrb.mxu3 %v3218_v55  ;;  %v3294_v31 = vor.u32 %v3741_v28, %v3291_v29  ;;  %v3819_v55 = vld [vmem:[#allocation5 + $0x418] sm:$0xf0]  ;;  %v4546_v29 = vperm.slane %v4533_v18, 1 }
  0x76   : > { %v3578_v56 = vor.u32 %v3819_v55, %v3577_v54 }
  0x77   : > { %1480 = vmatpush.bf16.msrb.mxu1 %v3294_v31 }
  0x78   : > { %1433 = vmatpush.bf16.msrb.mxu0 %v3154_v32  ;;  %v3750_v32 = vld [vmem:[#allocation5 + $0x1f0] sm:$0xf0] }
  0x79   : > { %1384 = vmatpush.bf16.msrb.mxu3 %v3150_v58  ;;  %v3298_v33 = vor.u32 %v3750_v32, %v3297_v30  ;;  %v3802_v58 = vld [vmem:[#allocation5 + $0x390] sm:$0xf0] }
  0x7a   : > { %v3510_v59 = vor.u32 %v3802_v58, %v3509_v57  ;;  %v4569_v57 = vperm.slane %v4533_v18, 2 }
  0x7b   : > { %1529 = vmatpush.bf16.msrb.mxu2 %v3298_v33 }
  0x7c   : > { %1434 = vmatpush.bf16.msrb.mxu0 %v3086_v35  ;;  %v3223_v35 = vld [vmem:[#allocation5 + $0x164] sm:$0xf0] }
  0x7d   : > { %1385 = vmatpush.bf16.msrb.mxu3 %v3082_v61  ;;  %v3226_v38 = vor.u32 %v3724_v34, %v3223_v35  ;;  %v3785_v61 = vld [vmem:[#allocation5 + $0x308] sm:$0xf0] }
  0x7e   : > { %v3442_v63 = vor.u32 %v3785_v61, %v3441_v60 }
  0x7f   : > { %1259 = vmatmul.bf16.gmra.mxu3 %v4498_v36  ;;  %1435 = vmatmul.bf16.vlgmr.msrb.gmra.mxu0 %v4478_v10 }
  0x80   : > { %1298 = vmatmul.bf16.gmra.mxu1 %v4481_v12  ;;  %1530 = vmatpush.bf16.msrb.mxu2 %v3230_v40 }
  0x81   : > { %1347 = vmatmul.bf16.gmra.mxu2 %v4481_v12  ;;  %1481 = vmatpush.bf16.msrb.mxu1 %v3226_v38 }
  0x82   : > { %1623 = vmatpush.bf16.msra.mxu0 %v3578_v56  ;;  %1574 = vmatpush.bf16.msra.mxu3 %v3574_v23 }
  0x84   : > { %1531 = vmatpush.bf16.msrb.mxu2 %v3162_v46 }
  0x85   : > { %1482 = vmatpush.bf16.msrb.mxu1 %v3158_v45  ;;  %v3506_v45 = vor.u32 %v3793_v43, %v3503_v44 }
  0x86   : > { %1624 = vmatpush.bf16.msra.mxu0 %v3510_v59 }
  0x87   : > { %1575 = vmatpush.bf16.msra.mxu3 %v3506_v45 }
  0x88   : > { %1532 = vmatpush.bf16.msrb.mxu2 %v3094_v53 }
  0x89   : > { %1483 = vmatpush.bf16.msrb.mxu1 %v3090_v51 }
  0x8a   : > { %1625 = vmatpush.bf16.msra.mxu0 %v3442_v63 }
  0x8e   : > { %1626 = vmatpush.bf16.msra.mxu0 %v3374_v2  ;;  %v3435_v2 = vld [vmem:[#allocation5 + $0x304] sm:$0xf0] }
  0x8f   : > { %1264 = vmatmul.bf16.gmra.mxu3 %v4505_v49  ;;  %1440 = vmatmul.bf16.gmra.mxu0 %v4488_v24  ;;  %v3438_v3 = vor.u32 %v3776_v1, %v3435_v2  ;;  %v3095_v1 = vld [vmem:[#allocation5 + $0x5c] sm:$0xf0] }
  0x90   : > { %1303 = vmatmul.bf16.gmra.mxu1 %v4491_v26 }
  0x91   : > { %1352 = vmatmul.bf16.gmra.mxu2 %v4491_v26  ;;  %1576 = vmatpush.bf16.msra.mxu3 %v3438_v3 }
  0x92   : > { %1627 = vmatpush.bf16.msra.mxu0 %v3306_v5 }
  0x96   : > { %1628 = vmatpush.bf16.msra.mxu0 %v3238_v8 }
  0x9a   : > { %1629 = vmatpush.bf16.msra.mxu0 %v3170_v13 }
  0x9e   : > { %1630 = vmatpush.bf16.msra.mxu0 %v3102_v16  ;;  %v3759_v16 = vld [vmem:[#allocation5 + $0x23c] sm:$0xf] }
  0x9f   : > { %1269 = vmatmul.bf16.gmra.mxu3 %v4512_v62  ;;  %1445 = vmatmul.bf16.gmra.mxu0 %v4481_v12 }
  0xa0   : > { %1308 = vmatmul.bf16.gmra.mxu1 %v4498_v36 }
  0xa1   : > { %1357 = vmatmul.bf16.gmra.mxu2 %v4498_v36 }
  0xaf   : > { %1274 = vmatmul.bf16.gmra.mxu3 %v4519_v27  ;;  %1450 = vmatmul.bf16.gmra.mxu0 %v4491_v26 }
  0xb0   : > { %1313 = vmatmul.bf16.gmra.mxu1 %v4505_v49 }
  0xb1   : > { %1362 = vmatmul.bf16.gmra.mxu2 %v4505_v49 }
  0xbf   : > { %1386 = vmatmul.bf16.vlgmr.msrb.gmra.mxu3 %v4478_v10  ;;  %1455 = vmatmul.bf16.gmra.mxu0 %v4498_v36 }
  0xc0   : > { %1318 = vmatmul.bf16.gmra.mxu1 %v4512_v62 }
  0xc1   : > { %1367 = vmatmul.bf16.gmra.mxu2 %v4512_v62 }
  0xcf   : > { %1391 = vmatmul.bf16.gmra.mxu3 %v4488_v24  ;;  %1460 = vmatmul.bf16.gmra.mxu0 %v4505_v49 }
  0xd0   : > { %1323 = vmatmul.bf16.gmra.mxu1 %v4519_v27 }
  0xd1   : > { %1372 = vmatmul.bf16.gmra.mxu2 %v4519_v27 }
  0xdc   : > { %v1240_v17 = vpop.f32.mrf.mxu0 }
  0xdd   : > { %v4535_v19 = vpop.f32.mrf.mxu1  ;;  %v2068_v25 = vadd.f32 %v4540_v20, %v1240_v17  ;;  %v3367_v17 = vld [vmem:[#allocation5 + $0x27c] sm:$0xf0] }
  0xde   : > { %v3370_v22 = vor.u32 %v3759_v16, %v3367_v17  ;;  %v3811_v16 = vld [vmem:[#allocation5 + $0x3dc] sm:$0xf]  ;;  %v3579_v17 = vld [vmem:[#allocation5 + $0x41c] sm:$0xf0] }
  0xdf   : > { %1396 = vmatmul.bf16.gmra.mxu3 %v4481_v12  ;;  %1465 = vmatmul.bf16.gmra.mxu0 %v4512_v62 }
  0xe0   : > { %1484 = vmatmul.bf16.vlgmr.msrb.gmra.mxu1 %v4478_v10  ;;  %1577 = vmatpush.bf16.msra.mxu3 %v3370_v22 }
  0xe1   : > { %1533 = vmatmul.bf16.vlgmr.msrb.gmra.mxu2 %v4478_v10 }
  0xe2   : > { %v1250_v28 = vpop.f32.mrf.mxu3 }
  0xe3   : > { %v2076_v6 = vadd.f32 %v4540_v20, %v1250_v28 }
  0xe4   : > { %v1338_v30 = vpop.f32.mrf.mxu2  ;;  %v1242_v32 = vpop.f32.mrf.mxu0 }
  0xe5   : > { %v2102_v31 = vadd.f32 %v4546_v29, %v1338_v30  ;;  %v4549_v33 = vpop.f32.mrf.mxu1  ;;  %v2070_v35 = vadd.f32 %v4540_v20, %v1242_v32 }
  0xe7   : > { %v2134_v34 = vmax.f32 %v2068_v25, %v2102_v31 }
  0xea   : > { %v1252_v37 = vpop.f32.mrf.mxu3 }
  0xeb   : > { %v4594_v23 = vadd.f32 %v4540_v20, %v1252_v37 }
  0xec   : > { %v1340_v38 = vpop.f32.mrf.mxu2  ;;  %v1245_v40 = vpop.f32.mrf.mxu0 }
  0xed   : > { %v2104_v39 = vadd.f32 %v4546_v29, %v1340_v38  ;;  %v4553_v41 = vpop.f32.mrf.mxu1  ;;  %v2072_v46 = vadd.f32 %v4540_v20, %v1245_v40  ;;  %v3725_v40 = vld [vmem:[#allocation5 + $0x12c] sm:$0xf] }
  0xef   : > { %v2136_v42 = vmax.f32 %v2070_v35, %v2104_v39  ;;  %1401 = vmatmul.bf16.gmra.mxu3 %v4491_v26  ;;  %1470 = vmatmul.bf16.gmra.mxu0 %v4519_v27  ;;  %v3299_v35 = vld [vmem:[#allocation5 + $0x1f4] sm:$0xf0] }
  0xf0   : > { %1489 = vmatmul.bf16.gmra.mxu1 %v4488_v24 }
  0xf1   : > { %1538 = vmatmul.bf16.gmra.mxu2 %v4488_v24 }
  0xf2   : > { %v1255_v47 = vpop.f32.mrf.mxu3 }
  0xf3   : > { %v4613_v45 = vadd.f32 %v4540_v20, %v1255_v47 }
  0xf4   : > { %v1343_v48 = vpop.f32.mrf.mxu2  ;;  %v1247_v51 = vpop.f32.mrf.mxu0 }
  0xf5   : > { %v2106_v50 = vadd.f32 %v4546_v29, %v1343_v48  ;;  %v4561_v52 = vpop.f32.mrf.mxu1  ;;  %v4564_v54 = vadd.f32 %v4540_v20, %v1247_v51 }
  0xf7   : > { %v2138_v53 = vmax.f32 %v2072_v46, %v2106_v50 }
  0xfa   : > { %v4566_v55 = vpop.f32.mrf.mxu3 }
  0xfc   : > { %v1345_v56 = vpop.f32.mrf.mxu2  ;;  %v1436_v59 = vpop.f32.mrf.mxu0 }
  0xfd   : > { %v2108_v58 = vadd.f32 %v4546_v29, %v1345_v56  ;;  %v4572_v60 = vpop.f32.mrf.mxu1  ;;  %v2168_v61 = vadd.f32 %v4569_v57, %v1436_v59  ;;  %v3163_v56 = vld [vmem:[#allocation5 + $0xe4] sm:$0xf0] }
  0xff   : > { %v2140_v63 = vmax.f32 %v4564_v54, %v2108_v58  ;;  %v4576_v0 = vmax.f32 %v2134_v34, %v2168_v61  ;;  %1406 = vmatmul.bf16.gmra.mxu3 %v4498_v36  ;;  %1631 = vmatmul.bf16.vlgmr.msra.gmra.mxu0 %v4478_v10  ;;  %v3742_v34 = vld [vmem:[#allocation5 + $0x1b4] sm:$0xf]  ;;  %v3708_v54 = vld [vmem:[#allocation5 + $0xa4] sm:$0xf]  ;;  %v3691_v61 = vld [vmem:[#allocation5 + $0x1c] sm:$0xf] }
 0x100   : > { %1494 = vmatmul.bf16.gmra.mxu1 %v4481_v12  ;;  %v3302_v37 = vor.u32 %v3742_v34, %v3299_v35  ;;  %v3166_v59 = vor.u32 %v3708_v54, %v3163_v56  ;;  %v3098_v3 = vor.u32 %v3691_v61, %v3095_v1  ;;  %v3794_v35 = vld [vmem:[#allocation5 + $0x354] sm:$0xf]  ;;  %v3777_v61 = vld [vmem:[#allocation5 + $0x2cc] sm:$0xf]  ;;  %v3443_v1 = vld [vmem:[#allocation5 + $0x30c] sm:$0xf0] }
 0x101   : > { %1543 = vmatmul.bf16.gmra.mxu2 %v4481_v12 }
 0x102   : > { %v4582_v4 = vpop.f32.mrf.mxu3  ;;  %1578 = vmatpush.bf16.msra.mxu3 %v3302_v37  ;;  %v3511_v37 = vld [vmem:[#allocation5 + $0x394] sm:$0xf0] }
 0x104   : > { %v1348_v5 = vpop.f32.mrf.mxu2  ;;  %v1438_v8 = vpop.f32.mrf.mxu0 }
 0x105   : > { %v2110_v7 = vadd.f32 %v4546_v29, %v1348_v5  ;;  %v4586_v9 = vpop.f32.mrf.mxu1  ;;  %v2170_v11 = vadd.f32 %v4569_v57, %v1438_v8  ;;  %v4629_v5 = vadd.f32 %v4540_v20, %v4566_v55  ;;  %v3582_v55 = vor.u32 %v3811_v16, %v3579_v17  ;;  %v3760_v17 = vld [vmem:[#allocation5 + $0x244] sm:$0xf] }
 0x107   : > { %v2142_v13 = vmax.f32 %v2076_v6, %v2110_v7  ;;  %v4589_v14 = vmax.f32 %v2136_v42, %v2170_v11  ;;  %v3231_v42 = vld [vmem:[#allocation5 + $0x16c] sm:$0xf0]  ;;  %1672 = vmatpush.bf16.msra.mxu1 %v3582_v55  ;;  %v3381_v55 = vld [vmem:[#allocation5 + $0x248] sm:$0xf] }
 0x108   : > { %v3234_v44 = vor.u32 %v3725_v40, %v3231_v42  ;;  %v3517_v42 = vld [vmem:[#allocation5 + $0x358] sm:$0xf] }
 0x10a   : > { %v4591_v15 = vpop.f32.mrf.mxu3  ;;  %1579 = vmatpush.bf16.msra.mxu3 %v3234_v44 }
 0x10c   : > { %v1350_v21 = vpop.f32.mrf.mxu2  ;;  %v1441_v28 = vpop.f32.mrf.mxu0 }
 0x10d   : > { %v4597_v25 = vadd.f32 %v4546_v29, %v1350_v21  ;;  %v4599_v30 = vpop.f32.mrf.mxu1  ;;  %v2172_v31 = vadd.f32 %v4569_v57, %v1441_v28  ;;  %v3585_v21 = vld [vmem:[#allocation5 + $0x3e0] sm:$0xf]  ;;  %v3820_v28 = vld [vmem:[#allocation5 + $0x420] sm:$0xf0] }
 0x10e   : > { %1580 = vmatpush.bf16.msra.mxu3 %v3166_v59 }
 0x10f   : > { %v2144_v32 = vmax.f32 %v4594_v23, %v4597_v25  ;;  %v4604_v38 = vmax.f32 %v2138_v53, %v2172_v31  ;;  %1411 = vmatmul.bf16.gmra.mxu3 %v4505_v49  ;;  %1636 = vmatmul.bf16.gmra.mxu0 %v4488_v24  ;;  %v3586_v31 = vor.u32 %v3820_v28, %v3585_v21  ;;  %v3375_v21 = vld [vmem:[#allocation5 + $0x284] sm:$0xf0] }
 0x110   : > { %1499 = vmatmul.bf16.gmra.mxu1 %v4491_v26 }
 0x111   : > { %1548 = vmatmul.bf16.gmra.mxu2 %v4491_v26 }
 0x112   : > { %v4610_v39 = vpop.f32.mrf.mxu3  ;;  %1581 = vmatpush.bf16.msra.mxu3 %v3098_v3  ;;  %1721 = vmatpush.bf16.msra.mxu2 %v3586_v31  ;;  %v3446_v3 = vor.u32 %v3777_v61, %v3443_v1  ;;  %v3378_v31 = vor.u32 %v3760_v17, %v3375_v21  ;;  %v3752_v61 = vld [vmem:[#allocation5 + $0x200] sm:$0xf0] }
 0x114   : > { %v1353_v43 = vpop.f32.mrf.mxu2  ;;  %v1443_v48 = vpop.f32.mrf.mxu0 }
 0x115   : > { %v4616_v46 = vadd.f32 %v4546_v29, %v1353_v43  ;;  %v4618_v50 = vpop.f32.mrf.mxu1  ;;  %v2174_v51 = vadd.f32 %v4569_v57, %v1443_v48  ;;  %v3803_v43 = vld [vmem:[#allocation5 + $0x398] sm:$0xf0] }
 0x117   : > { %v2146_v53 = vmax.f32 %v4613_v45, %v4616_v46  ;;  %v4623_v58 = vmax.f32 %v2140_v63, %v2174_v51  ;;  %v3518_v51 = vor.u32 %v3803_v43, %v3517_v42  ;;  %v3743_v43 = vld [vmem:[#allocation5 + $0x1bc] sm:$0xf]  ;;  %v3245_v45 = vld [vmem:[#allocation5 + $0x138] sm:$0xf] }
 0x119   : > { %1722 = vmatpush.bf16.msra.mxu2 %v3518_v51  ;;  %v3313_v51 = vld [vmem:[#allocation5 + $0x1c0] sm:$0xf] }
 0x11a   : > { %v4625_v47 = vpop.f32.mrf.mxu3  ;;  %v3314_v1 = vor.u32 %v3752_v61, %v3313_v51  ;;  %v3692_v61 = vld [vmem:[#allocation5 + $0x24] sm:$0xf] }
 0x11c   : > { %v1355_v2 = vpop.f32.mrf.mxu2  ;;  %v1446_v7 = vpop.f32.mrf.mxu0 }
 0x11d   : > { %v4632_v6 = vadd.f32 %v4546_v29, %v1355_v2  ;;  %v4634_v8 = vpop.f32.mrf.mxu1  ;;  %v2176_v63 = vadd.f32 %v4569_v57, %v1446_v7  ;;  %v3449_v2 = vld [vmem:[#allocation5 + $0x2d0] sm:$0xf]  ;;  %v3786_v7 = vld [vmem:[#allocation5 + $0x310] sm:$0xf0] }
 0x11f   : > { %v2148_v11 = vmax.f32 %v4629_v5, %v4632_v6  ;;  %v4639_v22 = vmax.f32 %v2142_v13, %v2176_v63  ;;  %1416 = vmatmul.bf16.gmra.mxu3 %v4512_v62  ;;  %1641 = vmatmul.bf16.gmra.mxu0 %v4481_v12  ;;  %v3514_v13 = vor.u32 %v3794_v35, %v3511_v37  ;;  %v3769_v35 = vld [vmem:[#allocation5 + $0x288] sm:$0xf0] }
 0x120   : > { %1504 = vmatmul.bf16.gmra.mxu1 %v4498_v36  ;;  %v4649_v12 = vadd.f32 %v4540_v20, %v4582_v4  ;;  %v3450_v63 = vor.u32 %v3786_v7, %v3449_v2  ;;  %v4668_v37 = vadd.f32 %v4540_v20, %v4591_v15  ;;  %v3239_v7 = vld [vmem:[#allocation5 + $0x174] sm:$0xf0]  ;;  %v4712_v5 = vadd.f32 %v4540_v20, %v4625_v47 }
 0x121   : > { %1553 = vmatmul.bf16.gmra.mxu2 %v4498_v36  ;;  %1673 = vmatpush.bf16.msra.mxu1 %v3514_v13 }
 0x122   : > { %v4645_v34 = vpop.f32.mrf.mxu3  ;;  %1723 = vmatpush.bf16.msra.mxu2 %v3450_v63  ;;  %v3735_v63 = vld [vmem:[#allocation5 + $0x178] sm:$0xf0] }
 0x124   : > { %v1358_v40 = vpop.f32.mrf.mxu2  ;;  %v1448_v48 = vpop.f32.mrf.mxu0 }
 0x125   : > { %v4652_v44 = vadd.f32 %v4546_v29, %v1358_v40  ;;  %v4654_v54 = vpop.f32.mrf.mxu1  ;;  %v2178_v56 = vadd.f32 %v4569_v57, %v1448_v48  ;;  %1674 = vmatpush.bf16.msra.mxu1 %v3446_v3  ;;  %v3307_v48 = vld [vmem:[#allocation5 + $0x1fc] sm:$0xf0]  ;;  %v3726_v3 = vld [vmem:[#allocation5 + $0x134] sm:$0xf] }
 0x127   : > { %v2150_v59 = vmax.f32 %v4649_v12, %v4652_v44  ;;  %v4662_v4 = vmax.f32 %v2144_v32, %v2178_v56  ;;  %v3382_v32 = vor.u32 %v3769_v35, %v3381_v55  ;;  %v3310_v56 = vor.u32 %v3743_v43, %v3307_v48  ;;  %v3718_v48 = vld [vmem:[#allocation5 + $0xf0] sm:$0xf0] }
 0x128   : > { %v3246_v55 = vor.u32 %v3735_v63, %v3245_v45 }
 0x129   : > { %1675 = vmatpush.bf16.msra.mxu1 %v3378_v31  ;;  %1724 = vmatpush.bf16.msra.mxu2 %v3382_v32  ;;  %v3171_v32 = vld [vmem:[#allocation5 + $0xec] sm:$0xf0] }
 0x12a   : > { %v4664_v16 = vpop.f32.mrf.mxu3 }
 0x12c   : > { %v1360_v28 = vpop.f32.mrf.mxu2  ;;  %v1451_v25 = vpop.f32.mrf.mxu0 }
 0x12d   : > { %v4671_v23 = vadd.f32 %v4546_v29, %v1360_v28  ;;  %v4673_v40 = vpop.f32.mrf.mxu1  ;;  %v2180_v13 = vadd.f32 %v4569_v57, %v1451_v25  ;;  %1676 = vmatpush.bf16.msra.mxu1 %v3310_v56  ;;  %1725 = vmatpush.bf16.msra.mxu2 %v3314_v1  ;;  %v3709_v25 = vld [vmem:[#allocation5 + $0xac] sm:$0xf]  ;;  %v3103_v1 = vld [vmem:[#allocation5 + $0x64] sm:$0xf0] }
 0x12e   : > { %v3174_v43 = vor.u32 %v3709_v25, %v3171_v32  ;;  %v3106_v45 = vor.u32 %v3692_v61, %v3103_v1  ;;  %v3593_v25 = vld [vmem:[#allocation5 + $0x3e8] sm:$0xf]  ;;  %v3821_v32 = vld [vmem:[#allocation5 + $0x428] sm:$0xf0]  ;;  %v3525_v61 = vld [vmem:[#allocation5 + $0x360] sm:$0xf] }
 0x12f   : > { %v2152_v42 = vmax.f32 %v4668_v37, %v4671_v23  ;;  %v4681_v15 = vmax.f32 %v2146_v53, %v2180_v13  ;;  %1421 = vmatmul.bf16.gmra.mxu3 %v4519_v27  ;;  %1646 = vmatmul.bf16.gmra.mxu0 %v4491_v26  ;;  %v3242_v53 = vor.u32 %v3726_v3, %v3239_v7  ;;  %v3177_v13 = vld [vmem:[#allocation5 + $0xb0] sm:$0xf]  ;;  %v3109_v3 = vld [vmem:[#allocation5 + $0x28] sm:$0xf]  ;;  %v3804_v1 = vld [vmem:[#allocation5 + $0x3a0] sm:$0xf0] }
 0x130   : > { %1509 = vmatmul.bf16.gmra.mxu1 %v4505_v49  ;;  %v4691_v26 = vadd.f32 %v4540_v20, %v4610_v39  ;;  %v3178_v51 = vor.u32 %v3718_v48, %v3177_v13  ;;  %v3594_v48 = vor.u32 %v3821_v32, %v3593_v25 }
 0x131   : > { %1558 = vmatmul.bf16.gmra.mxu2 %v4505_v49  ;;  %1677 = vmatpush.bf16.msra.mxu1 %v3242_v53  ;;  %v4708_v53 = vld [vmem:[#allocation7 + $0x8] sm:$0xff] }
 0x132   : > { %v4687_v2 = vpop.f32.mrf.mxu3  ;;  %1726 = vmatpush.bf16.msra.mxu2 %v3246_v55  ;;  %v4723_v13 = vperm.slane %v4708_v53, 0  ;;  %1819 = vmatpush.bf16.msrb.mxu0 %v3594_v48  ;;  %v3389_v48 = vld [vmem:[#allocation5 + $0x250] sm:$0xf] }
 0x134   : > { %v1363_v46 = vpop.f32.mrf.mxu2  ;;  %v1453_v21 = vpop.f32.mrf.mxu0  ;;  %v4739_v12 = vadd.f32 %v4723_v13, %v4535_v19 }
 0x135   : > { %v4694_v17 = vadd.f32 %v4546_v29, %v1363_v46  ;;  %v4696_v28 = vpop.f32.mrf.mxu1  ;;  %v2182_v31 = vadd.f32 %v4569_v57, %v1453_v21  ;;  %1678 = vmatpush.bf16.msra.mxu1 %v3174_v43  ;;  %v3701_v46 = vld [vmem:[#allocation5 + $0x68] sm:$0xf0]  ;;  %v4733_v43 = vperm.slane %v4708_v53, 1 }
 0x136   : > { %1727 = vmatpush.bf16.msra.mxu2 %v3178_v51  ;;  %v3110_v63 = vor.u32 %v3701_v46, %v3109_v3 }
 0x137   : > { %v2154_v35 = vmax.f32 %v4691_v26, %v4694_v17  ;;  %v4704_v39 = vmax.f32 %v2148_v11, %v2182_v31 }
 0x139   : > { %1679 = vmatpush.bf16.msra.mxu1 %v3106_v45 }
 0x13a   : > { %v4706_v56 = vpop.f32.mrf.mxu3  ;;  %1728 = vmatpush.bf16.msra.mxu2 %v3110_v63  ;;  %v3457_v63 = vld [vmem:[#allocation5 + $0x2d8] sm:$0xf] }
 0x13c   : > { %v1365_v7 = vpop.f32.mrf.mxu2  ;;  %v1456_v11 = vpop.f32.mrf.mxu0 }
 0x13d   : > { %v4715_v6 = vadd.f32 %v4546_v29, %v1365_v7  ;;  %v4717_v21 = vpop.f32.mrf.mxu1  ;;  %v2184_v55 = vadd.f32 %v4569_v57, %v1456_v11 }
 0x13f   : > { %v2156_v31 = vmax.f32 %v4712_v5, %v4715_v6  ;;  %v4728_v47 = vmax.f32 %v2150_v59, %v2184_v55  ;;  %1582 = vmatmul.bf16.vlgmr.msra.gmra.mxu3 %v4478_v10  ;;  %1651 = vmatmul.bf16.gmra.mxu0 %v4498_v36  ;;  %v3526_v36 = vor.u32 %v3804_v1, %v3525_v61  ;;  %v3787_v55 = vld [vmem:[#allocation5 + $0x318] sm:$0xf0] }
 0x140   : > { %1514 = vmatmul.bf16.gmra.mxu1 %v4512_v62  ;;  %v4746_v59 = vadd.f32 %v4540_v20, %v4645_v34  ;;  %v3458_v25 = vor.u32 %v3787_v55, %v3457_v63  ;;  %v4765_v61 = vadd.f32 %v4723_v13, %v4549_v33  ;;  %v3321_v55 = vld [vmem:[#allocation5 + $0x1c8] sm:$0xf]  ;;  %v4831_v6 = vadd.f32 %v4540_v20, %v4706_v56 }
 0x141   : > { %1563 = vmatmul.bf16.gmra.mxu2 %v4512_v62  ;;  %1820 = vmatpush.bf16.msrb.mxu0 %v3526_v36 }
 0x142   : > { %v1387_v51 = vpop.f32.mrf.mxu3 }
 0x143   : > { %v4742_v10 = vadd.f32 %v4733_v43, %v1387_v51  ;;  %v3770_v51 = vld [vmem:[#allocation5 + $0x290] sm:$0xf0] }
 0x144   : > { %v1368_v44 = vpop.f32.mrf.mxu2  ;;  %v1458_v7 = vpop.f32.mrf.mxu0  ;;  %v3390_v36 = vor.u32 %v3770_v51, %v3389_v48  ;;  %v3253_v51 = vld [vmem:[#allocation5 + $0x140] sm:$0xf] }
 0x145   : > { %v4749_v3 = vadd.f32 %v4546_v29, %v1368_v44  ;;  %v2135_v45 = vmax.f32 %v4739_v12, %v4742_v10  ;;  %v4753_v46 = vpop.f32.mrf.mxu1  ;;  %v2186_v19 = vadd.f32 %v4569_v57, %v1458_v7  ;;  %1821 = vmatpush.bf16.msrb.mxu0 %v3458_v25  ;;  %v4772_v7 = vadd.f32 %v4540_v20, %v4664_v16  ;;  %v3753_v25 = vld [vmem:[#allocation5 + $0x208] sm:$0xf0] }
 0x147   : > { %v2158_v11 = vmax.f32 %v4746_v59, %v4749_v3  ;;  %v4761_v34 = vmax.f32 %v2152_v42, %v2186_v19  ;;  %v4863_v59 = vperm.slane %v4533_v18, 3  ;;  %v3812_v3 = vld [vmem:[#allocation5 + $0x3e4] sm:$0xf] }
 0x149   : > { %1822 = vmatpush.bf16.msrb.mxu0 %v3390_v36  ;;  %v4795_v36 = vadd.f32 %v4723_v13, %v4553_v41 }
 0x14a   : > { %v1389_v32 = vpop.f32.mrf.mxu3 }
 0x14b   : > { %v4768_v44 = vadd.f32 %v4733_v43, %v1389_v32  ;;  %v3322_v32 = vor.u32 %v3753_v25, %v3321_v55 }
 0x14c   : > { %v1370_v1 = vpop.f32.mrf.mxu2  ;;  %v1461_v23 = vpop.f32.mrf.mxu0 }
 0x14d   : > { %v4775_v37 = vadd.f32 %v4546_v29, %v1370_v1  ;;  %v2137_v42 = vmax.f32 %v4765_v61, %v4768_v44  ;;  %v4779_v19 = vpop.f32.mrf.mxu1  ;;  %v2188_v33 = vadd.f32 %v4569_v57, %v1461_v23  ;;  %1823 = vmatpush.bf16.msrb.mxu0 %v3322_v32  ;;  %v3736_v1 = vld [vmem:[#allocation5 + $0x180] sm:$0xf0]  ;;  %v3185_v32 = vld [vmem:[#allocation5 + $0xb8] sm:$0xf] }
 0x14f   : > { %v2160_v63 = vmax.f32 %v4772_v7, %v4775_v37  ;;  %v4787_v16 = vmax.f32 %v2154_v35, %v2188_v33  ;;  %1587 = vmatmul.bf16.gmra.mxu3 %v4488_v24  ;;  %1656 = vmatmul.bf16.gmra.mxu0 %v4505_v49  ;;  %v3254_v24 = vor.u32 %v3736_v1, %v3253_v51  ;;  %v3117_v33 = vld [vmem:[#allocation5 + $0x30] sm:$0xf] }
 0x150   : > { %1519 = vmatmul.bf16.gmra.mxu1 %v4519_v27  ;;  %v4802_v49 = vadd.f32 %v4540_v20, %v4687_v2 }
 0x151   : > { %1568 = vmatmul.bf16.gmra.mxu2 %v4519_v27  ;;  %1824 = vmatpush.bf16.msrb.mxu0 %v3254_v24  ;;  %v4824_v24 = vadd.f32 %v4723_v13, %v4561_v52 }
 0x152   : > { %v1392_v48 = vpop.f32.mrf.mxu3 }
 0x153   : > { %v4798_v17 = vadd.f32 %v4733_v43, %v1392_v48  ;;  %v3719_v48 = vld [vmem:[#allocation5 + $0xf8] sm:$0xf0] }
 0x154   : > { %v1373_v26 = vpop.f32.mrf.mxu2  ;;  %v1463_v23 = vpop.f32.mrf.mxu0  ;;  %v3186_v51 = vor.u32 %v3719_v48, %v3185_v32 }
 0x155   : > { %v4805_v35 = vadd.f32 %v4546_v29, %v1373_v26  ;;  %v4809_v55 = vpop.f32.mrf.mxu1  ;;  %v2190_v41 = vadd.f32 %v4569_v57, %v1463_v23  ;;  %v4820_v26 = vperm.slane %v4708_v53, 2  ;;  %v3702_v23 = vld [vmem:[#allocation5 + $0x70] sm:$0xf0] }
 0x156   : > { %1825 = vmatpush.bf16.msrb.mxu0 %v3186_v51  ;;  %v3118_v5 = vor.u32 %v3702_v23, %v3117_v33 }
 0x157   : > { %v2162_v25 = vmax.f32 %v4802_v49, %v4805_v35  ;;  %v4817_v2 = vmax.f32 %v2156_v31, %v2190_v41 }
 0x15a   : > { %v1394_v1 = vpop.f32.mrf.mxu3  ;;  %1826 = vmatpush.bf16.msrb.mxu0 %v3118_v5 }
 0x15b   : > { %v4827_v35 = vadd.f32 %v4733_v43, %v1394_v1  ;;  %v4858_v1 = vld [vmem:[%s4463_s11] sm:$0xff] }
 0x15c   : > { %v1375_v49 = vpop.f32.mrf.mxu2  ;;  %v1466_v41 = vpop.f32.mrf.mxu0 }
 0x15d   : > { %v4834_v31 = vadd.f32 %v4546_v29, %v1375_v49  ;;  %v2141_v32 = vmax.f32 %v4824_v24, %v4827_v35  ;;  %v2192_v52 = vadd.f32 %v4569_v57, %v1466_v41  ;;  %v1485_v48 = vpop.f32.mrf.mxu1  ;;  %v4848_v29 = vld [vmem:[%s4463_s11 + $0x10] sm:$0xff]  ;;  %v3315_v24 = vld [vmem:[#allocation5 + $0x204] sm:$0xf0] }
 0x15e   : > { %v2169_v33 = vadd.f32 %v4820_v26, %v1485_v48 }
 0x15f   : > { %v2164_v51 = vmax.f32 %v4831_v6, %v4834_v31  ;;  %v4845_v20 = vmax.f32 %v2158_v11, %v2192_v52  ;;  %1592 = vmatmul.bf16.gmra.mxu3 %v4848_v29  ;;  %1661 = vmatmul.bf16.gmra.mxu0 %v4512_v62  ;;  %v3587_v11 = vld [vmem:[#allocation5 + $0x424] sm:$0xf0]  ;;  %v4867_v62 = vadd.f32 %v4723_v13, %v4572_v60 }
 0x160   : > { %v4855_v56 = vmax.f32 %v2135_v45, %v2169_v33  ;;  %1680 = vmatmul.bf16.vlgmr.msra.gmra.mxu1 %v4858_v1  ;;  %v3590_v23 = vor.u32 %v3812_v3, %v3587_v11  ;;  %v4890_v11 = vadd.f32 %v4723_v13, %v4586_v9 }
 0x161   : > { %1729 = vmatmul.bf16.vlgmr.msra.gmra.mxu2 %v4858_v1 }
 0x162   : > { %v1397_v49 = vpop.f32.mrf.mxu3  ;;  %1770 = vmatpush.bf16.msrb.mxu3 %v3590_v23 }
 0x163   : > { %v4870_v12 = vadd.f32 %v4733_v43, %v1397_v49 }
 0x164   : > { %v1534_v10 = vpop.f32.mrf.mxu2  ;;  %v1468_v5 = vpop.f32.mrf.mxu0 }
 0x165   : > { %v2234_v45 = vadd.f32 %v4863_v59, %v1534_v10  ;;  %v2143_v6 = vmax.f32 %v4867_v62, %v4870_v12  ;;  %v2194_v31 = vadd.f32 %v4569_v57, %v1468_v5  ;;  %v1487_v41 = vpop.f32.mrf.mxu1  ;;  %v4907_v62 = vld [vmem:[%s4463_s11 + $0x18] sm:$0xff]  ;;  %v5949_v12 = vmax.f32 %v4795_v36, %v4798_v17 }
 0x166   : > { %v2171_v60 = vadd.f32 %v4820_v26, %v1487_v41  ;;  %v4923_v41 = vadd.f32 %v4723_v13, %v4599_v30 }
 0x167   : > { %v2266_v52 = vmax.f32 %v4576_v0, %v2234_v45  ;;  %v4881_v48 = vmax.f32 %v2160_v63, %v2194_v31  ;;  %v4917_v45 = vld [vmem:[%s4463_s11 + $0x8] sm:$0xff] }
 0x168   : > { %v4886_v33 = vmax.f32 %v2137_v42, %v2171_v60 }
 0x16a   : > { %v1399_v3 = vpop.f32.mrf.mxu3 }
 0x16b   : > { %v4893_v0 = vadd.f32 %v4733_v43, %v1399_v3 }
 0x16c   : > { %v1536_v23 = vpop.f32.mrf.mxu2  ;;  %v1471_v7 = vpop.f32.mrf.mxu0 }
 0x16d   : > { %v4896_v49 = vadd.f32 %v4863_v59, %v1536_v23  ;;  %v2145_v37 = vmax.f32 %v4890_v11, %v4893_v0  ;;  %v2196_v61 = vadd.f32 %v4569_v57, %v1471_v7  ;;  %v1490_v44 = vpop.f32.mrf.mxu1 }
 0x16e   : > { %v2173_v9 = vadd.f32 %v4820_v26, %v1490_v44 }
 0x16f   : > { %v2268_v42 = vmax.f32 %v4589_v14, %v4896_v49  ;;  %v4904_v63 = vmax.f32 %v2162_v25, %v2196_v61  ;;  %1597 = vmatmul.bf16.gmra.mxu3 %v4907_v62  ;;  %1666 = vmatmul.bf16.gmra.mxu0 %v4519_v27  ;;  %v3795_v14 = vld [vmem:[#allocation5 + $0x35c] sm:$0xf]  ;;  %v3519_v25 = vld [vmem:[#allocation5 + $0x39c] sm:$0xf0] }
 0x170   : > { %v4914_v10 = vmax.f32 %v5949_v12, %v2173_v9  ;;  %1685 = vmatmul.bf16.gmra.mxu1 %v4917_v45  ;;  %v3522_v5 = vor.u32 %v3795_v14, %v3519_v25  ;;  %v4945_v9 = vperm.slane %v4533_v18, 4 }
 0x171   : > { %1734 = vmatmul.bf16.gmra.mxu2 %v4917_v45 }
 0x172   : > { %v1402_v31 = vpop.f32.mrf.mxu3  ;;  %1771 = vmatpush.bf16.msrb.mxu3 %v3522_v5 }
 0x173   : > { %v4926_v27 = vadd.f32 %v4733_v43, %v1402_v31  ;;  %v4966_v31 = vld [vmem:[%s4463_s11 + $0x20] sm:$0xff] }
 0x174   : > { %v1539_v36 = vpop.f32.mrf.mxu2  ;;  %v1473_v60 = vpop.f32.mrf.mxu0 }
 0x175   : > { %v4929_v17 = vadd.f32 %v4863_v59, %v1539_v36  ;;  %v2147_v3 = vmax.f32 %v4923_v41, %v4926_v27  ;;  %v2198_v23 = vadd.f32 %v4569_v57, %v1473_v60  ;;  %v1492_v49 = vpop.f32.mrf.mxu1  ;;  %v4949_v57 = vadd.f32 %v4723_v13, %v4618_v50  ;;  %v3451_v60 = vld [vmem:[#allocation5 + $0x314] sm:$0xf0] }
 0x176   : > { %v2175_v30 = vadd.f32 %v4820_v26, %v1492_v49 }
 0x177   : > { %v2270_v7 = vmax.f32 %v4604_v38, %v4929_v17  ;;  %v4937_v61 = vmax.f32 %v2164_v51, %v2198_v23  ;;  %v3778_v17 = vld [vmem:[#allocation5 + $0x2d4] sm:$0xf] }
 0x178   : > { %v4942_v44 = vmax.f32 %v2141_v32, %v2175_v30  ;;  %v3454_v23 = vor.u32 %v3778_v17, %v3451_v60 }
 0x17a   : > { %v1404_v12 = vpop.f32.mrf.mxu3  ;;  %1772 = vmatpush.bf16.msrb.mxu3 %v3454_v23 }
 0x17b   : > { %v4952_v38 = vadd.f32 %v4733_v43, %v1404_v12 }
 0x17c   : > { %v1541_v14 = vpop.f32.mrf.mxu2  ;;  %v1632_v25 = vpop.f32.mrf.mxu0 }
 0x17d   : > { %v4955_v51 = vadd.f32 %v4863_v59, %v1541_v14  ;;  %v1495_v35 = vpop.f32.mrf.mxu1  ;;  %v2300_v18 = vadd.f32 %v4945_v9, %v1632_v25  ;;  %v4999_v25 = vadd.f32 %v4723_v13, %v4654_v54  ;;  %v3179_v54 = vld [vmem:[#allocation5 + $0xf4] sm:$0xf0] }
 0x17e   : > { %v2177_v50 = vadd.f32 %v4820_v26, %v1495_v35 }
 0x17f   : > { %v4963_v5 = vmax.f32 %v2266_v52, %v2300_v18  ;;  %1602 = vmatmul.bf16.gmra.mxu3 %v4966_v31  ;;  %1827 = vmatmul.bf16.vlgmr.msrb.gmra.mxu0 %v4858_v1  ;;  %v4976_v52 = vadd.f32 %v4723_v13, %v4634_v8 }
 0x180   : > { %v4970_v36 = vmax.f32 %v2143_v6, %v2177_v50  ;;  %1690 = vmatmul.bf16.gmra.mxu1 %v4848_v29 }
 0x181   : > { %1739 = vmatmul.bf16.gmra.mxu2 %v4848_v29 }
 0x182   : > { %v1407_v49 = vpop.f32.mrf.mxu3 }
 0x183   : > { %v4979_v30 = vadd.f32 %v4733_v43, %v1407_v49  ;;  %v3761_v49 = vld [vmem:[#allocation5 + $0x24c] sm:$0xf] }
 0x184   : > { %v1544_v12 = vpop.f32.mrf.mxu2  ;;  %v1634_v14 = vpop.f32.mrf.mxu0 }
 0x185   : > { %v4982_v6 = vadd.f32 %v4863_v59, %v1544_v12  ;;  %v1497_v35 = vpop.f32.mrf.mxu1  ;;  %v2302_v18 = vadd.f32 %v4945_v9, %v1634_v14  ;;  %v3383_v12 = vld [vmem:[#allocation5 + $0x28c] sm:$0xf0] }
 0x186   : > { %v2179_v8 = vadd.f32 %v4820_v26, %v1497_v35  ;;  %v3386_v35 = vor.u32 %v3761_v49, %v3383_v12  ;;  %v5016_v49 = vld [vmem:[%s4463_s11 + $0x28] sm:$0xff] }
 0x187   : > { %v4990_v17 = vmax.f32 %v2268_v42, %v2302_v18 }
 0x188   : > { %v4995_v60 = vmax.f32 %v2145_v37, %v2179_v8  ;;  %1773 = vmatpush.bf16.msrb.mxu3 %v3386_v35 }
 0x18a   : > { %v1409_v23 = vpop.f32.mrf.mxu3 }
 0x18b   : > { %v5002_v14 = vadd.f32 %v4733_v43, %v1409_v23  ;;  %v3744_v23 = vld [vmem:[#allocation5 + $0x1c4] sm:$0xf] }
 0x18c   : > { %v1546_v50 = vpop.f32.mrf.mxu2  ;;  %v1637_v18 = vpop.f32.mrf.mxu0 }
 0x18d   : > { %v5005_v42 = vadd.f32 %v4863_v59, %v1546_v50  ;;  %v1500_v0 = vpop.f32.mrf.mxu1  ;;  %v2304_v37 = vadd.f32 %v4945_v9, %v1637_v18  ;;  %v3318_v50 = vor.u32 %v3744_v23, %v3315_v24  ;;  %v3247_v18 = vld [vmem:[#allocation5 + $0x17c] sm:$0xf0] }
 0x18e   : > { %v2181_v8 = vadd.f32 %v4820_v26, %v1500_v0  ;;  %v5029_v0 = vadd.f32 %v4723_v13, %v4673_v40 }
 0x18f   : > { %v5013_v32 = vmax.f32 %v2270_v7, %v2304_v37  ;;  %1607 = vmatmul.bf16.gmra.mxu3 %v5016_v49  ;;  %1832 = vmatmul.bf16.gmra.mxu0 %v4917_v45  ;;  %v3727_v7 = vld [vmem:[#allocation5 + $0x13c] sm:$0xf] }
 0x190   : > { %v5023_v12 = vmax.f32 %v2147_v3, %v2181_v8  ;;  %1695 = vmatmul.bf16.gmra.mxu1 %v4907_v62  ;;  %1774 = vmatpush.bf16.msrb.mxu3 %v3318_v50  ;;  %v3250_v23 = vor.u32 %v3727_v7, %v3247_v18  ;;  %v5952_v7 = vmax.f32 %v4623_v58, %v4955_v51 }
 0x191   : > { %5950 = vst [vmem:[#allocation16_spill] sm:$0xff] %v5013_v32  ;;  %1744 = vmatmul.bf16.gmra.mxu2 %v4907_v62  ;;  %v5954_v3 = vmax.f32 %v4949_v57, %v4952_v38  ;;  %v5088_v38 = vadd.f32 %v4723_v13, %v4717_v21 }
 0x192   : > { %5951 = vst [vmem:[#allocation17_spill] sm:$0xff] %v5023_v12  ;;  %v1412_v35 = vpop.f32.mrf.mxu3  ;;  %v3111_v12 = vld [vmem:[#allocation5 + $0x6c] sm:$0xf0] }
 0x193   : > { %v5032_v37 = vadd.f32 %v4733_v43, %v1412_v35  ;;  %v3710_v35 = vld [vmem:[#allocation5 + $0xb4] sm:$0xf] }
 0x194   : > { %v1549_v24 = vpop.f32.mrf.mxu2  ;;  %v1639_v27 = vpop.f32.mrf.mxu0  ;;  %1775 = vmatpush.bf16.msrb.mxu3 %v3250_v23 }
 0x195   : > { %v5035_v41 = vadd.f32 %v4863_v59, %v1549_v24  ;;  %v1502_v8 = vpop.f32.mrf.mxu1  ;;  %v2306_v50 = vadd.f32 %v4945_v9, %v1639_v27  ;;  %v3182_v24 = vor.u32 %v3710_v35, %v3179_v54  ;;  %v3693_v27 = vld [vmem:[#allocation5 + $0x2c] sm:$0xf] }
 0x196   : > { %v2183_v11 = vadd.f32 %v4820_v26, %v1502_v8  ;;  %v5055_v8 = vadd.f32 %v4723_v13, %v4696_v28  ;;  %v3114_v51 = vor.u32 %v3693_v27, %v3111_v12  ;;  %v3813_v35 = vld [vmem:[#allocation5 + $0x3ec] sm:$0xf]  ;;  %v5956_v12 = vmax.f32 %v4639_v22, %v4982_v6  ;;  %v5075_v27 = vld [vmem:[%s4463_s11 + $0x30] sm:$0xff] }
 0x197   : > { %v5046_v18 = vmax.f32 %v5952_v7, %v2306_v50  ;;  %v3595_v7 = vld [vmem:[#allocation5 + $0x42c] sm:$0xf0] }
 0x198   : > { %v5051_v32 = vmax.f32 %v5954_v3, %v2183_v11  ;;  %1776 = vmatpush.bf16.msrb.mxu3 %v3182_v24  ;;  %v3601_v24 = vld [vmem:[#allocation5 + $0x3f0] sm:$0xf] }
 0x199   : > { %5953 = vst [vmem:[#allocation18_spill] sm:$0xff] %v5046_v18  ;;  %v3397_v18 = vld [vmem:[#allocation5 + $0x258] sm:$0xf] }
 0x19a   : > { %5955 = vst [vmem:[#allocation19_spill] sm:$0xff] %v5051_v32  ;;  %v1414_v23 = vpop.f32.mrf.mxu3  ;;  %v5114_v32 = vadd.f32 %v4723_v13, %v4753_v46  ;;  %v3125_v46 = vld [vmem:[#allocation5 + $0x38] sm:$0xf] }
 0x19b   : > { %v5058_v40 = vadd.f32 %v4733_v43, %v1414_v23 }
 0x19c   : > { %v1551_v58 = vpop.f32.mrf.mxu2  ;;  %v1642_v57 = vpop.f32.mrf.mxu0  ;;  %1777 = vmatpush.bf16.msrb.mxu3 %v3114_v51  ;;  %v3822_v51 = vld [vmem:[#allocation5 + $0x430] sm:$0xf0] }
 0x19d   : > { %v5061_v54 = vadd.f32 %v4863_v59, %v1551_v58  ;;  %v1505_v11 = vpop.f32.mrf.mxu1  ;;  %v2308_v3 = vadd.f32 %v4945_v9, %v1642_v57  ;;  %v3598_v58 = vor.u32 %v3813_v35, %v3595_v7  ;;  %v5958_v57 = vmax.f32 %v4976_v52, %v4979_v30  ;;  %v3805_v7 = vld [vmem:[#allocation5 + $0x3a8] sm:$0xf0] }
 0x19e   : > { %v2185_v50 = vadd.f32 %v4820_v26, %v1505_v11  ;;  %v3602_v22 = vor.u32 %v3822_v51, %v3601_v24  ;;  %v3788_v51 = vld [vmem:[#allocation5 + $0x320] sm:$0xf0] }
 0x19f   : > { %v5072_v23 = vmax.f32 %v5956_v12, %v2308_v3  ;;  %1612 = vmatmul.bf16.gmra.mxu3 %v5075_v27  ;;  %1837 = vmatmul.bf16.gmra.mxu0 %v4848_v29  ;;  %v3796_v3 = vld [vmem:[#allocation5 + $0x364] sm:$0xf]  ;;  %v3527_v12 = vld [vmem:[#allocation5 + $0x3a4] sm:$0xf0] }
 0x1a0   : > { %v5082_v11 = vmax.f32 %v5958_v57, %v2185_v50  ;;  %1700 = vmatmul.bf16.gmra.mxu1 %v4966_v31  ;;  %1917 = vmatpush.bf16.msrb.mxu2 %v3602_v22  ;;  %v3530_v30 = vor.u32 %v3796_v3, %v3527_v12  ;;  %v3533_v50 = vld [vmem:[#allocation5 + $0x368] sm:$0xf]  ;;  %v3779_v3 = vld [vmem:[#allocation5 + $0x2dc] sm:$0xf]  ;;  %v3459_v12 = vld [vmem:[#allocation5 + $0x31c] sm:$0xf0] }
 0x1a1   : > { %5957 = vst [vmem:[#allocation20_spill] sm:$0xff] %v5072_v23  ;;  %1749 = vmatmul.bf16.gmra.mxu2 %v4966_v31  ;;  %1868 = vmatpush.bf16.msrb.mxu1 %v3598_v58  ;;  %v3534_v58 = vor.u32 %v3805_v7, %v3533_v50  ;;  %v3465_v23 = vld [vmem:[#allocation5 + $0x2e0] sm:$0xf]  ;;  %v3462_v7 = vor.u32 %v3779_v3, %v3459_v12  ;;  %v3745_v12 = vld [vmem:[#allocation5 + $0x1cc] sm:$0xf] }
 0x1a2   : > { %5959 = vst [vmem:[#allocation21_spill] sm:$0xff] %v5082_v11  ;;  %v1417_v6 = vpop.f32.mrf.mxu3  ;;  %v3466_v11 = vor.u32 %v3788_v51, %v3465_v23 }
 0x1a3   : > { %v5091_v35 = vadd.f32 %v4733_v43, %v1417_v6 }
 0x1a4   : > { %v1554_v52 = vpop.f32.mrf.mxu2  ;;  %v1644_v24 = vpop.f32.mrf.mxu0  ;;  %1918 = vmatpush.bf16.msrb.mxu2 %v3534_v58  ;;  %v3762_v58 = vld [vmem:[#allocation5 + $0x254] sm:$0xf] }
 0x1a5   : > { %v5094_v57 = vadd.f32 %v4863_v59, %v1554_v52  ;;  %v1507_v22 = vpop.f32.mrf.mxu1  ;;  %v2310_v28 = vadd.f32 %v4945_v9, %v1644_v24  ;;  %1869 = vmatpush.bf16.msrb.mxu1 %v3530_v30  ;;  %v5960_v52 = vmax.f32 %v4662_v4, %v5005_v42  ;;  %v5961_v24 = vmax.f32 %v4999_v25, %v5002_v14  ;;  %v3771_v25 = vld [vmem:[#allocation5 + $0x298] sm:$0xf0] }
 0x1a6   : > { %v2187_v6 = vadd.f32 %v4820_v26, %v1507_v22  ;;  %v3391_v22 = vld [vmem:[#allocation5 + $0x294] sm:$0xf0]  ;;  %v3398_v51 = vor.u32 %v3771_v25, %v3397_v18 }
 0x1a7   : > { %v5105_v50 = vmax.f32 %v5960_v52, %v2310_v28  ;;  %v3394_v28 = vor.u32 %v3762_v58, %v3391_v22  ;;  %v3323_v52 = vld [vmem:[#allocation5 + $0x20c] sm:$0xf0]  ;;  %v5134_v58 = vld [vmem:[%s4463_s11 + $0x38] sm:$0xff] }
 0x1a8   : > { %v5110_v30 = vmax.f32 %v5961_v24, %v2187_v6  ;;  %1919 = vmatpush.bf16.msrb.mxu2 %v3466_v11  ;;  %v5962_v24 = vmax.f32 %v4681_v15, %v5035_v41  ;;  %v3326_v22 = vor.u32 %v3745_v12, %v3323_v52 }
 0x1a9   : > { %1870 = vmatpush.bf16.msrb.mxu1 %v3462_v7  ;;  %v3329_v7 = vld [vmem:[#allocation5 + $0x1d0] sm:$0xf] }
 0x1aa   : > { %v1419_v21 = vpop.f32.mrf.mxu3 }
 0x1ab   : > { %v5117_v4 = vadd.f32 %v4733_v43, %v1419_v21 }
 0x1ac   : > { %v1556_v42 = vpop.f32.mrf.mxu2  ;;  %v1647_v23 = vpop.f32.mrf.mxu0  ;;  %1920 = vmatpush.bf16.msrb.mxu2 %v3398_v51  ;;  %v3255_v51 = vld [vmem:[#allocation5 + $0x184] sm:$0xf0] }
 0x1ad   : > { %v5120_v14 = vadd.f32 %v4863_v59, %v1556_v42  ;;  %v1510_v6 = vpop.f32.mrf.mxu1  ;;  %v2312_v3 = vadd.f32 %v4945_v9, %v1647_v23  ;;  %1871 = vmatpush.bf16.msrb.mxu1 %v3394_v28  ;;  %v3754_v42 = vld [vmem:[#allocation5 + $0x210] sm:$0xf0]  ;;  %v5964_v28 = vmax.f32 %v5029_v0, %v5032_v37  ;;  %v3728_v23 = vld [vmem:[#allocation5 + $0x144] sm:$0xf] }
 0x1ae   : > { %v2189_v21 = vadd.f32 %v4820_v26, %v1510_v6  ;;  %v3330_v15 = vor.u32 %v3754_v42, %v3329_v7  ;;  %v3261_v6 = vld [vmem:[#allocation5 + $0x148] sm:$0xf]  ;;  %v3258_v37 = vor.u32 %v3728_v23, %v3255_v51  ;;  %v3187_v23 = vld [vmem:[#allocation5 + $0xfc] sm:$0xf0] }
 0x1af   : > { %v5131_v18 = vmax.f32 %v5962_v24, %v2312_v3  ;;  %1617 = vmatmul.bf16.gmra.mxu3 %v5134_v58  ;;  %1842 = vmatmul.bf16.gmra.mxu0 %v4907_v62  ;;  %v5147_v3 = vadd.f32 %v4723_v13, %v4779_v19  ;;  %v3193_v51 = vld [vmem:[#allocation5 + $0xc0] sm:$0xf] }
 0x1b0   : > { %v5141_v25 = vmax.f32 %v5964_v28, %v2189_v21  ;;  %1705 = vmatmul.bf16.gmra.mxu1 %v5016_v49  ;;  %1921 = vmatpush.bf16.msrb.mxu2 %v3330_v15  ;;  %v3737_v21 = vld [vmem:[#allocation5 + $0x188] sm:$0xf0] }
 0x1b1   : > { %5963 = vst [vmem:[#allocation22_spill] sm:$0xff] %v5131_v18  ;;  %1754 = vmatmul.bf16.gmra.mxu2 %v5016_v49  ;;  %1872 = vmatpush.bf16.msrb.mxu1 %v3326_v22  ;;  %v3262_v24 = vor.u32 %v3737_v21, %v3261_v6  ;;  %v3720_v22 = vld [vmem:[#allocation5 + $0x100] sm:$0xf0]  ;;  %v5173_v18 = vadd.f32 %v4723_v13, %v4809_v55  ;;  %v3609_v55 = vld [vmem:[#allocation5 + $0x3f8] sm:$0xf] }
 0x1b2   : > { %v1422_v41 = vpop.f32.mrf.mxu3  ;;  %v3194_v11 = vor.u32 %v3720_v22, %v3193_v51  ;;  %v5967_v51 = vmax.f32 %v4728_v47, %v5094_v57  ;;  %v3541_v57 = vld [vmem:[#allocation5 + $0x370] sm:$0xf] }
 0x1b3   : > { %v5150_v12 = vadd.f32 %v4733_v43, %v1422_v41  ;;  %v3711_v41 = vld [vmem:[#allocation5 + $0xbc] sm:$0xf] }
 0x1b4   : > { %v1559_v0 = vpop.f32.mrf.mxu2  ;;  %v1649_v7 = vpop.f32.mrf.mxu0  ;;  %1922 = vmatpush.bf16.msrb.mxu2 %v3262_v24  ;;  %v3190_v21 = vor.u32 %v3711_v41, %v3187_v23  ;;  %v3694_v24 = vld [vmem:[#allocation5 + $0x34] sm:$0xf]  ;;  %v3703_v41 = vld [vmem:[#allocation5 + $0x78] sm:$0xf0] }
 0x1b5   : > { %v5153_v52 = vadd.f32 %v4863_v59, %v1559_v0  ;;  %v1512_v42 = vpop.f32.mrf.mxu1  ;;  %v2314_v28 = vadd.f32 %v4945_v9, %v1649_v7  ;;  %1873 = vmatpush.bf16.msrb.mxu1 %v3258_v37  ;;  %v5965_v0 = vmax.f32 %v4704_v39, %v5061_v54  ;;  %v5966_v7 = vmax.f32 %v5055_v8, %v5058_v40 }
 0x1b6   : > { %v2191_v15 = vadd.f32 %v4820_v26, %v1512_v42  ;;  %v3119_v42 = vld [vmem:[#allocation5 + $0x74] sm:$0xf0]  ;;  %v3126_v22 = vor.u32 %v3703_v41, %v3125_v46  ;;  %v5195_v46 = vperm.slane %v4708_v53, 3 }
 0x1b7   : > { %v5164_v6 = vmax.f32 %v5965_v0, %v2314_v28  ;;  %v3122_v28 = vor.u32 %v3694_v24, %v3119_v42  ;;  %v3806_v42 = vld [vmem:[#allocation5 + $0x3b0] sm:$0xf0] }
 0x1b8   : > { %v5169_v37 = vmax.f32 %v5966_v7, %v2191_v15  ;;  %1923 = vmatpush.bf16.msrb.mxu2 %v3194_v11  ;;  %v5968_v7 = vmax.f32 %v5088_v38, %v5091_v35  ;;  %v3542_v41 = vor.u32 %v3806_v42, %v3541_v57 }
 0x1b9   : > { %1874 = vmatpush.bf16.msrb.mxu1 %v3190_v21 }
 0x1ba   : > { %v1424_v19 = vpop.f32.mrf.mxu3 }
 0x1bb   : > { %v5176_v39 = vadd.f32 %v4733_v43, %v1424_v19  ;;  %v3823_v19 = vld [vmem:[#allocation5 + $0x438] sm:$0xf0] }
 0x1bc   : > { %v1561_v54 = vpop.f32.mrf.mxu2  ;;  %v1652_v8 = vpop.f32.mrf.mxu0  ;;  %1924 = vmatpush.bf16.msrb.mxu2 %v3126_v22  ;;  %v3610_v21 = vor.u32 %v3823_v19, %v3609_v55  ;;  %v3473_v55 = vld [vmem:[#allocation5 + $0x2e8] sm:$0xf]  ;;  %v3789_v19 = vld [vmem:[#allocation5 + $0x328] sm:$0xf0] }
 0x1bd   : > { %v5179_v40 = vadd.f32 %v4863_v59, %v1561_v54  ;;  %v2165_v11 = vmax.f32 %v5173_v18, %v5176_v39  ;;  %v1515_v15 = vpop.f32.mrf.mxu1  ;;  %v2316_v23 = vadd.f32 %v4945_v9, %v1652_v8  ;;  %1875 = vmatpush.bf16.msrb.mxu1 %v3122_v28 }
 0x1be   : > { %v2193_v43 = vadd.f32 %v4820_v26, %v1515_v15  ;;  %2015 = vmatpush.bf16.msra.mxu0 %v3610_v21 }
 0x1bf   : > { %v2288_v13 = vmax.f32 %v4817_v2, %v5179_v40  ;;  %v5190_v0 = vmax.f32 %v5967_v51, %v2316_v23  ;;  %1778 = vmatmul.bf16.vlgmr.msrb.gmra.mxu3 %v4858_v1  ;;  %1847 = vmatmul.bf16.gmra.mxu0 %v4966_v31  ;;  %v5969_v51 = vmax.f32 %v4761_v34, %v5120_v14 }
 0x1c0   : > { %v5200_v24 = vmax.f32 %v5968_v7, %v2193_v43  ;;  %1710 = vmatmul.bf16.gmra.mxu1 %v5075_v27  ;;  %v3474_v7 = vor.u32 %v3789_v19, %v3473_v55  ;;  %v3337_v55 = vld [vmem:[#allocation5 + $0x1d8] sm:$0xf]  ;;  %v3755_v19 = vld [vmem:[#allocation5 + $0x218] sm:$0xf0] }
 0x1c1   : > { %1759 = vmatmul.bf16.gmra.mxu2 %v5075_v27 }
 0x1c2   : > { %v1583_v47 = vpop.f32.mrf.mxu3  ;;  %2016 = vmatpush.bf16.msra.mxu0 %v3542_v41  ;;  %v3772_v41 = vld [vmem:[#allocation5 + $0x2a0] sm:$0xf0] }
 0x1c3   : > { %v5205_v28 = vadd.f32 %v5195_v46, %v1583_v47  ;;  %v5970_v47 = vmax.f32 %v5114_v32, %v5117_v4 }
 0x1c4   : > { %v1564_v54 = vpop.f32.mrf.mxu2  ;;  %v1654_v22 = vpop.f32.mrf.mxu0 }
 0x1c5   : > { %v5208_v8 = vadd.f32 %v4863_v59, %v1564_v54  ;;  %v1517_v35 = vpop.f32.mrf.mxu1  ;;  %v2318_v15 = vadd.f32 %v4945_v9, %v1654_v22  ;;  %v3405_v54 = vld [vmem:[#allocation5 + $0x260] sm:$0xf] }
 0x1c6   : > { %v2195_v43 = vadd.f32 %v4820_v26, %v1517_v35  ;;  %2017 = vmatpush.bf16.msra.mxu0 %v3474_v7  ;;  %v3406_v38 = vor.u32 %v3772_v41, %v3405_v54  ;;  %v3269_v41 = vld [vmem:[#allocation5 + $0x150] sm:$0xf] }
 0x1c7   : > { %v5219_v21 = vmax.f32 %v5969_v51, %v2318_v15  ;;  %v5971_v51 = vmax.f32 %v4787_v16, %v5153_v52  ;;  %v3738_v16 = vld [vmem:[#allocation5 + $0x190] sm:$0xf0] }
 0x1c8   : > { %v5224_v57 = vmax.f32 %v5970_v47, %v2195_v43  ;;  %v3338_v47 = vor.u32 %v3755_v19, %v3337_v55 }
 0x1ca   : > { %v1585_v42 = vpop.f32.mrf.mxu3  ;;  %2018 = vmatpush.bf16.msra.mxu0 %v3406_v38  ;;  %v5973_v38 = vmax.f32 %v5147_v3, %v5150_v12 }
 0x1cb   : > { %v5227_v35 = vadd.f32 %v5195_v46, %v1585_v42 }
 0x1cc   : > { %v1566_v22 = vpop.f32.mrf.mxu2  ;;  %v1657_v34 = vpop.f32.mrf.mxu0 }
 0x1cd   : > { %v5230_v23 = vadd.f32 %v4863_v59, %v1566_v22  ;;  %v2269_v14 = vmax.f32 %v4886_v33, %v5227_v35  ;;  %v1520_v15 = vpop.f32.mrf.mxu1  ;;  %v2320_v32 = vadd.f32 %v4945_v9, %v1657_v34  ;;  %v3270_v34 = vor.u32 %v3738_v16, %v3269_v41 }
 0x1ce   : > { %v2197_v43 = vadd.f32 %v4820_v26, %v1520_v15  ;;  %2019 = vmatpush.bf16.msra.mxu0 %v3338_v47  ;;  %v3721_v47 = vld [vmem:[#allocation5 + $0x108] sm:$0xf0] }
 0x1cf   : > { %v2292_v4 = vmax.f32 %v4881_v48, %v5230_v23  ;;  %v5241_v7 = vmax.f32 %v5971_v51, %v2320_v32  ;;  %1783 = vmatmul.bf16.gmra.mxu3 %v4917_v45  ;;  %1852 = vmatmul.bf16.gmra.mxu0 %v5016_v49  ;;  %v3201_v51 = vld [vmem:[#allocation5 + $0xc8] sm:$0xf] }
 0x1d0   : > { %v5248_v42 = vmax.f32 %v5973_v38, %v2197_v43  ;;  %1715 = vmatmul.bf16.gmra.mxu1 %v5134_v58 }
 0x1d1   : > { %5972 = vst [vmem:[#allocation23_spill] sm:$0xff] %v5241_v7  ;;  %1764 = vmatmul.bf16.gmra.mxu2 %v5134_v58  ;;  %v3828_v7 = vld [vmem:[#allocation8 + $0x20] sm:$0xff] }
 0x1d2   : > { %v1588_v54 = vpop.f32.mrf.mxu3  ;;  %2020 = vmatpush.bf16.msra.mxu0 %v3270_v34 }
 0x1d3   : > { %v5253_v22 = vadd.f32 %v5195_v46, %v1588_v54  ;;  %v3202_v54 = vor.u32 %v3721_v47, %v3201_v51 }
 0x1d4   : > { %v1569_v52 = vpop.f32.mrf.mxu2  ;;  %v1659_v32 = vpop.f32.mrf.mxu0 }
 0x1d5   : > { %v5256_v15 = vadd.f32 %v4863_v59, %v1569_v52  ;;  %v2271_v3 = vmax.f32 %v4914_v10, %v5253_v22  ;;  %v1522_v12 = vpop.f32.mrf.mxu1  ;;  %v2322_v43 = vadd.f32 %v4945_v9, %v1659_v32  ;;  %v5275_v52 = vperm.slane %v4708_v53, 4 }
 0x1d6   : > { %v2199_v19 = vadd.f32 %v4820_v26, %v1522_v12  ;;  %2021 = vmatpush.bf16.msra.mxu0 %v3202_v54  ;;  %v3704_v26 = vld [vmem:[#allocation5 + $0x80] sm:$0xf0]  ;;  %v5976_v12 = vmax.f32 %v4845_v20, %v5208_v8  ;;  %v3814_v20 = vld [vmem:[#allocation5 + $0x3f4] sm:$0xf]  ;;  %v3603_v8 = vld [vmem:[#allocation5 + $0x434] sm:$0xf0] }
 0x1d7   : > { %v2294_v55 = vmax.f32 %v4904_v63, %v5256_v15  ;;  %v5267_v38 = vmax.f32 %v2288_v13, %v2322_v43  ;;  %v3133_v63 = vld [vmem:[#allocation5 + $0x40] sm:$0xf]  ;;  %v3606_v51 = vor.u32 %v3814_v20, %v3603_v8 }
 0x1d8   : > { %v5272_v41 = vmax.f32 %v2165_v11, %v2199_v19  ;;  %v3134_v2 = vor.u32 %v3704_v26, %v3133_v63 }
 0x1d9   : > { %5974 = vst [vmem:[#allocation24_spill] sm:$0xff] %v5267_v38  ;;  %1966 = vmatpush.bf16.msra.mxu3 %v3606_v51 }
 0x1da   : > { %5975 = vst [vmem:[#allocation25_spill] sm:$0xff] %v5272_v41  ;;  %v1590_v16 = vpop.f32.mrf.mxu3  ;;  %2022 = vmatpush.bf16.msra.mxu0 %v3134_v2 }
 0x1db   : > { %v5278_v15 = vadd.f32 %v5195_v46, %v1590_v16 }
 0x1dc   : > { %v1571_v34 = vpop.f32.mrf.mxu2  ;;  %v1662_v13 = vpop.f32.mrf.mxu0 }
 0x1dd   : > { %v5281_v40 = vadd.f32 %v4863_v59, %v1571_v34  ;;  %v2273_v18 = vmax.f32 %v4942_v44, %v5278_v15  ;;  %v2324_v39 = vadd.f32 %v4945_v9, %v1662_v13  ;;  %v1681_v11 = vpop.f32.mrf.mxu1  ;;  %v5977_v59 = vmax.f32 %v4855_v56, %v5205_v28 }
 0x1de   : > { %v2301_v32 = vadd.f32 %v5275_v52, %v1681_v11 }
 0x1df   : > { %v2296_v53 = vmax.f32 %v4937_v61, %v5281_v40  ;;  %v5292_v43 = vmax.f32 %v5976_v12, %v2324_v39  ;;  %1788 = vmatmul.bf16.gmra.mxu3 %v4848_v29  ;;  %1857 = vmatmul.bf16.gmra.mxu0 %v5075_v27  ;;  %v5303_v61 = vld [vmem:[#allocation7] sm:$0xff] }
 0x1e0   : > { %v5299_v44 = vmax.f32 %v5977_v59, %v2301_v32  ;;  %1876 = vmatmul.bf16.vlgmr.msrb.gmra.mxu1 %v4858_v1  ;;  %v5306_v19 = vperm.slane %v5303_v61, 5 }
 0x1e1   : > { %1925 = vmatmul.bf16.vlgmr.msrb.gmra.mxu2 %v4858_v1 }
 0x1e2   : > { %v1593_v47 = vpop.f32.mrf.mxu3 }
 0x1e3   : > { %v2243_v54 = vadd.f32 %v5195_v46, %v1593_v47 }
 0x1e4   : > { %v1730_v16 = vpop.f32.mrf.mxu2  ;;  %v1664_v28 = vpop.f32.mrf.mxu0 }
 0x1e5   : > { %v5310_v56 = vadd.f32 %v5306_v19, %v1730_v16  ;;  %v2275_v63 = vmax.f32 %v4970_v36, %v2243_v54  ;;  %v2326_v26 = vadd.f32 %v4945_v9, %v1664_v28  ;;  %v1683_v34 = vpop.f32.mrf.mxu1  ;;  %v5982_v28 = vld [vmem:[#allocation17_spill] sm:$0xff] }
 0x1e6   : > { %v2303_v2 = vadd.f32 %v5275_v52, %v1683_v34  ;;  %v3195_v34 = vld [vmem:[#allocation5 + $0x104] sm:$0xf0] }
 0x1e7   : > { %v5320_v40 = vmax.f32 %v2292_v4, %v2326_v26  ;;  %v3535_v4 = vld [vmem:[#allocation5 + $0x3ac] sm:$0xf0]  ;;  %v5983_v26 = vld [vmem:[#allocation16_spill] sm:$0xff] }
 0x1e8   : > { %v5325_v13 = vmax.f32 %v2269_v14, %v2303_v2 }
 0x1e9   : > { %5978 = vst [vmem:[#allocation26_spill] sm:$0xff] %v5320_v40 }
 0x1ea   : > { %5979 = vst [vmem:[#allocation27_spill] sm:$0xff] %v5325_v13  ;;  %v1595_v39 = vpop.f32.mrf.mxu3  ;;  %v3824_v13 = vld [vmem:[#allocation8] sm:$0xff] }
 0x1eb   : > { %v2245_v36 = vadd.f32 %v5195_v46, %v1595_v39 }
 0x1ec   : > { %v1732_v11 = vpop.f32.mrf.mxu2  ;;  %v1667_v12 = vpop.f32.mrf.mxu0 }
 0x1ed   : > { %v5329_v32 = vadd.f32 %v5306_v19, %v1732_v11  ;;  %v2277_v59 = vmax.f32 %v4995_v60, %v2245_v36  ;;  %v2328_v20 = vadd.f32 %v4945_v9, %v1667_v12  ;;  %v1686_v48 = vpop.f32.mrf.mxu1  ;;  %v3797_v60 = vld [vmem:[#allocation5 + $0x36c] sm:$0xf] }
 0x1ee   : > { %v2305_v33 = vadd.f32 %v5275_v52, %v1686_v48  ;;  %v3538_v8 = vor.u32 %v3797_v60, %v3535_v4  ;;  %v5987_v4 = vld [vmem:[#allocation18_spill] sm:$0xff] }
 0x1ef   : > { %v5336_v35 = vmax.f32 %v2294_v55, %v2328_v20  ;;  %1793 = vmatmul.bf16.gmra.mxu3 %v4907_v62  ;;  %1862 = vmatmul.bf16.gmra.mxu0 %v5134_v58 }
 0x1f0   : > { %v5343_v14 = vmax.f32 %v2271_v3, %v2305_v33  ;;  %1881 = vmatmul.bf16.gmra.mxu1 %v4917_v45  ;;  %1967 = vmatpush.bf16.msra.mxu3 %v3538_v8  ;;  %v5986_v33 = vld [vmem:[#allocation19_spill] sm:$0xff] }
 0x1f1   : > { %5980 = vst [vmem:[#allocation28_spill] sm:$0xff] %v5336_v35  ;;  %1930 = vmatmul.bf16.gmra.mxu2 %v4917_v45 }
 0x1f2   : > { %5981 = vst [vmem:[#allocation29_spill] sm:$0xff] %v5343_v14  ;;  %v1598_v51 = vpop.f32.mrf.mxu3 }
 0x1f3   : > { %v2247_v55 = vadd.f32 %v5195_v46, %v1598_v51 }
 0x1f4   : > { %v1735_v47 = vpop.f32.mrf.mxu2  ;;  %v1669_v16 = vpop.f32.mrf.mxu0 }
 0x1f5   : > { %v5349_v54 = vadd.f32 %v5306_v19, %v1735_v47  ;;  %v2279_v10 = vmax.f32 %v5982_v28, %v2247_v55  ;;  %v2330_v22 = vadd.f32 %v4945_v9, %v1669_v16  ;;  %v1688_v3 = vpop.f32.mrf.mxu1  ;;  %v3467_v55 = vld [vmem:[#allocation5 + $0x324] sm:$0xf0] }
 0x1f6   : > { %v2307_v2 = vadd.f32 %v5275_v52, %v1688_v3 }
 0x1f7   : > { %v5356_v39 = vmax.f32 %v2296_v53, %v2330_v22  ;;  %v3780_v53 = vld [vmem:[#allocation5 + $0x2e4] sm:$0xf] }
 0x1f8   : > { %v5358_v36 = vmax.f32 %v2273_v18, %v2307_v2  ;;  %v3470_v47 = vor.u32 %v3780_v53, %v3467_v55  ;;  %v5989_v2 = vld [vmem:[#allocation21_spill] sm:$0xff]  ;;  %v3399_v53 = vld [vmem:[#allocation5 + $0x29c] sm:$0xf0] }
 0x1f9   : > { %5984 = vst [vmem:[#allocation17_spill] sm:$0xff] %v5356_v39 }
 0x1fa   : > { %5985 = vst [vmem:[#allocation16_spill] sm:$0xff] %v5358_v36  ;;  %v1600_v11 = vpop.f32.mrf.mxu3  ;;  %1968 = vmatpush.bf16.msra.mxu3 %v3470_v47 }
 0x1fb   : > { %v2249_v12 = vadd.f32 %v5195_v46, %v1600_v11 }
 0x1fc   : > { %v1737_v20 = vpop.f32.mrf.mxu2 }
 0x1fd   : > { %v5362_v48 = vadd.f32 %v5306_v19, %v1737_v20  ;;  %v2281_v60 = vmax.f32 %v5986_v33, %v2249_v12  ;;  %v1691_v9 = vpop.f32.mrf.mxu1  ;;  %v3331_v12 = vld [vmem:[#allocation5 + $0x214] sm:$0xf0] }
 0x1fe   : > { %v2309_v51 = vadd.f32 %v5275_v52, %v1691_v9 }
 0x1ff   : > { %1798 = vmatmul.bf16.gmra.mxu3 %v4966_v31  ;;  %2023 = vmatmul.bf16.vlgmr.msra.gmra.mxu0 %v4858_v1 }
 0x200   : > { %v5370_v18 = vmax.f32 %v2275_v63, %v2309_v51  ;;  %1886 = vmatmul.bf16.gmra.mxu1 %v4848_v29  ;;  %v5990_v63 = vld [vmem:[#allocation20_spill] sm:$0xff]  ;;  %v3763_v51 = vld [vmem:[#allocation5 + $0x25c] sm:$0xf] }
 0x201   : > { %1935 = vmatmul.bf16.gmra.mxu2 %v4848_v29 }
 0x202   : > { %5988 = vst [vmem:[#allocation19_spill] sm:$0xff] %v5370_v18  ;;  %v1603_v16 = vpop.f32.mrf.mxu3 }
 0x203   : > { %v2251_v28 = vadd.f32 %v5195_v46, %v1603_v16  ;;  %v3402_v16 = vor.u32 %v3763_v51, %v3399_v53 }
 0x204   : > { %v1740_v22 = vpop.f32.mrf.mxu2 }
 0x205   : > { %v5376_v3 = vadd.f32 %v5306_v19, %v1740_v22  ;;  %v2283_v11 = vmax.f32 %v5989_v2, %v2251_v28  ;;  %v1693_v1 = vpop.f32.mrf.mxu1  ;;  %1969 = vmatpush.bf16.msra.mxu3 %v3402_v16  ;;  %v3263_v16 = vld [vmem:[#allocation5 + $0x18c] sm:$0xf0] }
 0x206   : > { %v2311_v20 = vadd.f32 %v5275_v52, %v1693_v1 }
 0x208   : > { %v5382_v33 = vmax.f32 %v2277_v59, %v2311_v20  ;;  %v3746_v20 = vld [vmem:[#allocation5 + $0x1d4] sm:$0xf] }
 0x20a   : > { %v1605_v9 = vpop.f32.mrf.mxu3 }
 0x20b   : > { %v5385_v55 = vadd.f32 %v5195_v46, %v1605_v9  ;;  %v3334_v9 = vor.u32 %v3746_v20, %v3331_v12 }
 0x20c   : > { %v1742_v47 = vpop.f32.mrf.mxu2 }
 0x20d   : > { %v5388_v22 = vadd.f32 %v5306_v19, %v1742_v47  ;;  %v1696_v2 = vpop.f32.mrf.mxu1  ;;  %1970 = vmatpush.bf16.msra.mxu3 %v3334_v9  ;;  %v3729_v47 = vld [vmem:[#allocation5 + $0x14c] sm:$0xf]  ;;  %v3712_v9 = vld [vmem:[#allocation5 + $0xc4] sm:$0xf] }
 0x20e   : > { %v2313_v1 = vadd.f32 %v5275_v52, %v1696_v2  ;;  %v3266_v28 = vor.u32 %v3729_v47, %v3263_v16  ;;  %v3198_v23 = vor.u32 %v3712_v9, %v3195_v34  ;;  %v3695_v47 = vld [vmem:[#allocation5 + $0x3c] sm:$0xf]  ;;  %v3127_v16 = vld [vmem:[#allocation5 + $0x7c] sm:$0xf0] }
 0x20f   : > { %1803 = vmatmul.bf16.gmra.mxu3 %v5016_v49  ;;  %2028 = vmatmul.bf16.gmra.mxu0 %v4917_v45 }
 0x210   : > { %v5397_v51 = vmax.f32 %v2279_v10, %v2313_v1  ;;  %1891 = vmatmul.bf16.gmra.mxu1 %v4907_v62  ;;  %v5991_v10 = vld [vmem:[#allocation22_spill] sm:$0xff] }
 0x211   : > { %1940 = vmatmul.bf16.gmra.mxu2 %v4907_v62  ;;  %1971 = vmatpush.bf16.msra.mxu3 %v3266_v28 }
 0x212   : > { %v1608_v53 = vpop.f32.mrf.mxu3 }
 0x213   : > { %v2255_v59 = vadd.f32 %v5195_v46, %v1608_v53 }
 0x214   : > { %v1745_v2 = vpop.f32.mrf.mxu2 }
 0x215   : > { %v5403_v8 = vadd.f32 %v5306_v19, %v1745_v2  ;;  %v2287_v45 = vmax.f32 %v5141_v25, %v2255_v59  ;;  %v1698_v12 = vpop.f32.mrf.mxu1  ;;  %1972 = vmatpush.bf16.msra.mxu3 %v3198_v23  ;;  %v3130_v59 = vor.u32 %v3695_v47, %v3127_v16  ;;  %v5432_v16 = vpop.f32.mrf.mxu0 }
 0x216   : > { %v2315_v20 = vadd.f32 %v5275_v52, %v1698_v12 }
 0x218   : > { %v5409_v15 = vmax.f32 %v2281_v60, %v2315_v20 }
 0x219   : > { %1973 = vmatpush.bf16.msra.mxu3 %v3130_v59 }
 0x21a   : > { %v1610_v53 = vpop.f32.mrf.mxu3 }
 0x21b   : > { %v5412_v2 = vadd.f32 %v5195_v46, %v1610_v53 }
 0x21c   : > { %v1747_v25 = vpop.f32.mrf.mxu2 }
 0x21d   : > { %v5415_v28 = vadd.f32 %v5306_v19, %v1747_v25  ;;  %v1701_v1 = vpop.f32.mrf.mxu1  ;;  %v5447_v12 = vpop.f32.mrf.mxu0 }
 0x21e   : > { %v2317_v23 = vadd.f32 %v5275_v52, %v1701_v1 }
 0x21f   : > { %1808 = vmatmul.bf16.gmra.mxu3 %v5075_v27  ;;  %2033 = vmatmul.bf16.gmra.mxu0 %v4848_v29 }
 0x220   : > { %v5424_v60 = vmax.f32 %v2283_v11, %v2317_v23  ;;  %1896 = vmatmul.bf16.gmra.mxu1 %v4966_v31 }
 0x221   : > { %1945 = vmatmul.bf16.gmra.mxu2 %v4966_v31 }
 0x222   : > { %5992 = vst [vmem:[#allocation18_spill] sm:$0xff] %v5424_v60  ;;  %v1613_v20 = vpop.f32.mrf.mxu3 }
 0x223   : > { %v2259_v9 = vadd.f32 %v5195_v46, %v1613_v20 }
 0x224   : > { %v1750_v53 = vpop.f32.mrf.mxu2 }
 0x225   : > { %v5430_v47 = vadd.f32 %v5306_v19, %v1750_v53  ;;  %v2291_v1 = vmax.f32 %v5200_v24, %v2259_v9  ;;  %v5435_v25 = vpop.f32.mrf.mxu1 }
 0x22a   : > { %v1615_v11 = vpop.f32.mrf.mxu3 }
 0x22b   : > { %v5440_v59 = vadd.f32 %v5195_v46, %v1615_v11 }
 0x22c   : > { %v5442_v23 = vpop.f32.mrf.mxu2 }
 0x22d   : > { %v1706_v53 = vpop.f32.mrf.mxu1 }
 0x22e   : > { %v2321_v34 = vadd.f32 %v5275_v52, %v1706_v53 }
 0x22f   : > { %1813 = vmatmul.bf16.gmra.mxu3 %v5134_v58  ;;  %2038 = vmatmul.bf16.gmra.mxu0 %v4907_v62 }
 0x230   : > { %v5451_v24 = vmax.f32 %v2287_v45, %v2321_v34  ;;  %1901 = vmatmul.bf16.gmra.mxu1 %v5016_v49  ;;  %v5464_v45 = vpop.f32.mrf.mxu0 }
 0x231   : > { %1950 = vmatmul.bf16.gmra.mxu2 %v5016_v49 }
 0x232   : > { %v1618_v9 = vpop.f32.mrf.mxu3 }
 0x233   : > { %v2263_v11 = vadd.f32 %v5195_v46, %v1618_v9  ;;  %v3830_v9 = vld [vmem:[#allocation8 + $0x30] sm:$0xff] }
 0x234   : > { %v1755_v20 = vpop.f32.mrf.mxu2 }
 0x235   : > { %v5457_v29 = vadd.f32 %v5306_v19, %v1755_v20  ;;  %v2295_v53 = vmax.f32 %v5248_v42, %v2263_v11  ;;  %v5460_v60 = vpop.f32.mrf.mxu1  ;;  %v4061_v42 = vld [vmem:[%s4463_s11] sm:$0xff]  ;;  %v5476_v11 = vld [vmem:[#allocation7 + $0x8] sm:$0xff] }
 0x236   : > { %5996 = vst [vmem:[#allocation30_spill] sm:$0xff] %v5476_v11  ;;  %v5479_v62 = vperm.slane %v5476_v11, 5 }
 0x237   : > { %5993 = vst [vmem:[#allocation21_spill] sm:$0xff] %v5457_v29  ;;  %v3831_v29 = vld [vmem:[#allocation8 + $0x38] sm:$0xff] }
 0x238   : > { %2738 = vmatpush.bf16.msrb.mxu0 %v3831_v29  ;;  %3848 = vmatpush.bf16.msra.mxu1 %v3831_v29  ;;  %v4063_v29 = vld [vmem:[%s4463_s11 + $0x8] sm:$0xff] }
 0x23a   : > { %v1620_v34 = vpop.f32.mrf.mxu3 }
 0x23b   : > { %v5467_v39 = vadd.f32 %v5195_v46, %v1620_v34 }
 0x23c   : > { %v5469_v40 = vpop.f32.mrf.mxu2  ;;  %2739 = vmatpush.bf16.msrb.mxu0 %v3830_v9  ;;  %3849 = vmatpush.bf16.msra.mxu1 %v3830_v9 }
 0x23d   : > { %5994 = vst [vmem:[#allocation20_spill] sm:$0xff] %v5467_v39  ;;  %v1711_v20 = vpop.f32.mrf.mxu1  ;;  %v3829_v39 = vld [vmem:[#allocation8 + $0x28] sm:$0xff] }
 0x23e   : > { %5995 = vst [vmem:[#allocation22_spill] sm:$0xff] %v5469_v40  ;;  %v2325_v38 = vadd.f32 %v5275_v52, %v1711_v20  ;;  %v5485_v20 = vpop.f32.mrf.mxu0 }
 0x23f   : > { %1974 = vmatmul.bf16.vlgmr.msra.gmra.mxu3 %v4061_v42  ;;  %2043 = vmatmul.bf16.gmra.mxu0 %v4966_v31 }
 0x240   : > { %v5481_v46 = vmax.f32 %v2291_v1, %v2325_v38  ;;  %1906 = vmatmul.bf16.gmra.mxu1 %v5075_v27  ;;  %2740 = vmatpush.bf16.msrb.mxu0 %v3829_v39 }
 0x241   : > { %1955 = vmatmul.bf16.gmra.mxu2 %v5075_v27  ;;  %3850 = vmatpush.bf16.msra.mxu1 %v3829_v39  ;;  %v3827_v39 = vld [vmem:[#allocation8 + $0x18] sm:$0xff] }
 0x242   : > { %v1779_v34 = vpop.f32.mrf.mxu3 }
 0x243   : > { %v5488_v31 = vadd.f32 %v5479_v62, %v1779_v34 }
 0x244   : > { %v1760_v42 = vpop.f32.mrf.mxu2  ;;  %2741 = vmatpush.bf16.msrb.mxu0 %v3828_v7 }
 0x245   : > { %5997 = vst [vmem:[#allocation31_spill] sm:$0xff] %v5488_v31  ;;  %v5491_v11 = vadd.f32 %v5306_v19, %v1760_v42  ;;  %v5495_v1 = vpop.f32.mrf.mxu1  ;;  %3851 = vmatpush.bf16.msra.mxu1 %v3828_v7  ;;  %v3826_v7 = vld [vmem:[#allocation8 + $0x10] sm:$0xff] }
 0x246   : > { %v5504_v40 = vpop.f32.mrf.mxu0 }
 0x247   : > { %5998 = vst [vmem:[#allocation32_spill] sm:$0xff] %v5491_v11 }
 0x248   : > { %2742 = vmatpush.bf16.msrb.mxu0 %v3827_v39 }
 0x249   : > { %3852 = vmatpush.bf16.msra.mxu1 %v3827_v39 }
 0x24a   : > { %v1781_v34 = vpop.f32.mrf.mxu3 }
 0x24b   : > { %v5502_v42 = vadd.f32 %v5479_v62, %v1781_v34 }
 0x24c   : > { %v5499_v41 = vpop.f32.mrf.mxu2  ;;  %2743 = vmatpush.bf16.msrb.mxu0 %v3826_v7 }
 0x24d   : > { %5999 = vst [vmem:[#allocation33_spill] sm:$0xff] %v5502_v42  ;;  %v1716_v31 = vpop.f32.mrf.mxu1  ;;  %3853 = vmatpush.bf16.msra.mxu1 %v3826_v7  ;;  %v4064_v7 = vld [vmem:[%s4463_s11 + $0x10] sm:$0xff] }
 0x24e   : > { %v2329_v9 = vadd.f32 %v5275_v52, %v1716_v31 }
 0x24f   : > { %1979 = vmatmul.bf16.gmra.mxu3 %v4063_v29  ;;  %2048 = vmatmul.bf16.gmra.mxu0 %v5016_v49  ;;  %v5525_v29 = vpop.f32.mrf.mxu0 }
 0x250   : > { %v5511_v11 = vmax.f32 %v2295_v53, %v2329_v9  ;;  %1911 = vmatmul.bf16.gmra.mxu1 %v5134_v58  ;;  %v3825_v9 = vld [vmem:[#allocation8 + $0x8] sm:$0xff]  ;;  %v5537_v53 = vperm.slane %v5303_v61, 6 }
 0x251   : > { %1960 = vmatmul.bf16.gmra.mxu2 %v5134_v58  ;;  %2744 = vmatpush.bf16.msrb.mxu0 %v3825_v9 }
 0x252   : > { %v1784_v34 = vpop.f32.mrf.mxu3  ;;  %3854 = vmatpush.bf16.msra.mxu1 %v3825_v9  ;;  %v2434_v49 = vadd.f32 %v5537_v53, %v5447_v12 }
 0x253   : > { %v5516_v42 = vadd.f32 %v5479_v62, %v1784_v34 }
 0x254   : > { %v1765_v38 = vpop.f32.mrf.mxu2 }
 0x255   : > { %6000 = vst [vmem:[#allocation34_spill] sm:$0xff] %v5516_v42  ;;  %v5519_v31 = vadd.f32 %v5306_v19, %v1765_v38  ;;  %2745 = vmatpush.bf16.msrb.mxu0 %v3824_v13  ;;  %v5545_v42 = vperm.slane %v5303_v61, 7 }
 0x256   : > { %3855 = vmatpush.bf16.msra.mxu1 %v3824_v13  ;;  %v2432_v13 = vadd.f32 %v5537_v53, %v5432_v16 }
 0x257   : > { %6001 = vst [vmem:[#allocation35_spill] sm:$0xff] %v5519_v31  ;;  %v5539_v9 = vpop.f32.mrf.mxu0 }
 0x25a   : > { %v1786_v39 = vpop.f32.mrf.mxu3 }
 0x25b   : > { %v5530_v38 = vadd.f32 %v5479_v62, %v1786_v39 }
 0x25c   : > { %v5527_v34 = vpop.f32.mrf.mxu2 }
 0x25d   : > { %6002 = vst [vmem:[#allocation36_spill] sm:$0xff] %v5527_v34 }
 0x25e   : > { %6003 = vst [vmem:[#allocation37_spill] sm:$0xff] %v5530_v38 }
 0x25f   : > { %1984 = vmatmul.bf16.gmra.mxu3 %v4064_v7  ;;  %2053 = vmatmul.bf16.gmra.mxu0 %v5075_v27  ;;  %v5557_v14 = vpop.f32.mrf.mxu0  ;;  %v6006_v27 = vmax.f32 %v4990_v17, %v5329_v32  ;;  %v2436_v17 = vadd.f32 %v5537_v53, %v5464_v45 }
 0x262   : > { %v1789_v31 = vpop.f32.mrf.mxu3 }
 0x263   : > { %v5542_v35 = vadd.f32 %v5479_v62, %v1789_v31  ;;  %v6005_v31 = vmax.f32 %v4963_v5, %v5310_v56  ;;  %v4065_v5 = vld [vmem:[%s4463_s11 + $0x18] sm:$0xff] }
 0x264   : > { %v1926_v39 = vpop.f32.mrf.mxu2 }
 0x265   : > { %6004 = vst [vmem:[#allocation38_spill] sm:$0xff] %v5542_v35  ;;  %v2498_v7 = vadd.f32 %v5545_v42, %v1926_v39  ;;  %v2464_v38 = vmax.f32 %v6005_v31, %v2432_v13  ;;  %v2466_v35 = vmax.f32 %v6006_v27, %v2434_v49 }
 0x267   : > { %v2530_v61 = vmax.f32 %v2464_v38, %v2498_v7  ;;  %v5575_v32 = vpop.f32.mrf.mxu0  ;;  %v6007_v7 = vmax.f32 %v5983_v26, %v5349_v54  ;;  %v4066_v54 = vld [vmem:[%s4463_s11 + $0x20] sm:$0xff] }
 0x269   : > { %3956 = vtanh.f32 %v2530_v61  ;;  %v2468_v31 = vmax.f32 %v6007_v7, %v2436_v17 }
 0x26a   : > { %v1791_v36 = vpop.f32.mrf.mxu3 }
 0x26b   : > { %v5560_v34 = vadd.f32 %v5479_v62, %v1791_v36 }
 0x26c   : > { %v1928_v16 = vpop.f32.mrf.mxu2 }
 0x26d   : > { %v2500_v39 = vadd.f32 %v5545_v42, %v1928_v16  ;;  %v2409_v12 = vmax.f32 %v5382_v33, %v5560_v34 }
 0x26f   : > { %v2532_v18 = vmax.f32 %v2466_v35, %v2500_v39  ;;  %1989 = vmatmul.bf16.gmra.mxu3 %v4065_v5  ;;  %2058 = vmatmul.bf16.gmra.mxu0 %v5134_v58  ;;  %v3957_v13 = vpop.eup %3956  ;;  %v6008_v5 = vmax.f32 %v5987_v4, %v5362_v48  ;;  %v2440_v48 = vadd.f32 %v5537_v53, %v5504_v40 }
 0x270   : > { %v6010_v40 = vmax.f32 %v5110_v30, %v5385_v55  ;;  %v4067_v30 = vld [vmem:[%s4463_s11 + $0x28] sm:$0xff] }
 0x271   : > { %3958 = vtanh.f32 %v2532_v18  ;;  %v2438_v18 = vadd.f32 %v5537_v53, %v5485_v20 }
 0x272   : > { %v1794_v56 = vpop.f32.mrf.mxu3 }
 0x273   : > { %v5571_v36 = vadd.f32 %v5479_v62, %v1794_v56  ;;  %v2470_v56 = vmax.f32 %v6008_v5, %v2438_v18  ;;  %v2319_v18 = vadd.f32 %v5275_v52, %v5435_v25 }
 0x274   : > { %v1931_v38 = vpop.f32.mrf.mxu2 }
 0x275   : > { %v2411_v35 = vmax.f32 %v5397_v51, %v5571_v36  ;;  %v2502_v58 = vadd.f32 %v5545_v42, %v1931_v38 }
 0x277   : > { %v3959_v49 = vpop.eup %3958  ;;  %v2534_v16 = vmax.f32 %v2468_v31, %v2502_v58 }
 0x278   : > { %v2594_v27 = vpack.c.bf16 %v3959_v49, %v3957_v13  ;;  %v5594_v49 = vpop.f32.mrf.mxu0 }
 0x279   : > { %3960 = vtanh.f32 %v2534_v16 }
 0x27a   : > { %v1796_v61 = vpop.f32.mrf.mxu3 }
 0x27b   : > { %v5586_v45 = vadd.f32 %v5479_v62, %v1796_v61  ;;  %v2442_v61 = vadd.f32 %v5537_v53, %v5525_v29 }
 0x27c   : > { %v1933_v39 = vpop.f32.mrf.mxu2 }
 0x27d   : > { %v2504_v13 = vadd.f32 %v5545_v42, %v1933_v39  ;;  %v2413_v38 = vmax.f32 %v5409_v15, %v5586_v45  ;;  %v3839_v39 = vld [vmem:[#allocation8 + $0x78] sm:$0xff] }
 0x27e   : > { %3856 = vmatpush.bf16.msra.mxu2 %v3839_v39  ;;  %2787 = vmatpush.bf16.msra.mxu0 %v3839_v39  ;;  %v6012_v39 = vmax.f32 %v5991_v10, %v5403_v8 }
 0x27f   : > { %v2536_v20 = vmax.f32 %v2470_v56, %v2504_v13  ;;  %1994 = vmatmul.bf16.gmra.mxu3 %v4066_v54  ;;  %2746 = vmatmul.bf16.vlgmr.msrb.gmra.mxu0 %v2594_v27  ;;  %v3961_v58 = vpop.eup %3960  ;;  %v6009_v27 = vmax.f32 %v5990_v63, %v5376_v3  ;;  %v5612_v56 = vmax.f32 %v6010_v40, %v2319_v18 }
 0x280   : > { %v6011_v3 = vmax.f32 %v5105_v50, %v5388_v22  ;;  %v2444_v50 = vadd.f32 %v5537_v53, %v5539_v9  ;;  %v3838_v9 = vld [vmem:[#allocation8 + $0x70] sm:$0xff] }
 0x281   : > { %3962 = vtanh.f32 %v2536_v20  ;;  %v2472_v16 = vmax.f32 %v6009_v27, %v2440_v48 }
 0x282   : > { %v5597_v26 = vpop.f32.mrf.mxu3  ;;  %v2474_v63 = vmax.f32 %v6011_v3, %v2442_v61  ;;  %3857 = vmatpush.bf16.msra.mxu2 %v3838_v9  ;;  %2788 = vmatpush.bf16.msra.mxu0 %v3838_v9  ;;  %v2450_v9 = vadd.f32 %v5537_v53, %v5594_v49 }
 0x284   : > { %v1936_v17 = vpop.f32.mrf.mxu2 }
 0x285   : > { %v2506_v31 = vadd.f32 %v5545_v42, %v1936_v17 }
 0x287   : > { %v3963_v4 = vpop.eup %3962  ;;  %v2538_v25 = vmax.f32 %v2472_v16, %v2506_v31  ;;  %v2323_v31 = vadd.f32 %v5275_v52, %v5460_v60  ;;  %v2446_v16 = vadd.f32 %v5537_v53, %v5557_v14  ;;  %v6014_v14 = vmax.f32 %v5164_v6, %v5415_v28 }
 0x288   : > { %v2596_v7 = vpack.c.bf16 %v3963_v4, %v3961_v58  ;;  %v5627_v4 = vpop.f32.mrf.mxu1 }
 0x289   : > { %3964 = vtanh.f32 %v2538_v25  ;;  %v6013_v25 = vmax.f32 %v5169_v37, %v5412_v2  ;;  %v2478_v8 = vmax.f32 %v6014_v14, %v2446_v16  ;;  %v4068_v2 = vld [vmem:[%s4463_s11 + $0x30] sm:$0xff]  ;;  %v2327_v16 = vadd.f32 %v5275_v52, %v5495_v1 }
 0x28a   : > { %2751 = vmatmul.bf16.vlgmr.msra.gmra.mxu1 %v2596_v7  ;;  %v1801_v5 = vpop.f32.mrf.mxu3  ;;  %v6016_v1 = vmax.f32 %v5224_v57, %v5440_v59  ;;  %v4069_v57 = vld [vmem:[%s4463_s11 + $0x38] sm:$0xff] }
 0x28b   : > { %v5615_v13 = vadd.f32 %v5479_v62, %v1801_v5  ;;  %v2476_v5 = vmax.f32 %v6012_v39, %v2444_v50  ;;  %v3833_v59 = vld [vmem:[#allocation8 + $0x48] sm:$0xff] }
 0x28c   : > { %v1938_v20 = vpop.f32.mrf.mxu2  ;;  %v5681_v14 = vmax.f32 %v6016_v1, %v2327_v16  ;;  %v6018_v1 = vld [vmem:[#allocation23_spill] sm:$0xff] }
 0x28d   : > { %v2508_v29 = vadd.f32 %v5545_v42, %v1938_v20  ;;  %v2417_v54 = vmax.f32 %v5612_v56, %v5615_v13  ;;  %v5644_v20 = vmax.f32 %v6013_v25, %v2323_v31  ;;  %v6015_v25 = vmax.f32 %v5190_v0, %v5430_v47  ;;  %v3834_v47 = vld [vmem:[#allocation8 + $0x50] sm:$0xff] }
 0x28e   : > { %v6031_v16 = vld [vmem:[#allocation27_spill] sm:$0xff] }
 0x28f   : > { %v2540_v17 = vmax.f32 %v2474_v63, %v2508_v29  ;;  %1999 = vmatmul.bf16.gmra.mxu3 %v4067_v30  ;;  %v3965_v18 = vpop.eup %3964  ;;  %v3837_v30 = vld [vmem:[#allocation8 + $0x68] sm:$0xff] }
 0x290   : > { %2789 = vmatpush.bf16.msra.mxu0 %v3837_v30  ;;  %3858 = vmatpush.bf16.msra.mxu2 %v3837_v30 }
 0x291   : > { %3966 = vtanh.f32 %v2540_v17  ;;  %v5655_v17 = vpop.f32.mrf.mxu1 }
 0x292   : > { %v1804_v55 = vpop.f32.mrf.mxu3 }
 0x293   : > { %v5625_v58 = vadd.f32 %v5479_v62, %v1804_v55 }
 0x294   : > { %v1941_v48 = vpop.f32.mrf.mxu2 }
 0x295   : > { %v2419_v22 = vmax.f32 %v5451_v24, %v5625_v58  ;;  %v2510_v61 = vadd.f32 %v5545_v42, %v1941_v48  ;;  %v1853_v48 = vpop.f32.mrf.mxu0 }
 0x297   : > { %v3967_v7 = vpop.eup %3966  ;;  %v2542_v60 = vmax.f32 %v2476_v5, %v2510_v61 }
 0x298   : > { %v2598_v27 = vpack.c.bf16 %v3967_v7, %v3965_v18  ;;  %v3836_v18 = vld [vmem:[#allocation8 + $0x60] sm:$0xff]  ;;  %v2448_v7 = vadd.f32 %v5537_v53, %v5575_v32  ;;  %v3835_v32 = vld [vmem:[#allocation8 + $0x58] sm:$0xff] }
 0x299   : > { %3968 = vtanh.f32 %v2542_v60  ;;  %2790 = vmatpush.bf16.msra.mxu0 %v3836_v18  ;;  %3859 = vmatpush.bf16.msra.mxu2 %v3836_v18 }
 0x29a   : > { %2756 = vmatmul.bf16.gmra.mxu1 %v2598_v27  ;;  %v1806_v40 = vpop.f32.mrf.mxu3  ;;  %v2384_v27 = vadd.f32 %v5306_v19, %v5442_v23  ;;  %v2480_v60 = vmax.f32 %v6015_v25, %v2448_v7  ;;  %v3832_v7 = vld [vmem:[#allocation8 + $0x40] sm:$0xff] }
 0x29b   : > { %v5647_v3 = vadd.f32 %v5479_v62, %v1806_v40  ;;  %v5672_v40 = vpop.f32.mrf.mxu1 }
 0x29c   : > { %v1943_v63 = vpop.f32.mrf.mxu2  ;;  %v2416_v23 = vmax.f32 %v5219_v21, %v2384_v27  ;;  %v2452_v27 = vadd.f32 %v5537_v53, %v1853_v48  ;;  %v6019_v48 = vld [vmem:[#allocation21_spill] sm:$0xff] }
 0x29d   : > { %v2512_v10 = vadd.f32 %v5545_v42, %v1943_v63  ;;  %v2421_v29 = vmax.f32 %v5644_v20, %v5647_v3  ;;  %2791 = vmatpush.bf16.msra.mxu0 %v3835_v32  ;;  %3860 = vmatpush.bf16.msra.mxu2 %v3835_v32  ;;  %v2331_v32 = vadd.f32 %v5275_v52, %v5627_v4  ;;  %v6032_v21 = vld [vmem:[#allocation33_spill] sm:$0xff] }
 0x29f   : > { %v2544_v37 = vmax.f32 %v2478_v8, %v2512_v10  ;;  %2004 = vmatmul.bf16.gmra.mxu3 %v4068_v2  ;;  %v3969_v50 = vpop.eup %3968  ;;  %v1855_v2 = vpop.f32.mrf.mxu0 }
 0x2a1   : > { %3970 = vtanh.f32 %v2544_v37  ;;  %v2482_v37 = vmax.f32 %v2416_v23, %v2450_v9  ;;  %2792 = vmatpush.bf16.msra.mxu0 %v3834_v47  ;;  %3861 = vmatpush.bf16.msra.mxu2 %v3834_v47 }
 0x2a2   : > { %v1809_v55 = vpop.f32.mrf.mxu3 }
 0x2a3   : > { %v5659_v6 = vadd.f32 %v5479_v62, %v1809_v55  ;;  %v5690_v55 = vpop.f32.mrf.mxu1 }
 0x2a4   : > { %v1946_v28 = vpop.f32.mrf.mxu2 }
 0x2a5   : > { %v2423_v31 = vmax.f32 %v5481_v46, %v5659_v6  ;;  %v2514_v39 = vadd.f32 %v5545_v42, %v1946_v28  ;;  %2793 = vmatpush.bf16.msra.mxu0 %v3833_v59  ;;  %3862 = vmatpush.bf16.msra.mxu2 %v3833_v59 }
 0x2a7   : > { %v3971_v61 = vpop.eup %3970  ;;  %v2546_v49 = vmax.f32 %v2480_v60, %v2514_v39  ;;  %v1858_v25 = vpop.f32.mrf.mxu0 }
 0x2a8   : > { %v2600_v5 = vpack.c.bf16 %v3971_v61, %v3969_v50 }
 0x2a9   : > { %3972 = vtanh.f32 %v2546_v49  ;;  %2794 = vmatpush.bf16.msra.mxu0 %v3832_v7  ;;  %3863 = vmatpush.bf16.msra.mxu2 %v3832_v7  ;;  %v6020_v49 = vmax.f32 %v6018_v1, %v6019_v48  ;;  %v2456_v48 = vadd.f32 %v5537_v53, %v1858_v25  ;;  %v6028_v25 = vld [vmem:[#allocation32_spill] sm:$0xff] }
 0x2aa   : > { %2761 = vmatmul.bf16.gmra.mxu1 %v2600_v5  ;;  %v1811_v63 = vpop.f32.mrf.mxu3  ;;  %v6017_v5 = vld [vmem:[#allocation22_spill] sm:$0xff] }
 0x2ab   : > { %v5684_v8 = vadd.f32 %v5479_v62, %v1811_v63  ;;  %v2388_v9 = vadd.f32 %v5306_v19, %v6017_v5  ;;  %v2454_v63 = vadd.f32 %v5537_v53, %v1855_v2  ;;  %v1884_v2 = vpop.f32.mrf.mxu1  ;;  %v6025_v5 = vld [vmem:[#allocation30_spill] sm:$0xff] }
 0x2ac   : > { %v1948_v10 = vpop.f32.mrf.mxu2 }
 0x2ad   : > { %v2516_v0 = vadd.f32 %v5545_v42, %v1948_v10  ;;  %v2484_v10 = vmax.f32 %v6020_v49, %v2452_v27 }
 0x2af   : > { %v2548_v30 = vmax.f32 %v2482_v37, %v2516_v0  ;;  %2009 = vmatmul.bf16.gmra.mxu3 %v4069_v57  ;;  %v3973_v61 = vpop.eup %3972  ;;  %v6021_v37 = vld [vmem:[#allocation24_spill] sm:$0xff] }
 0x2b0   : > { %v2420_v0 = vmax.f32 %v6021_v37, %v2388_v9  ;;  %v6023_v57 = vld [vmem:[#allocation20_spill] sm:$0xff]  ;;  %v5720_v9 = vperm.slane %v6025_v5, 6 }
 0x2b1   : > { %3974 = vtanh.f32 %v2548_v30  ;;  %v6022_v30 = vld [vmem:[#allocation25_spill] sm:$0xff] }
 0x2b2   : > { %v1814_v28 = vpop.f32.mrf.mxu3  ;;  %v6024_v59 = vmax.f32 %v6022_v30, %v6023_v57  ;;  %v2486_v7 = vmax.f32 %v2420_v0, %v2454_v63  ;;  %v2433_v63 = vadd.f32 %v5720_v9, %v5655_v17  ;;  %v2392_v0 = vadd.f32 %v5306_v19, %v5499_v41  ;;  %v6026_v57 = vld [vmem:[#allocation31_spill] sm:$0xff]  ;;  %v6030_v41 = vld [vmem:[#allocation26_spill] sm:$0xff] }
 0x2b3   : > { %v5693_v18 = vadd.f32 %v5479_v62, %v1814_v28  ;;  %v2435_v17 = vadd.f32 %v5720_v9, %v5672_v40 }
 0x2b4   : > { %v1951_v50 = vpop.f32.mrf.mxu2  ;;  %v5711_v28 = vmax.f32 %v6024_v59, %v2331_v32  ;;  %v1860_v32 = vpop.f32.mrf.mxu0  ;;  %v6027_v59 = vmax.f32 %v5299_v44, %v6026_v57  ;;  %v6033_v44 = vmax.f32 %v6031_v16, %v6032_v21  ;;  %v2437_v21 = vadd.f32 %v5720_v9, %v5690_v55 }
 0x2b5   : > { %v2518_v60 = vadd.f32 %v5545_v42, %v1951_v50  ;;  %v2439_v55 = vadd.f32 %v5720_v9, %v1884_v2 }
 0x2b7   : > { %v3975_v39 = vpop.eup %3974  ;;  %v2550_v52 = vmax.f32 %v2484_v10, %v2518_v60  ;;  %v5723_v60 = vperm.slane %v6025_v5, 7 }
 0x2b8   : > { %v2602_v23 = vpack.c.bf16 %v3975_v39, %v3973_v61 }
 0x2b9   : > { %3976 = vtanh.f32 %v2550_v52  ;;  %v2465_v52 = vmax.f32 %v6027_v59, %v2433_v63  ;;  %v2467_v63 = vmax.f32 %v6033_v44, %v2435_v17 }
 0x2ba   : > { %2766 = vmatmul.bf16.gmra.mxu1 %v2602_v23  ;;  %v1816_v47 = vpop.f32.mrf.mxu3 }
 0x2bb   : > { %v5714_v4 = vadd.f32 %v5479_v62, %v1816_v47  ;;  %v5731_v47 = vpop.f32.mrf.mxu1 }
 0x2bc   : > { %v1953_v50 = vpop.f32.mrf.mxu2  ;;  %v1863_v57 = vpop.f32.mrf.mxu0 }
 0x2bd   : > { %v2520_v61 = vadd.f32 %v5545_v42, %v1953_v50 }
 0x2bf   : > { %v2552_v39 = vmax.f32 %v2486_v7, %v2520_v61  ;;  %v3977_v49 = vpop.eup %3976  ;;  %v6029_v7 = vmax.f32 %v5292_v43, %v6028_v25 }
 0x2c1   : > { %3978 = vtanh.f32 %v2552_v39  ;;  %v2488_v61 = vmax.f32 %v6029_v7, %v2456_v48  ;;  %v2458_v39 = vadd.f32 %v5537_v53, %v1860_v32 }
 0x2c2   : > { %v1975_v23 = vpop.f32.mrf.mxu3 }
 0x2c3   : > { %v2499_v10 = vadd.f32 %v5723_v60, %v1975_v23  ;;  %v2424_v23 = vmax.f32 %v6030_v41, %v2392_v0  ;;  %v6035_v41 = vld [vmem:[#allocation29_spill] sm:$0xff] }
 0x2c4   : > { %v1956_v1 = vpop.f32.mrf.mxu2 }
 0x2c5   : > { %v2522_v30 = vadd.f32 %v5545_v42, %v1956_v1  ;;  %v2531_v5 = vmax.f32 %v2465_v52, %v2499_v10  ;;  %v1889_v10 = vpop.f32.mrf.mxu1  ;;  %v2460_v52 = vadd.f32 %v5537_v53, %v1863_v57  ;;  %v6039_v57 = vld [vmem:[#allocation35_spill] sm:$0xff] }
 0x2c7   : > { %v3979_v37 = vpop.eup %3978  ;;  %v2554_v27 = vmax.f32 %v2488_v61, %v2522_v30  ;;  %3980 = vtanh.f32 %v2531_v5  ;;  %v6034_v61 = vld [vmem:[#allocation36_spill] sm:$0xff] }
 0x2c8   : > { %v2604_v50 = vpack.c.bf16 %v3979_v37, %v3977_v49  ;;  %v2490_v49 = vmax.f32 %v2424_v23, %v2458_v39  ;;  %v6036_v23 = vld [vmem:[#allocation34_spill] sm:$0xff] }
 0x2c9   : > { %3982 = vtanh.f32 %v2554_v27  ;;  %v2396_v27 = vadd.f32 %v5306_v19, %v6034_v61  ;;  %v6041_v19 = vld [vmem:[#allocation17_spill] sm:$0xff] }
 0x2ca   : > { %2771 = vmatmul.bf16.gmra.mxu1 %v2604_v50  ;;  %v1977_v1 = vpop.f32.mrf.mxu3  ;;  %v1865_v50 = vpop.f32.mrf.mxu0  ;;  %v6043_v61 = vld [vmem:[#allocation37_spill] sm:$0xff] }
 0x2cb   : > { %v2501_v40 = vadd.f32 %v5723_v60, %v1977_v1  ;;  %v6037_v1 = vmax.f32 %v6035_v41, %v6036_v23 }
 0x2cc   : > { %v1958_v59 = vpop.f32.mrf.mxu2 }
 0x2cd   : > { %v2524_v43 = vadd.f32 %v5545_v42, %v1958_v59  ;;  %v2533_v48 = vmax.f32 %v2467_v63, %v2501_v40  ;;  %v3981_v0 = vpop.eup %3980  ;;  %v2469_v44 = vmax.f32 %v6037_v1, %v2437_v21  ;;  %v6038_v59 = vld [vmem:[#allocation28_spill] sm:$0xff] }
 0x2ce   : > { %v6040_v40 = vmax.f32 %v6038_v59, %v6039_v57  ;;  %v6045_v57 = vld [vmem:[#allocation19_spill] sm:$0xff] }
 0x2cf   : > { %v2556_v32 = vmax.f32 %v2490_v49, %v2524_v43  ;;  %3984 = vtanh.f32 %v2533_v48  ;;  %v3983_v30 = vpop.eup %3982  ;;  %v2462_v43 = vadd.f32 %v5537_v53, %v1865_v50 }
 0x2d0   : > { %v2492_v49 = vmax.f32 %v6040_v40, %v2460_v52  ;;  %v6046_v40 = vld [vmem:[#allocation38_spill] sm:$0xff] }
 0x2d1   : > { %3986 = vtanh.f32 %v2556_v32  ;;  %v2428_v32 = vmax.f32 %v6041_v19, %v2396_v27 }
 0x2d2   : > { %v1980_v37 = vpop.f32.mrf.mxu3 }
 0x2d3   : > { %v2503_v25 = vadd.f32 %v5723_v60, %v1980_v37  ;;  %v1892_v37 = vpop.f32.mrf.mxu1 }
 0x2d4   : > { %v1961_v16 = vpop.f32.mrf.mxu2 }
 0x2d5   : > { %v3985_v17 = vpop.eup %3984  ;;  %v2526_v5 = vadd.f32 %v5545_v42, %v1961_v16  ;;  %v2535_v48 = vmax.f32 %v2469_v44, %v2503_v25 }
 0x2d6   : > { %v2595_v39 = vpack.c.bf16 %v3985_v17, %v3981_v0  ;;  %v6042_v17 = vld [vmem:[#allocation16_spill] sm:$0xff] }
 0x2d7   : > { %v3987_v7 = vpop.eup %3986  ;;  %v2558_v0 = vmax.f32 %v2492_v49, %v2526_v5  ;;  %v6044_v21 = vmax.f32 %v6042_v17, %v6043_v61  ;;  %3988 = vtanh.f32 %v2535_v48  ;;  %v2441_v5 = vadd.f32 %v5720_v9, %v5731_v47 }
 0x2d8   : > { %v2606_v63 = vpack.c.bf16 %v3987_v7, %v3983_v30  ;;  %2795 = vmatmul.bf16.vlgmr.msra.gmra.mxu0 %v2595_v39  ;;  %v2494_v7 = vmax.f32 %v2428_v32, %v2462_v43  ;;  %v6047_v49 = vmax.f32 %v6045_v57, %v6046_v40  ;;  %v2445_v61 = vadd.f32 %v5720_v9, %v1892_v37 }
 0x2d9   : > { %v2471_v41 = vmax.f32 %v6044_v21, %v2439_v55  ;;  %3990 = vtanh.f32 %v2558_v0 }
 0x2da   : > { %2776 = vmatmul.bf16.gmra.mxu1 %v2606_v63  ;;  %v1982_v16 = vpop.f32.mrf.mxu3  ;;  %v2473_v43 = vmax.f32 %v6047_v49, %v2441_v5  ;;  %v2477_v33 = vmax.f32 %v2411_v35, %v2445_v61 }
 0x2db   : > { %v2505_v30 = vadd.f32 %v5723_v60, %v1982_v16  ;;  %v1894_v23 = vpop.f32.mrf.mxu1 }
 0x2dc   : > { %v1963_v2 = vpop.f32.mrf.mxu2 }
 0x2dd   : > { %v2528_v52 = vadd.f32 %v5545_v42, %v1963_v2  ;;  %v2537_v53 = vmax.f32 %v2471_v41, %v2505_v30  ;;  %v3989_v27 = vpop.eup %3988  ;;  %v2443_v42 = vadd.f32 %v5720_v9, %v1889_v10  ;;  %v2447_v30 = vadd.f32 %v5720_v9, %v1894_v23 }
 0x2df   : > { %v2560_v50 = vmax.f32 %v2494_v7, %v2528_v52  ;;  %3992 = vtanh.f32 %v2537_v53  ;;  %v3991_v39 = vpop.eup %3990  ;;  %v2475_v47 = vmax.f32 %v2409_v12, %v2443_v42  ;;  %v2479_v52 = vmax.f32 %v2413_v38, %v2447_v30 }
 0x2e1   : > { %3994 = vtanh.f32 %v2560_v50  ;;  %v2383_v50 = vadd.f32 %v5479_v62, %v5597_v26 }
 0x2e2   : > { %v1985_v25 = vpop.f32.mrf.mxu3 }
 0x2e3   : > { %v2507_v63 = vadd.f32 %v5723_v60, %v1985_v25  ;;  %v1897_v16 = vpop.f32.mrf.mxu1 }
 0x2e4   : > { %v2449_v36 = vadd.f32 %v5720_v9, %v1897_v16 }
 0x2e5   : > { %v3993_v1 = vpop.eup %3992  ;;  %v2539_v48 = vmax.f32 %v2473_v43, %v2507_v63 }
 0x2e6   : > { %v2597_v55 = vpack.c.bf16 %v3993_v1, %v3989_v27 }
 0x2e7   : > { %v3995_v44 = vpop.eup %3994  ;;  %3996 = vtanh.f32 %v2539_v48 }
 0x2e8   : > { %v2608_v59 = vpack.c.bf16 %v3995_v44, %v3991_v39  ;;  %2800 = vmatmul.bf16.vlgmr.msra.gmra.mxu2 %v2597_v55  ;;  %v6048_v39 = vld [vmem:[#allocation18_spill] sm:$0xff] }
 0x2e9   : > { %v2415_v5 = vmax.f32 %v6048_v39, %v2383_v50 }
 0x2ea   : > { %2781 = vmatmul.bf16.gmra.mxu1 %v2608_v59  ;;  %v1987_v19 = vpop.f32.mrf.mxu3 }
 0x2eb   : > { %v2509_v32 = vadd.f32 %v5723_v60, %v1987_v19  ;;  %v1899_v34 = vpop.f32.mrf.mxu1  ;;  %v2481_v38 = vmax.f32 %v2415_v5, %v2449_v36 }
 0x2ec   : > { %v2451_v45 = vadd.f32 %v5720_v9, %v1899_v34 }
 0x2ed   : > { %v2541_v0 = vmax.f32 %v2475_v47, %v2509_v32  ;;  %v3997_v17 = vpop.eup %3996 }
 0x2ee   : > { %v2483_v62 = vmax.f32 %v2417_v54, %v2451_v45 }
 0x2ef   : > { %3998 = vtanh.f32 %v2541_v0 }
 0x2f2   : > { %v1990_v10 = vpop.f32.mrf.mxu3 }
 0x2f3   : > { %v2511_v41 = vadd.f32 %v5723_v60, %v1990_v10  ;;  %v1902_v25 = vpop.f32.mrf.mxu1 }
 0x2f4   : > { %v2453_v57 = vadd.f32 %v5720_v9, %v1902_v25 }
 0x2f5   : > { %v3999_v21 = vpop.eup %3998  ;;  %v2543_v12 = vmax.f32 %v2477_v33, %v2511_v41 }
 0x2f6   : > { %v2599_v2 = vpack.c.bf16 %v3999_v21, %v3997_v17  ;;  %v2485_v56 = vmax.f32 %v2419_v22, %v2453_v57 }
 0x2f7   : > { %4000 = vtanh.f32 %v2543_v12 }
 0x2f8   : > { %2805 = vmatmul.bf16.gmra.mxu2 %v2599_v2  ;;  %v6049_v2 = vmax.f32 %v5681_v14, %v5684_v8  ;;  %v6050_v14 = vmax.f32 %v5511_v11, %v5693_v18 }
 0x2fa   : > { %v1992_v7 = vpop.f32.mrf.mxu3 }
 0x2fb   : > { %v2513_v37 = vadd.f32 %v5723_v60, %v1992_v7  ;;  %v1904_v55 = vpop.f32.mrf.mxu1 }
 0x2fc   : > { %v2455_v19 = vadd.f32 %v5720_v9, %v1904_v55 }
 0x2fd   : > { %v2545_v53 = vmax.f32 %v2479_v52, %v2513_v37  ;;  %v4001_v51 = vpop.eup %4000 }
 0x2fe   : > { %v2487_v47 = vmax.f32 %v2421_v29, %v2455_v19 }
 0x2ff   : > { %4002 = vtanh.f32 %v2545_v53 }
 0x302   : > { %v1995_v27 = vpop.f32.mrf.mxu3 }
 0x303   : > { %v2515_v23 = vadd.f32 %v5723_v60, %v1995_v27  ;;  %v1907_v49 = vpop.f32.mrf.mxu1  ;;  %v5827_v27 = vpop.f32.mrf.mxu0 }
 0x304   : > { %v2457_v61 = vadd.f32 %v5720_v9, %v1907_v49 }
 0x305   : > { %v4003_v35 = vpop.eup %4002  ;;  %v2547_v1 = vmax.f32 %v2481_v38, %v2515_v23 }
 0x306   : > { %v2601_v15 = vpack.c.bf16 %v4003_v35, %v4001_v51  ;;  %v2489_v20 = vmax.f32 %v2423_v31, %v2457_v61  ;;  %v6051_v51 = vmax.f32 %v5711_v28, %v5714_v4 }
 0x307   : > { %4004 = vtanh.f32 %v2547_v1 }
 0x308   : > { %2810 = vmatmul.bf16.gmra.mxu2 %v2601_v15 }
 0x30a   : > { %v1997_v44 = vpop.f32.mrf.mxu3 }
 0x30b   : > { %v2517_v26 = vadd.f32 %v5723_v60, %v1997_v44  ;;  %v1909_v16 = vpop.f32.mrf.mxu1  ;;  %v5833_v23 = vpop.f32.mrf.mxu0 }
 0x30c   : > { %v2459_v22 = vadd.f32 %v5720_v9, %v1909_v16 }
 0x30d   : > { %v2549_v63 = vmax.f32 %v2483_v62, %v2517_v26  ;;  %v4005_v59 = vpop.eup %4004 }
 0x30e   : > { %v2491_v30 = vmax.f32 %v6049_v2, %v2459_v22 }
 0x30f   : > { %4006 = vtanh.f32 %v2549_v63 }
 0x312   : > { %v2000_v42 = vpop.f32.mrf.mxu3 }
 0x313   : > { %v2519_v43 = vadd.f32 %v5723_v60, %v2000_v42  ;;  %v1912_v3 = vpop.f32.mrf.mxu1  ;;  %v2029_v15 = vpop.f32.mrf.mxu0 }
 0x314   : > { %v2461_v52 = vadd.f32 %v5720_v9, %v1912_v3 }
 0x315   : > { %v4007_v40 = vpop.eup %4006  ;;  %v2551_v13 = vmax.f32 %v2485_v56, %v2519_v43 }
 0x316   : > { %v2603_v48 = vpack.c.bf16 %v4007_v40, %v4005_v59  ;;  %v2493_v8 = vmax.f32 %v6050_v14, %v2461_v52 }
 0x317   : > { %4008 = vtanh.f32 %v2551_v13 }
 0x318   : > { %2815 = vmatmul.bf16.gmra.mxu2 %v2603_v48 }
 0x31a   : > { %v2002_v54 = vpop.f32.mrf.mxu3 }
 0x31b   : > { %v2521_v32 = vadd.f32 %v5723_v60, %v2002_v54  ;;  %v1914_v37 = vpop.f32.mrf.mxu1  ;;  %v2031_v38 = vpop.f32.mrf.mxu0 }
 0x31c   : > { %v2463_v53 = vadd.f32 %v5720_v9, %v1914_v37 }
 0x31d   : > { %v2553_v0 = vmax.f32 %v2487_v47, %v2521_v32  ;;  %v4009_v17 = vpop.eup %4008 }
 0x31e   : > { %v2495_v36 = vmax.f32 %v6051_v51, %v2463_v53 }
 0x31f   : > { %4010 = vtanh.f32 %v2553_v0 }
 0x322   : > { %v2005_v10 = vpop.f32.mrf.mxu3 }
 0x323   : > { %v2523_v24 = vadd.f32 %v5723_v60, %v2005_v10  ;;  %v2752_v18 = vpop.f32.mrf.mxu1  ;;  %v2034_v44 = vpop.f32.mrf.mxu0 }
 0x324   : > { %v2753_v62 = vadd.f32 %v2752_v18, %v2029_v15 }
 0x325   : > { %v4011_v21 = vpop.eup %4010  ;;  %v2555_v29 = vmax.f32 %v2489_v20, %v2523_v24 }
 0x326   : > { %v2605_v58 = vpack.c.bf16 %v4011_v21, %v4009_v17 }
 0x327   : > { %4012 = vtanh.f32 %v2555_v29 }
 0x328   : > { %2820 = vmatmul.bf16.gmra.mxu2 %v2605_v58 }
 0x32a   : > { %v2007_v41 = vpop.f32.mrf.mxu3 }
 0x32b   : > { %v2525_v33 = vadd.f32 %v5723_v60, %v2007_v41  ;;  %v2754_v45 = vpop.f32.mrf.mxu1 }
 0x32c   : > { %v2755_v55 = vadd.f32 %v2754_v45, %v2031_v38 }
 0x32d   : > { %v2557_v34 = vmax.f32 %v2491_v30, %v2525_v33  ;;  %v4013_v7 = vpop.eup %4012 }
 0x32f   : > { %4014 = vtanh.f32 %v2557_v34 }
 0x332   : > { %v2010_v12 = vpop.f32.mrf.mxu3 }
 0x333   : > { %v2527_v6 = vadd.f32 %v5723_v60, %v2010_v12  ;;  %v2757_v1 = vpop.f32.mrf.mxu1 }
 0x334   : > { %v2758_v40 = vadd.f32 %v2757_v1, %v2034_v44 }
 0x335   : > { %v4015_v46 = vpop.eup %4014  ;;  %v2559_v50 = vmax.f32 %v2493_v8, %v2527_v6 }
 0x336   : > { %v2607_v31 = vpack.c.bf16 %v4015_v46, %v4013_v7 }
 0x337   : > { %4016 = vtanh.f32 %v2559_v50 }
 0x338   : > { %2825 = vmatmul.bf16.gmra.mxu2 %v2607_v31 }
 0x33a   : > { %v2012_v25 = vpop.f32.mrf.mxu3 }
 0x33b   : > { %v2529_v35 = vadd.f32 %v5723_v60, %v2012_v25  ;;  %v2759_v28 = vpop.f32.mrf.mxu1  ;;  %v2036_v60 = vpop.f32.mrf.mxu0 }
 0x33c   : > { %v2760_v56 = vadd.f32 %v2759_v28, %v2036_v60 }
 0x33d   : > { %v2561_v39 = vmax.f32 %v2495_v36, %v2529_v35  ;;  %v4017_v5 = vpop.eup %4016 }
 0x33f   : > { %4018 = vtanh.f32 %v2561_v39 }
 0x343   : > { %v2762_v59 = vpop.f32.mrf.mxu1  ;;  %v2039_v57 = vpop.f32.mrf.mxu0 }
 0x344   : > { %v2763_v32 = vadd.f32 %v2762_v59, %v2039_v57 }
 0x345   : > { %v4019_v9 = vpop.eup %4018 }
 0x346   : > { %v2609_v11 = vpack.c.bf16 %v4019_v9, %v4017_v5  ;;  %v5850_v9 = vld [vmem:[%s5914_s4] ss:$0 sm:$0xff] }
 0x348   : > { %2830 = vmatmul.bf16.gmra.mxu2 %v2609_v11 }
 0x34b   : > { %v2764_v48 = vpop.f32.mrf.mxu1  ;;  %v2041_v19 = vpop.f32.mrf.mxu0 }
 0x34c   : > { %v2765_v17 = vadd.f32 %v2764_v48, %v2041_v19 }
 0x353   : > { %v2767_v47 = vpop.f32.mrf.mxu1  ;;  %v2044_v0 = vpop.f32.mrf.mxu0 }
 0x354   : > { %v2768_v22 = vadd.f32 %v2767_v47, %v2044_v0 }
 0x35b   : > { %v2769_v61 = vpop.f32.mrf.mxu1  ;;  %v2046_v58 = vpop.f32.mrf.mxu0 }
 0x35c   : > { %v2770_v2 = vadd.f32 %v2769_v61, %v2046_v58 }
 0x363   : > { %v2772_v29 = vpop.f32.mrf.mxu1  ;;  %v2049_v41 = vpop.f32.mrf.mxu0 }
 0x364   : > { %v2773_v57 = vadd.f32 %v2772_v29, %v2049_v41 }
 0x36b   : > { %v2801_v4 = vpop.f32.mrf.mxu2  ;;  %v2774_v34 = vpop.f32.mrf.mxu1 }
 0x36c   : > { %v5835_v26 = vadd.f32 %v2801_v4, %v2753_v62  ;;  %v2051_v12 = vpop.f32.mrf.mxu0 }
 0x36d   : > { %v2775_v60 = vadd.f32 %v2774_v34, %v2051_v12 }
 0x373   : > { %v2803_v63 = vpop.f32.mrf.mxu2  ;;  %v2777_v52 = vpop.f32.mrf.mxu1 }
 0x374   : > { %v5837_v42 = vadd.f32 %v2803_v63, %v2755_v55  ;;  %v2054_v37 = vpop.f32.mrf.mxu0 }
 0x375   : > { %v2778_v44 = vadd.f32 %v2777_v52, %v2054_v37 }
 0x37b   : > { %v2806_v49 = vpop.f32.mrf.mxu2  ;;  %v2779_v6 = vpop.f32.mrf.mxu1 }
 0x37c   : > { %v5839_v43 = vadd.f32 %v2806_v49, %v2758_v40  ;;  %v2056_v53 = vpop.f32.mrf.mxu0 }
 0x37d   : > { %v2780_v15 = vadd.f32 %v2779_v6, %v2056_v53 }
 0x37e   : > { %v2844_v41 = vadd.f32 %v5850_v9, %v5839_v43 }
 0x383   : > { %v2808_v13 = vpop.f32.mrf.mxu2  ;;  %v2782_v8 = vpop.f32.mrf.mxu1 }
 0x384   : > { %v5841_v54 = vadd.f32 %v2808_v13, %v2760_v56  ;;  %v2059_v50 = vpop.f32.mrf.mxu0 }
 0x385   : > { %v2783_v35 = vadd.f32 %v2782_v8, %v2059_v50 }
 0x38b   : > { %v2811_v16 = vpop.f32.mrf.mxu2  ;;  %v2784_v51 = vpop.f32.mrf.mxu1 }
 0x38c   : > { %v5843_v10 = vadd.f32 %v2811_v16, %v2763_v32  ;;  %v2061_v36 = vpop.f32.mrf.mxu0 }
 0x38d   : > { %v2785_v39 = vadd.f32 %v2784_v51, %v2061_v36 }
 0x38e   : > { %v2846_v58 = vadd.f32 %v5850_v9, %v5843_v10 }
 0x393   : > { %v2813_v21 = vpop.f32.mrf.mxu2 }
 0x394   : > { %v5845_v24 = vadd.f32 %v2813_v21, %v2765_v17  ;;  %v2747_v56 = vpop.f32.mrf.mxu0 }
 0x395   : > { %v2748_v43 = vadd.f32 %v2747_v56, %v5827_v27  ;;  %v2872_v27 = vld [vmem:[#allocation10] sm:$0xff] }
 0x396   : > { %v2847_v61 = vadd.f32 %v5850_v9, %v5845_v24 }
 0x39b   : > { %v2816_v20 = vpop.f32.mrf.mxu2 }
 0x39c   : > { %v2817_v3 = vadd.f32 %v2816_v20, %v2768_v22  ;;  %v2749_v17 = vpop.f32.mrf.mxu0 }
 0x39e   : > { %v2848_v0 = vadd.f32 %v5850_v9, %v2817_v3  ;;  %v2845_v3 = vadd.f32 %v5850_v9, %v5841_v54  ;;  %v2842_v54 = vadd.f32 %v5850_v9, %v5835_v26 }
 0x3a3   : > { %v2818_v30 = vpop.f32.mrf.mxu2 }
 0x3a4   : > { %v2819_v33 = vadd.f32 %v2818_v30, %v2770_v2  ;;  %v2796_v20 = vpop.f32.mrf.mxu0  ;;  %v2843_v2 = vadd.f32 %v5850_v9, %v5837_v42 }
 0x3a6   : > { %v2849_v47 = vadd.f32 %v5850_v9, %v2819_v33  ;;  %v2750_v33 = vadd.f32 %v2749_v17, %v5833_v23 }
 0x3ab   : > { %v2821_v7 = vpop.f32.mrf.mxu2 }
 0x3ac   : > { %v2822_v40 = vadd.f32 %v2821_v7, %v2773_v57  ;;  %v2798_v10 = vpop.f32.mrf.mxu0  ;;  %v2797_v7 = vadd.f32 %v2796_v20, %v2748_v43 }
 0x3ad   : > { %v2799_v34 = vadd.f32 %v2798_v10, %v2750_v33 }
 0x3ae   : > { %v2850_v19 = vadd.f32 %v5850_v9, %v2822_v40  ;;  %v2840_v23 = vadd.f32 %v5850_v9, %v2797_v7 }
 0x3af   : > { %v2841_v52 = vadd.f32 %v5850_v9, %v2799_v34 }
 0x3b3   : > { %v2823_v46 = vpop.f32.mrf.mxu2 }
 0x3b4   : > { %v2824_v55 = vadd.f32 %v2823_v46, %v2775_v60 }
 0x3b6   : > { %v2851_v49 = vadd.f32 %v5850_v9, %v2824_v55 }
 0x3bb   : > { %v2826_v31 = vpop.f32.mrf.mxu2 }
 0x3bc   : > { %v2827_v62 = vadd.f32 %v2826_v31, %v2778_v44 }
 0x3be   : > { %v2852_v63 = vadd.f32 %v5850_v9, %v2827_v62 }
 0x3c3   : > { %v2828_v14 = vpop.f32.mrf.mxu2 }
 0x3c4   : > { %v2829_v38 = vadd.f32 %v2828_v14, %v2780_v15 }
 0x3c6   : > { %v2853_v28 = vadd.f32 %v5850_v9, %v2829_v38 }
 0x3cb   : > { %v2831_v25 = vpop.f32.mrf.mxu2 }
 0x3cc   : > { %v2832_v11 = vadd.f32 %v2831_v25, %v2783_v35 }
 0x3ce   : > { %v2854_v1 = vadd.f32 %v5850_v9, %v2832_v11 }
 0x3d3   : > { %v2833_v5 = vpop.f32.mrf.mxu2 }
 0x3d4   : > { %v2834_v18 = vadd.f32 %v2833_v5, %v2785_v39 }
 0x3d6   : > { %v2855_v45 = vadd.f32 %v5850_v9, %v2834_v18 }
 0x3d8   : > { %4020 = vtanh.f32 %v2855_v45 }
 0x3d9   : > { %4022 = vtanh.f32 %v2854_v1 }
 0x3da   : > { %4024 = vtanh.f32 %v2853_v28 }
 0x3db   : > { %4026 = vtanh.f32 %v2852_v63 }
 0x3dc   : > { %4028 = vtanh.f32 %v2851_v49 }
 0x3dd   : > { %4030 = vtanh.f32 %v2850_v19 }
 0x3de   : > { %v4021_v4 = vpop.eup %4020  ;;  %4032 = vtanh.f32 %v2849_v47 }
 0x3df   : > { %2873 = vmatpush.xpose.msrb.mxu3 %v4021_v4  ;;  %v4023_v59 = vpop.eup %4022  ;;  %4034 = vtanh.f32 %v2848_v0 }
 0x3e0   : > { %v4025_v48 = vpop.eup %4024  ;;  %4036 = vtanh.f32 %v2847_v61 }
 0x3e1   : > { %v4027_v13 = vpop.eup %4026  ;;  %4038 = vtanh.f32 %v2846_v58 }
 0x3e2   : > { %v4029_v32 = vpop.eup %4028  ;;  %4040 = vtanh.f32 %v2845_v3 }
 0x3e3   : > { %2874 = vmatpush.xpose.msrb.mxu3 %v4023_v59  ;;  %v4031_v16 = vpop.eup %4030  ;;  %4042 = vtanh.f32 %v2844_v41 }
 0x3e4   : > { %v4033_v21 = vpop.eup %4032  ;;  %4044 = vtanh.f32 %v2843_v2 }
 0x3e5   : > { %v4035_v22 = vpop.eup %4034  ;;  %4046 = vtanh.f32 %v2842_v54 }
 0x3e6   : > { %v4037_v29 = vpop.eup %4036  ;;  %4048 = vtanh.f32 %v2841_v52 }
 0x3e7   : > { %2875 = vmatpush.xpose.msrb.mxu3 %v4025_v48  ;;  %v4039_v24 = vpop.eup %4038  ;;  %4050 = vtanh.f32 %v2840_v23 }
 0x3e8   : > { %v4041_v30 = vpop.eup %4040 }
 0x3e9   : > { %v4043_v12 = vpop.eup %4042 }
 0x3ea   : > { %v4045_v42 = vpop.eup %4044 }
 0x3eb   : > { %2876 = vmatpush.xpose.msrb.mxu3 %v4027_v13  ;;  %v4047_v37 = vpop.eup %4046 }
 0x3ec   : > { %v4049_v26 = vpop.eup %4048 }
 0x3ed   : > { %v4051_v46 = vpop.eup %4050 }
 0x3ef   : > { %2877 = vmatpush.xpose.msrb.mxu3 %v4029_v32 }
 0x3f3   : > { %2878 = vmatpush.xpose.msrb.mxu3 %v4031_v16 }
 0x3f7   : > { %2879 = vmatpush.xpose.msrb.mxu3 %v4033_v21 }
 0x3fb   : > { %2880 = vmatpush.xpose.msrb.mxu3 %v4035_v22 }
 0x3ff   : > { %2881 = vmatpush.xpose.msrb.mxu3 %v4037_v29 }
 0x403   : > { %2882 = vmatpush.xpose.msrb.mxu3 %v4039_v24 }
 0x407   : > { %2883 = vmatpush.xpose.msrb.mxu3 %v4041_v30 }
 0x40b   : > { %2884 = vmatpush.xpose.msrb.mxu3 %v4043_v12 }
 0x40f   : > { %2885 = vmatpush.xpose.msrb.mxu3 %v4045_v42 }
 0x413   : > { %2886 = vmatpush.xpose.msrb.mxu3 %v4047_v37 }
 0x417   : > { %2887 = vmatpush.xpose.msrb.mxu3 %v4049_v26 }
 0x41b   : > { %2888 = vmatpush.xpose.msrb.mxu3 %v4051_v46 }
 0x41e   : > { %2889 = vmatmul.f32.vlgmr.msrb.gmra.mxu3 %v2872_v27 }
 0x4a1   : > { %v2890_v6 = vpop.f32.mrf.mxu3 }
 0x4a2   : > { %2893 = vst [vmem:[%s333_s10] sm:$0xff] %v2890_v6 }
 0x4a3   : > { %4247 = shalt.err (!%p4244_p10)
}
 0x4a4   : > { %3882 = dma.vmem_to_hbm [thread:$0]  (%p4426_p3), %s2908_s12, 128, %s2910_s30, %s2895_s13  }
 0x4a5 PF: > { %s2921_s7 = sand.u32 1, %s4282_s21   ;;  %p6052_p12 = scmp.ge.s32.totalorder %s4294_s24, 2 }
 0x4a6   : > { %s2922_s15 = scalar_lea.sflag [#allocation4], %s2921_s7 }
 0x4a7   : > { %p3902_p13 = pnand %p6052_p12, %p4374_p6 }
 0x4a9   : > { %p3903_p0 = pneg %p3902_p13 }
 0x4ab   : > { %4277 = dma.done.wait (%p3903_p0), %s2922_s15, 128  }
 0x4ac   : > { %4279 = vsyncadd (%p3903_p0), %s2922_s15, 4294967168  ;;  %p21_p5 = scmp.ge.s32.totalorder %s4416_s16, 4   ;;  %s6053_s21 = smov %s4286_s22 }
 0x4ad   : > { %s6054_s22 = smov %s4290_s23  ;;  %s6055_s23 = smov %s4432_s29 }
 0x4ae   : > { %s6056_s24 = smov %s4416_s16  ;;  %23 = sbr.rel (!%p21_p5) target bundleno = 7 (0x7), region = 105 }
 0x4b3   :  { %2928 = vsyncpa [#allocation3], 1 }
 0x4b4   :  { %2930 = vsyncpa [#allocation3 + $0x1], 1 }
 0x4b5   :  { %2931 = vsyncpa [#allocation6], 1 }
 0x4b6   :  { %2932 = vsyncpa [#allocation9], 1 }
 0x4b7   :  { %2933 = vsyncpa [#allocation4], 1 }
 0x4b8   :  { %2935 = vsyncpa [#allocation4 + $0x1], 1 }

</bundles_post_ra>
